<compile_context>
chip_gen: v7x
topology: tpu7x:2x2x1
jax: 0.10.0
libtpu: 0.0.40
codegen_flags: <defaults>
</compile_context>

<pallas_src>
import functools

import jax
import jax.numpy as jnp
from jax.experimental import pallas as pl
from jax.experimental.pallas import tpu as pltpu

# ----------------------------- small config ---------------------------------
VOCAB = 128                     # lane-dense LM-head output
D_MODEL = 32
EXPAND = 2
E_INNER = D_MODEL * EXPAND      # 64
N_STATE = 8
DT_RANK = 4
CONV_K = 4
N_LAYERS = 2
RMS_EPS = 1e-5
DBC_W = 128                     # lane-padded width of the fused x_proj/dt_proj output


# --------------------------- in-kernel helpers --------------------------------
def _swap_last2(x):
    """(B, M, N) -> (B, N, M) via per-batch 2-D transposes (B is static & tiny)."""
    return jnp.stack([x[b].T for b in range(x.shape[0])], axis=0)


def _embed_tokens(ids_ref, embed_ref):
    """Embedding gather fused as a one-hot (B*L, V) @ (V, D) MXU matmul."""
    BL = ids_ref.shape[0]
    V, _ = embed_ref.shape
    iota_v = jax.lax.broadcasted_iota(jnp.int32, (BL, V), 1)
    onehot = (iota_v == ids_ref[...]).astype(jnp.float32)        # (BL, V)
    return jnp.dot(onehot, embed_ref[...], preferred_element_type=jnp.float32)


def _mamba_block(hid, s0, norm_w, wi, conv_w, conv_b, wdbc, dt_b, A, d_skip, wo):
    """One Mamba block on in-vreg values.  hid: (B,L,D); s0: (B,N,E).
    Returns (hid + block_out, last_ssm_state (B,N,E))."""
    B, L, D = hid.shape
    K, E = conv_w.shape
    N = A.shape[0]

    # ---- RMSNorm -------------------------------------------------------------
    var = jnp.mean(hid * hid, axis=-1, keepdims=True)
    xn = hid * jax.lax.rsqrt(var + RMS_EPS) * norm_w              # (1, D) broadcasts

    # ---- in_proj: lane-dense (B*L, 2E=128) output; split hidden / gate -------
    proj = jnp.dot(xn.reshape(B * L, D), wi, preferred_element_type=jnp.float32)
    hs = proj[:, :E].reshape(B, L, E)
    gate = proj[:, E:].reshape(B, L, E)

    # ---- depthwise causal conv (K taps) + SiLU, accumulated in vregs ---------
    acc = conv_b + hs * conv_w[K - 1:K, :]                        # shift-0 tap + bias
    for shift in range(1, K):                                     # static: K = 4
        shifted = jnp.concatenate(
            [jnp.zeros((B, shift, E), jnp.float32), hs[:, :L - shift, :]], axis=1)
        acc = acc + shifted * conv_w[K - 1 - shift:K - shift, :]
    u = acc * jax.nn.sigmoid(acc)                                 # conv branch (B, L, E)

    # ---- fused x_proj (+ folded dt_proj): lane-padded 128-wide matmul output --
    dbc = jnp.dot(u.reshape(B * L, E), wdbc,
                  preferred_element_type=jnp.float32)             # (B*L, 128)
    dt_lin = dbc[:, :E] + dt_b
    # stable softplus built from ops guaranteed to lower on TPU
    delta = (jnp.maximum(dt_lin, 0.0)
             + jnp.log(1.0 + jnp.exp(-jnp.abs(dt_lin)))).reshape(B, L, E)
    Bm = dbc[:, E:E + N].reshape(B, L, N)
    Cm = dbc[:, E + N:E + 2 * N].reshape(B, L, N)

    # ---- selective scan: hoist discretization & gating out of the time loop ---
    # TODO(synk): at non-toy L this must be tiled over L (state carried across tiles).
    dA = jnp.exp(delta[:, :, None, :] * A)                        # (B, L, N, E)
    dBu = (delta * u)[:, :, None, :] * Bm[:, :, :, None]          # (B, L, N, E)
    Cme = Cm[:, :, :, None]                                       # (B, L, N, 1)

    state = s0
    ys = []
    for t in range(L):                                            # static unroll, L = 8
        state = dA[:, t] * state + dBu[:, t]
        ys.append(jnp.sum(state * Cme[:, t], axis=1))             # (B, E) stays in vregs
    y = jnp.stack(ys, axis=1)                                     # (B, L, E)

    # ---- D-skip + SiLU(gate), out_proj, residual -------------------------------
    y = (y + u * d_skip) * (gate * jax.nn.sigmoid(gate))
    out = jnp.dot(y.reshape(B * L, E), wo, preferred_element_type=jnp.float32)
    return hid + out.reshape(B, L, D), state


# ----------------------------- Pallas kernels --------------------------------
def _encoder_kernel(ids_ref, embed_ref,
                    norm_w_ref, wi_ref, conv_w_ref, conv_b_ref, wdbc_ref, dt_b_ref,
                    a_ref, d_ref, wo_ref,
                    states_ref, hid_ref):
    """Fused encoder backbone: grid=(N_LAYERS,), hidden resident in VMEM scratch."""
    layer = pl.program_id(0)
    B, L, D = hid_ref.shape
    N, E = a_ref.shape[1], a_ref.shape[2]

    @pl.when(layer == 0)
    def _():                                                      # fused embedding
        hid_ref[...] = _embed_tokens(ids_ref, embed_ref).reshape(B, L, D)

    new_hid, state = _mamba_block(
        hid_ref[...], jnp.zeros((B, N, E), jnp.float32),
        norm_w_ref[0], wi_ref[0], conv_w_ref[0], conv_b_ref[0],
        wdbc_ref[0], dt_b_ref[0], a_ref[0], d_ref[0], wo_ref[0])
    hid_ref[...] = new_hid
    # write directly in module-contract layout (B, E_inner, N_state)
    states_ref[0] = _swap_last2(state)
    # encoder's norm_f output is unused by MambaVAE -> skipped entirely.


def _decoder_kernel(ids_ref, embed_ref, s0_ref,
                    norm_w_ref, wi_ref, conv_w_ref, conv_b_ref, wdbc_ref, dt_b_ref,
                    a_ref, d_ref, wo_ref,
                    norm_f_ref, lmh_ref,
                    logits_ref, hid_ref):
    """Fused decoder backbone + final RMSNorm + tied LM head."""
    layer = pl.program_id(0)
    n_layers = pl.num_programs(0)
    B, L, D = hid_ref.shape

    @pl.when(layer == 0)
    def _():                                                      # fused embedding
        hid_ref[...] = _embed_tokens(ids_ref, embed_ref).reshape(B, L, D)

    s0 = _swap_last2(s0_ref[0])                                   # (B,E,N) -> (B,N,E)
    new_hid, _ = _mamba_block(
        hid_ref[...], s0,
        norm_w_ref[0], wi_ref[0], conv_w_ref[0], conv_b_ref[0],
        wdbc_ref[0], dt_b_ref[0], a_ref[0], d_ref[0], wo_ref[0])
    hid_ref[...] = new_hid

    @pl.when(layer == n_layers - 1)
    def _():                                                      # fused norm_f + head
        var = jnp.mean(new_hid * new_hid, axis=-1, keepdims=True)
        xn = new_hid * jax.lax.rsqrt(var + RMS_EPS) * norm_f_ref[...]
        V = lmh_ref.shape[1]
        # TODO(synk): real-size head needs vocab tiling (128-multiple tiles, bf16
        #             operands, f32 acc) and a fused shifted-NLL loss.
        logits_ref[...] = jnp.dot(xn.reshape(B * L, D), lmh_ref[...],
                                  preferred_element_type=jnp.float32).reshape(B, L, V)


# ----------------------------- kernel wrappers --------------------------------
def _cspec(shape):
    """Full-array block, same block every grid step (constant index map)."""
    nd = len(shape)
    return pl.BlockSpec(tuple(shape), lambda l, _nd=nd: (0,) * _nd)


def _wspec(shape):
    """Per-layer stacked weight: leading layer axis selected by the grid index."""
    nd = len(shape)
    return pl.BlockSpec((1,) + tuple(shape), lambda l, _nd=nd: (l,) + (0,) * _nd)


def _layer_specs():
    return [_wspec((1, D_MODEL)),                          # rmsnorm weight
            _wspec((D_MODEL, 2 * E_INNER)),                # in_proj (pre-transposed)
            _wspec((CONV_K, E_INNER)),                     # depthwise conv taps
            _wspec((1, E_INNER)),                          # conv bias
            _wspec((E_INNER, DBC_W)),                      # fused x_proj/dt_proj (padded)
            _wspec((1, E_INNER)),                          # dt_proj bias
            _wspec((N_STATE, E_INNER)),                    # A = -exp(A_log), (N, E)
            _wspec((1, E_INNER)),                          # D skip
            _wspec((E_INNER, D_MODEL))]                    # out_proj (pre-transposed)


def encode_backbone(params, input_ids):
    """One pallas_call for the whole encoder; returns SSM last states (L, B, E, N)."""
    B, L = input_ids.shape
    ids_col = input_ids.reshape(B * L, 1)
    return pl.pallas_call(
        _encoder_kernel,
        out_shape=jax.ShapeDtypeStruct((N_LAYERS, B, E_INNER, N_STATE), jnp.float32),
        grid=(N_LAYERS,),
        in_specs=[_cspec((B * L, 1)),                      # token ids (column)
                  _cspec((VOCAB, D_MODEL)),                # embedding table
                  *_layer_specs()],
        out_specs=pl.BlockSpec((1, B, E_INNER, N_STATE), lambda l: (l, 0, 0, 0)),
        scratch_shapes=[pltpu.VMEM((B, L, D_MODEL), jnp.float32)],   # resident hidden
        compiler_params=pltpu.CompilerParams(dimension_semantics=("arbitrary",)),
    )(ids_col, params['embed'], *params['stacked'])


def decode_backbone(params, input_ids, init_states):
    """One pallas_call for the whole decoder + tied LM head; returns logits."""
    B, L = input_ids.shape
    ids_col = input_ids.reshape(B * L, 1)
    return pl.pallas_call(
        _decoder_kernel,
        out_shape=jax.ShapeDtypeStruct((B, L, VOCAB), jnp.float32),
        grid=(N_LAYERS,),
        in_specs=[_cspec((B * L, 1)),
                  _cspec((VOCAB, D_MODEL)),
                  pl.BlockSpec((1, B, E_INNER, N_STATE), lambda l: (l, 0, 0, 0)),
                  *_layer_specs(),
                  _cspec((1, D_MODEL)),                    # norm_f weight
                  _cspec((D_MODEL, VOCAB))],               # tied LM head (D, V)
        out_specs=_cspec((B, L, VOCAB)),
        scratch_shapes=[pltpu.VMEM((B, L, D_MODEL), jnp.float32)],   # resident hidden
        compiler_params=pltpu.CompilerParams(dimension_semantics=("arbitrary",)),
    )(ids_col, params['embed'], init_states, *params['stacked'],
      params['norm_f_w'], params['lm_head_t'])


# ------------------------------- JAX glue --------------------------------------
def causal_lm_loss(logits, labels):
    shift_logits = logits[:, :-1, :]
    shift_labels = labels[:, 1:]
    logp = jax.nn.log_softmax(shift_logits, axis=-1)
    nll = -jnp.take_along_axis(logp, shift_labels[..., None], axis=-1)[..., 0]
    return jnp.mean(nll)


# TODO(synk): attention_mask handling (HF multiplies hidden states by the mask around
#             the conv) is not implemented; attention_mask must be None.
@functools.partial(jax.jit, static_argnames=("do_sample", "training"))
def mamba_vae_forward(enc_params, dec_params, input_ids, noise_key,
                      do_sample=False, training=False):
    # encode -> per-layer last SSM states, already in contract layout (L, B, E, N)
    states = encode_backbone(enc_params, input_ids)
    # sample (matches reference module: kl = 0.5*sum(mu^2), additive noise std 0.5)
    if do_sample or training:
        kl_loss = 0.5 * jnp.sum(states * states)
        states = states + jax.random.normal(noise_key, states.shape, jnp.float32) * 0.5
    else:
        kl_loss = jnp.float32(0.0)
    # decode with sampled states as initial SSM states; tied LM head; CE loss vs ids
    # NOTE: conv states start at zero in the decoder (only SSM states are seeded).
    logits = decode_backbone(dec_params, input_ids, states)
    loss = causal_lm_loss(logits, input_ids)
    return loss, kl_loss / input_ids.shape[0], logits, states


# ------------------------------ param init / prep ------------------------------
def init_mamba_params(key):
    """Synthesize weights in torch-layout conventions (scaled-down config)."""
    keys = jax.random.split(key, 1 + N_LAYERS)

    def nrm(k, shape, scale=0.05):
        return jax.random.normal(k, shape, jnp.float32) * scale

    params = {
        'embed': nrm(keys[0], (VOCAB, D_MODEL), 0.05),
        'norm_f_w': jnp.ones((D_MODEL,), jnp.float32),
        'layers': [],
    }
    for i in range(N_LAYERS):
        lk = jax.random.split(keys[1 + i], 6)
        params['layers'].append({
            'norm_w': jnp.ones((D_MODEL,), jnp.float32),
            'in_proj_w': nrm(lk[0], (2 * E_INNER, D_MODEL)),      # torch Linear (out, in)
            'conv_w': nrm(lk[1], (CONV_K, E_INNER), 0.2),         # depthwise taps (K, E)
            'conv_b': jnp.zeros((E_INNER,), jnp.float32),
            'x_proj_w': nrm(lk[2], (DT_RANK + 2 * N_STATE, E_INNER)),
            'dt_proj_w': nrm(lk[3], (E_INNER, DT_RANK), 0.1),
            'dt_proj_b': nrm(lk[4], (E_INNER,), 0.1) + 0.5,
            'A_log': jnp.log(jnp.broadcast_to(
                jnp.arange(1, N_STATE + 1, dtype=jnp.float32), (E_INNER, N_STATE))),
            'D': jnp.ones((E_INNER,), jnp.float32),
            'out_proj_w': nrm(lk[5], (D_MODEL, E_INNER)),
        })
    return params


def prepare_mamba_params(raw):
    """One-time (outside jit) weight prep: f32 cast, pre-transpose to (in, out),
    fold dt_proj into x_proj (lane-padded to 128 columns), A = -exp(A_log) in (N, E)
    lane-major layout, and stack all per-layer weights along a leading layer axis."""
    embed = raw['embed'].astype(jnp.float32)
    pad = jnp.zeros((E_INNER, DBC_W - E_INNER - 2 * N_STATE), jnp.float32)
    norm_w, in_proj_t, conv_w, conv_b = [], [], [], []
    w_dbc, dt_b, a_t, d_skip, out_proj_t = [], [], [], [], []
    for lyr in raw['layers']:
        xw = lyr['x_proj_w'].astype(jnp.float32)                   # (R + 2N, E)
        dtw = lyr['dt_proj_w'].astype(jnp.float32)                 # (E, R)
        w_delta = (dtw @ xw[:DT_RANK, :]).T                        # (E, E) fold dt_proj
        w_bc = xw[DT_RANK:, :].T                                   # (E, 2N)
        norm_w.append(lyr['norm_w'].reshape(1, D_MODEL))
        in_proj_t.append(lyr['in_proj_w'].T)                       # (D, 2E)
        conv_w.append(lyr['conv_w'])                               # (K, E)
        conv_b.append(lyr['conv_b'].reshape(1, E_INNER))
        w_dbc.append(jnp.concatenate([w_delta, w_bc, pad], axis=1))  # (E, 128)
        dt_b.append(lyr['dt_proj_b'].reshape(1, E_INNER))
        a_t.append((-jnp.exp(lyr['A_log'])).T)                     # (N, E)
        d_skip.append(lyr['D'].reshape(1, E_INNER))
        out_proj_t.append(lyr['out_proj_w'].T)                     # (E, D)

    def stk(xs):
        return jnp.stack([x.astype(jnp.float32) for x in xs], axis=0)

    return {
        'embed': embed,                                            # (V, D)
        'norm_f_w': raw['norm_f_w'].reshape(1, D_MODEL).astype(jnp.float32),
        'lm_head_t': embed.T,                                      # tied head (D, V)
        'stacked': (stk(norm_w), stk(in_proj_t), stk(conv_w), stk(conv_b),
                    stk(w_dbc), stk(dt_b), stk(a_t), stk(d_skip), stk(out_proj_t)),
    }


# --------------------------------- main -----------------------------------------
if __name__ == "__main__":
    key = jax.random.PRNGKey(0)
    k_enc, k_dec, k_ids, k_noise = jax.random.split(key, 4)

    enc_params = prepare_mamba_params(init_mamba_params(k_enc))
    dec_params = prepare_mamba_params(init_mamba_params(k_dec))

    B, L = 2, 8
    input_ids = jax.random.randint(k_ids, (B, L), 0, VOCAB, dtype=jnp.int32)

    loss, kl, logits, states = mamba_vae_forward(
        enc_params, dec_params, input_ids, k_noise, do_sample=False, training=False)
    jax.block_until_ready((loss, kl, logits, states))

    assert logits.shape == (B, L, VOCAB)
    assert states.shape == (N_LAYERS, B, E_INNER, N_STATE)
    assert bool(jnp.isfinite(loss))
    print("KERNEL_OK")
</pallas_src>

<mosaic_0001>
module attributes {stable_mosaic.version = 11 : i64} {
  func.func @_encoder_kernel(%arg0: i32, %arg1: memref<16x1xi32, #tpu.memory_space<vmem>>, %arg2: memref<128x32xf32, #tpu.memory_space<vmem>>, %arg3: memref<1x1x32xf32, #tpu.memory_space<vmem>>, %arg4: memref<1x32x128xf32, #tpu.memory_space<vmem>>, %arg5: memref<1x4x64xf32, #tpu.memory_space<vmem>>, %arg6: memref<1x1x64xf32, #tpu.memory_space<vmem>>, %arg7: memref<1x64x128xf32, #tpu.memory_space<vmem>>, %arg8: memref<1x1x64xf32, #tpu.memory_space<vmem>>, %arg9: memref<1x8x64xf32, #tpu.memory_space<vmem>>, %arg10: memref<1x1x64xf32, #tpu.memory_space<vmem>>, %arg11: memref<1x64x32xf32, #tpu.memory_space<vmem>>, %arg12: memref<1x2x64x8xf32, #tpu.memory_space<vmem>>, %arg13: memref<2x8x32xf32, #tpu.memory_space<vmem>>) attributes {dimension_semantics = [#tpu.dimension_semantics<arbitrary>], iteration_bounds = array<i64: 2>, scalar_prefetch = 0 : i64, scratch_operands = 1 : i64, tpu.core_type = #tpu.core_type<tc>, window_params = [{pipeline_mode = #tpu.pipeline_mode<synchronous>, transform_indices = @transform_0, window_bounds = array<i64: 16, 1>}, {pipeline_mode = #tpu.pipeline_mode<synchronous>, transform_indices = @transform_1, window_bounds = array<i64: 128, 32>}, {transform_indices = @transform_2, window_bounds = array<i64: 1, 1, 32>}, {transform_indices = @transform_3, window_bounds = array<i64: 1, 32, 128>}, {transform_indices = @transform_4, window_bounds = array<i64: 1, 4, 64>}, {transform_indices = @transform_5, window_bounds = array<i64: 1, 1, 64>}, {transform_indices = @transform_6, window_bounds = array<i64: 1, 64, 128>}, {transform_indices = @transform_7, window_bounds = array<i64: 1, 1, 64>}, {transform_indices = @transform_8, window_bounds = array<i64: 1, 8, 64>}, {transform_indices = @transform_9, window_bounds = array<i64: 1, 1, 64>}, {transform_indices = @transform_10, window_bounds = array<i64: 1, 64, 32>}, {transform_indices = @transform_11, window_bounds = array<i64: 1, 2, 64, 8>}]} {
    %c0_i32 = arith.constant 0 : i32
    %0 = arith.cmpi eq, %arg0, %c0_i32 : i32
    %1 = arith.extui %0 : i1 to i32
    %c0_i32_0 = arith.constant 0 : i32
    %2 = arith.cmpi ne, %1, %c0_i32_0 : i32
    scf.if %2 {
      %237 = tpu.iota {dimensions = array<i32: 1>} : vector<16x128xi32>
      %c0_59 = arith.constant 0 : index
      %c0_60 = arith.constant 0 : index
      %238 = vector.load %arg1[%c0_59, %c0_60] : memref<16x1xi32, #tpu.memory_space<vmem>>, vector<16x1xi32>
      %239 = vector.broadcast %238 : vector<16x1xi32> to vector<16x128xi32>
      %240 = arith.cmpi eq, %237, %239 : vector<16x128xi32>
      %241 = arith.extui %240 : vector<16x128xi1> to vector<16x128xi32>
      %242 = arith.sitofp %241 : vector<16x128xi32> to vector<16x128xf32>
      %c0_61 = arith.constant 0 : index
      %c0_62 = arith.constant 0 : index
      %243 = vector.load %arg2[%c0_61, %c0_62] : memref<128x32xf32, #tpu.memory_space<vmem>>, vector<128x32xf32>
      %cst_63 = arith.constant dense<0.000000e+00> : vector<16x32xf32>
      %244 = tpu.matmul %242, %243, %cst_63 {dimension_numbers = #tpu.dot_dimension_numbers<[1], [0], [0], [1], [0, 0, 1, 1], [], []>} : vector<16x128xf32>, vector<128x32xf32>, vector<16x32xf32> -> vector<16x32xf32>
      %245 = vector.shape_cast %244 : vector<16x32xf32> to vector<2x8x32xf32>
      %c0_64 = arith.constant 0 : index
      %c0_65 = arith.constant 0 : index
      %c0_66 = arith.constant 0 : index
      %246 = vector.load %arg13[%c0_64, %c0_65, %c0_66] : memref<2x8x32xf32, #tpu.memory_space<vmem>>, vector<2x8x32xf32>
      tpu.vector_store %arg13[%c0_64, %c0_65, %c0_66], %245 {strides = array<i32>} : memref<2x8x32xf32, #tpu.memory_space<vmem>>, vector<2x8x32xf32>,
    } else {
    }
    %c0 = arith.constant 0 : index
    %c0_1 = arith.constant 0 : index
    %c0_2 = arith.constant 0 : index
    %3 = vector.load %arg13[%c0, %c0_1, %c0_2] : memref<2x8x32xf32, #tpu.memory_space<vmem>>, vector<2x8x32xf32>
    %cst = arith.constant 0.000000e+00 : f32
    %4 = vector.broadcast %cst : f32 to vector<2x8x64xf32>
    %c0_3 = arith.constant 0 : index
    %c0_4 = arith.constant 0 : index
    %c0_5 = arith.constant 0 : index
    %5 = vector.load %arg3[%c0_3, %c0_4, %c0_5] : memref<1x1x32xf32, #tpu.memory_space<vmem>>, vector<1x1x32xf32>
    %6 = vector.shape_cast %5 : vector<1x1x32xf32> to vector<1x32xf32>
    %c0_6 = arith.constant 0 : index
    %c0_7 = arith.constant 0 : index
    %c0_8 = arith.constant 0 : index
    %7 = vector.load %arg4[%c0_6, %c0_7, %c0_8] : memref<1x32x128xf32, #tpu.memory_space<vmem>>, vector<1x32x128xf32>
    %8 = vector.shape_cast %7 : vector<1x32x128xf32> to vector<32x128xf32>
    %c0_9 = arith.constant 0 : index
    %c0_10 = arith.constant 0 : index
    %c0_11 = arith.constant 0 : index
    %9 = vector.load %arg5[%c0_9, %c0_10, %c0_11] : memref<1x4x64xf32, #tpu.memory_space<vmem>>, vector<1x4x64xf32>
    %10 = vector.shape_cast %9 : vector<1x4x64xf32> to vector<4x64xf32>
    %c0_12 = arith.constant 0 : index
    %c0_13 = arith.constant 0 : index
    %c0_14 = arith.constant 0 : index
    %11 = vector.load %arg6[%c0_12, %c0_13, %c0_14] : memref<1x1x64xf32, #tpu.memory_space<vmem>>, vector<1x1x64xf32>
    %12 = vector.shape_cast %11 : vector<1x1x64xf32> to vector<1x64xf32>
    %c0_15 = arith.constant 0 : index
    %c0_16 = arith.constant 0 : index
    %c0_17 = arith.constant 0 : index
    %13 = vector.load %arg7[%c0_15, %c0_16, %c0_17] : memref<1x64x128xf32, #tpu.memory_space<vmem>>, vector<1x64x128xf32>
    %14 = vector.shape_cast %13 : vector<1x64x128xf32> to vector<64x128xf32>
    %c0_18 = arith.constant 0 : index
    %c0_19 = arith.constant 0 : index
    %c0_20 = arith.constant 0 : index
    %15 = vector.load %arg8[%c0_18, %c0_19, %c0_20] : memref<1x1x64xf32, #tpu.memory_space<vmem>>, vector<1x1x64xf32>
    %16 = vector.shape_cast %15 : vector<1x1x64xf32> to vector<1x64xf32>
    %c0_21 = arith.constant 0 : index
    %c0_22 = arith.constant 0 : index
    %c0_23 = arith.constant 0 : index
    %17 = vector.load %arg9[%c0_21, %c0_22, %c0_23] : memref<1x8x64xf32, #tpu.memory_space<vmem>>, vector<1x8x64xf32>
    %18 = vector.shape_cast %17 : vector<1x8x64xf32> to vector<8x64xf32>
    %c0_24 = arith.constant 0 : index
    %c0_25 = arith.constant 0 : index
    %c0_26 = arith.constant 0 : index
    %19 = vector.load %arg10[%c0_24, %c0_25, %c0_26] : memref<1x1x64xf32, #tpu.memory_space<vmem>>, vector<1x1x64xf32>
    %20 = vector.shape_cast %19 : vector<1x1x64xf32> to vector<1x64xf32>
    %c0_27 = arith.constant 0 : index
    %c0_28 = arith.constant 0 : index
    %c0_29 = arith.constant 0 : index
    %21 = vector.load %arg11[%c0_27, %c0_28, %c0_29] : memref<1x64x32xf32, #tpu.memory_space<vmem>>, vector<1x64x32xf32>
    %22 = vector.shape_cast %21 : vector<1x64x32xf32> to vector<64x32xf32>
    %23 = arith.mulf %3, %3 : vector<2x8x32xf32>
    %cst_30 = arith.constant dense<0.000000e+00> : vector<2x8xf32>
    %24 = vector.multi_reduction <add>, %23, %cst_30 [2] : vector<2x8x32xf32> to vector<2x8xf32>
    %25 = vector.shape_cast %24 : vector<2x8xf32> to vector<2x8x1xf32>
    %cst_31 = arith.constant 3.200000e+01 : f32
    %26 = vector.broadcast %cst_31 : f32 to vector<2x8x1xf32>
    %27 = arith.divf %25, %26 : vector<2x8x1xf32>
    %cst_32 = arith.constant 9.99999974E-6 : f32
    %28 = vector.broadcast %cst_32 : f32 to vector<2x8x1xf32>
    %29 = arith.addf %27, %28 : vector<2x8x1xf32>
    %30 = math.rsqrt %29 : vector<2x8x1xf32>
    %31 = vector.broadcast %30 : vector<2x8x1xf32> to vector<2x8x32xf32>
    %32 = arith.mulf %3, %31 : vector<2x8x32xf32>
    %33 = vector.shape_cast %6 : vector<1x32xf32> to vector<1x1x32xf32>
    %34 = vector.broadcast %33 : vector<1x1x32xf32> to vector<2x8x32xf32>
    %35 = arith.mulf %32, %34 : vector<2x8x32xf32>
    %36 = vector.shape_cast %35 : vector<2x8x32xf32> to vector<16x32xf32>
    %cst_33 = arith.constant dense<0.000000e+00> : vector<16x128xf32>
    %37 = tpu.matmul %36, %8, %cst_33 {dimension_numbers = #tpu.dot_dimension_numbers<[1], [0], [0], [1], [0, 0, 1, 1], [], []>} : vector<16x32xf32>, vector<32x128xf32>, vector<16x128xf32> -> vector<16x128xf32>
    %38 = vector.extract_strided_slice %37 {offsets = [0, 0], sizes = [16, 64], strides = [1, 1]} : vector<16x128xf32> to vector<16x64xf32>
    %39 = vector.shape_cast %38 : vector<16x64xf32> to vector<2x8x64xf32>
    %40 = vector.extract_strided_slice %37 {offsets = [0, 64], sizes = [16, 64], strides = [1, 1]} : vector<16x128xf32> to vector<16x64xf32>
    %41 = vector.shape_cast %40 : vector<16x64xf32> to vector<2x8x64xf32>
    %42 = vector.extract_strided_slice %10 {offsets = [3, 0], sizes = [1, 64], strides = [1, 1]} : vector<4x64xf32> to vector<1x64xf32>
    %43 = vector.shape_cast %42 : vector<1x64xf32> to vector<1x1x64xf32>
    %44 = vector.broadcast %43 : vector<1x1x64xf32> to vector<2x8x64xf32>
    %45 = arith.mulf %39, %44 : vector<2x8x64xf32>
    %46 = vector.shape_cast %12 : vector<1x64xf32> to vector<1x1x64xf32>
    %47 = vector.broadcast %46 : vector<1x1x64xf32> to vector<2x8x64xf32>
    %48 = arith.addf %47, %45 : vector<2x8x64xf32>
    %cst_34 = arith.constant 0.000000e+00 : f32
    %49 = vector.broadcast %cst_34 : f32 to vector<2x1x64xf32>
    %50 = vector.extract_strided_slice %39 {offsets = [0, 0, 0], sizes = [2, 7, 64], strides = [1, 1, 1]} : vector<2x8x64xf32> to vector<2x7x64xf32>
    %51 = tpu.concatenate %49, %50 in 1 : vector<2x1x64xf32>, vector<2x7x64xf32> -> vector<2x8x64xf32>
    %52 = vector.extract_strided_slice %10 {offsets = [2, 0], sizes = [1, 64], strides = [1, 1]} : vector<4x64xf32> to vector<1x64xf32>
    %53 = vector.shape_cast %52 : vector<1x64xf32> to vector<1x1x64xf32>
    %54 = vector.broadcast %53 : vector<1x1x64xf32> to vector<2x8x64xf32>
    %55 = arith.mulf %51, %54 : vector<2x8x64xf32>
    %56 = arith.addf %48, %55 : vector<2x8x64xf32>
    %cst_35 = arith.constant 0.000000e+00 : f32
    %57 = vector.broadcast %cst_35 : f32 to vector<2x2x64xf32>
    %58 = vector.extract_strided_slice %39 {offsets = [0, 0, 0], sizes = [2, 6, 64], strides = [1, 1, 1]} : vector<2x8x64xf32> to vector<2x6x64xf32>
    %59 = tpu.concatenate %57, %58 in 1 : vector<2x2x64xf32>, vector<2x6x64xf32> -> vector<2x8x64xf32>
    %60 = vector.extract_strided_slice %10 {offsets = [1, 0], sizes = [1, 64], strides = [1, 1]} : vector<4x64xf32> to vector<1x64xf32>
    %61 = vector.shape_cast %60 : vector<1x64xf32> to vector<1x1x64xf32>
    %62 = vector.broadcast %61 : vector<1x1x64xf32> to vector<2x8x64xf32>
    %63 = arith.mulf %59, %62 : vector<2x8x64xf32>
    %64 = arith.addf %56, %63 : vector<2x8x64xf32>
    %cst_36 = arith.constant 0.000000e+00 : f32
    %65 = vector.broadcast %cst_36 : f32 to vector<2x3x64xf32>
    %66 = vector.extract_strided_slice %39 {offsets = [0, 0, 0], sizes = [2, 5, 64], strides = [1, 1, 1]} : vector<2x8x64xf32> to vector<2x5x64xf32>
    %67 = tpu.concatenate %65, %66 in 1 : vector<2x3x64xf32>, vector<2x5x64xf32> -> vector<2x8x64xf32>
    %68 = vector.extract_strided_slice %10 {offsets = [0, 0], sizes = [1, 64], strides = [1, 1]} : vector<4x64xf32> to vector<1x64xf32>
    %69 = vector.shape_cast %68 : vector<1x64xf32> to vector<1x1x64xf32>
    %70 = vector.broadcast %69 : vector<1x1x64xf32> to vector<2x8x64xf32>
    %71 = arith.mulf %67, %70 : vector<2x8x64xf32>
    %72 = arith.addf %64, %71 : vector<2x8x64xf32>
    %73 = arith.negf %72 : vector<2x8x64xf32>
    %74 = math.exp %73 : vector<2x8x64xf32>
    %cst_37 = arith.constant 1.000000e+00 : f32
    %75 = vector.broadcast %cst_37 : f32 to vector<2x8x64xf32>
    %76 = arith.addf %75, %74 : vector<2x8x64xf32>
    %77 = arith.divf %75, %76 : vector<2x8x64xf32>
    %78 = arith.mulf %72, %77 : vector<2x8x64xf32>
    %79 = vector.shape_cast %78 : vector<2x8x64xf32> to vector<16x64xf32>
    %cst_38 = arith.constant dense<0.000000e+00> : vector<16x128xf32>
    %80 = tpu.matmul %79, %14, %cst_38 {dimension_numbers = #tpu.dot_dimension_numbers<[1], [0], [0], [1], [0, 0, 1, 1], [], []>} : vector<16x64xf32>, vector<64x128xf32>, vector<16x128xf32> -> vector<16x128xf32>
    %81 = vector.extract_strided_slice %80 {offsets = [0, 0], sizes = [16, 64], strides = [1, 1]} : vector<16x128xf32> to vector<16x64xf32>
    %82 = vector.broadcast %16 : vector<1x64xf32> to vector<16x64xf32>
    %83 = arith.addf %81, %82 : vector<16x64xf32>
    %cst_39 = arith.constant 0.000000e+00 : f32
    %84 = vector.broadcast %cst_39 : f32 to vector<16x64xf32>
    %85 = arith.maximumf %83, %84 : vector<16x64xf32>
    %86 = math.absf %83 : vector<16x64xf32>
    %cst_40 = arith.constant 0.000000e+00 : f32
    %87 = vector.broadcast %cst_40 : f32 to vector<16x64xf32>
    %88 = arith.subf %87, %86 : vector<16x64xf32>
    %89 = math.exp %88 : vector<16x64xf32>
    %cst_41 = arith.constant 1.000000e+00 : f32
    %90 = vector.broadcast %cst_41 : f32 to vector<16x64xf32>
    %91 = arith.addf %90, %89 : vector<16x64xf32>
    %92 = math.log %91 : vector<16x64xf32>
    %93 = arith.addf %85, %92 : vector<16x64xf32>
    %94 = vector.shape_cast %93 : vector<16x64xf32> to vector<2x8x64xf32>
    %95 = vector.extract_strided_slice %80 {offsets = [0, 64], sizes = [16, 8], strides = [1, 1]} : vector<16x128xf32> to vector<16x8xf32>
    %96 = vector.shape_cast %95 : vector<16x8xf32> to vector<2x8x8xf32>
    %97 = vector.extract_strided_slice %80 {offsets = [0, 72], sizes = [16, 8], strides = [1, 1]} : vector<16x128xf32> to vector<16x8xf32>
    %98 = vector.shape_cast %97 : vector<16x8xf32> to vector<2x8x8xf32>
    %99 = vector.shape_cast %94 : vector<2x8x64xf32> to vector<2x8x1x64xf32>
    %100 = vector.shape_cast %18 : vector<8x64xf32> to vector<1x1x8x64xf32>
    %101 = vector.broadcast %99 : vector<2x8x1x64xf32> to vector<2x8x8x64xf32>
    %102 = vector.broadcast %100 : vector<1x1x8x64xf32> to vector<2x8x8x64xf32>
    %103 = arith.mulf %101, %102 : vector<2x8x8x64xf32>
    %104 = math.exp %103 : vector<2x8x8x64xf32>
    %105 = arith.mulf %94, %78 : vector<2x8x64xf32>
    %106 = vector.shape_cast %105 : vector<2x8x64xf32> to vector<2x8x1x64xf32>
    %107 = vector.shape_cast %96 : vector<2x8x8xf32> to vector<2x8x8x1xf32>
    %108 = vector.broadcast %106 : vector<2x8x1x64xf32> to vector<2x8x8x64xf32>
    %109 = vector.broadcast %107 : vector<2x8x8x1xf32> to vector<2x8x8x64xf32>
    %110 = arith.mulf %108, %109 : vector<2x8x8x64xf32>
    %111 = vector.shape_cast %98 : vector<2x8x8xf32> to vector<2x8x8x1xf32>
    %112 = vector.extract_strided_slice %104 {offsets = [0, 0, 0, 0], sizes = [2, 1, 8, 64], strides = [1, 1, 1, 1]} : vector<2x8x8x64xf32> to vector<2x1x8x64xf32>
    %113 = vector.shape_cast %112 : vector<2x1x8x64xf32> to vector<2x8x64xf32>
    %114 = arith.mulf %113, %4 : vector<2x8x64xf32>
    %115 = vector.extract_strided_slice %110 {offsets = [0, 0, 0, 0], sizes = [2, 1, 8, 64], strides = [1, 1, 1, 1]} : vector<2x8x8x64xf32> to vector<2x1x8x64xf32>
    %116 = vector.shape_cast %115 : vector<2x1x8x64xf32> to vector<2x8x64xf32>
    %117 = arith.addf %114, %116 : vector<2x8x64xf32>
    %118 = vector.extract_strided_slice %111 {offsets = [0, 0, 0, 0], sizes = [2, 1, 8, 1], strides = [1, 1, 1, 1]} : vector<2x8x8x1xf32> to vector<2x1x8x1xf32>
    %119 = vector.shape_cast %118 : vector<2x1x8x1xf32> to vector<2x8x1xf32>
    %120 = vector.broadcast %119 : vector<2x8x1xf32> to vector<2x8x64xf32>
    %121 = arith.mulf %117, %120 : vector<2x8x64xf32>
    %cst_42 = arith.constant dense<0.000000e+00> : vector<2x64xf32>
    %122 = vector.multi_reduction <add>, %121, %cst_42 [1] : vector<2x8x64xf32> to vector<2x64xf32>
    %123 = vector.extract_strided_slice %104 {offsets = [0, 1, 0, 0], sizes = [2, 1, 8, 64], strides = [1, 1, 1, 1]} : vector<2x8x8x64xf32> to vector<2x1x8x64xf32>
    %124 = vector.shape_cast %123 : vector<2x1x8x64xf32> to vector<2x8x64xf32>
    %125 = arith.mulf %124, %117 : vector<2x8x64xf32>
    %126 = vector.extract_strided_slice %110 {offsets = [0, 1, 0, 0], sizes = [2, 1, 8, 64], strides = [1, 1, 1, 1]} : vector<2x8x8x64xf32> to vector<2x1x8x64xf32>
    %127 = vector.shape_cast %126 : vector<2x1x8x64xf32> to vector<2x8x64xf32>
    %128 = arith.addf %125, %127 : vector<2x8x64xf32>
    %129 = vector.extract_strided_slice %111 {offsets = [0, 1, 0, 0], sizes = [2, 1, 8, 1], strides = [1, 1, 1, 1]} : vector<2x8x8x1xf32> to vector<2x1x8x1xf32>
    %130 = vector.shape_cast %129 : vector<2x1x8x1xf32> to vector<2x8x1xf32>
    %131 = vector.broadcast %130 : vector<2x8x1xf32> to vector<2x8x64xf32>
    %132 = arith.mulf %128, %131 : vector<2x8x64xf32>
    %cst_43 = arith.constant dense<0.000000e+00> : vector<2x64xf32>
    %133 = vector.multi_reduction <add>, %132, %cst_43 [1] : vector<2x8x64xf32> to vector<2x64xf32>
    %134 = vector.extract_strided_slice %104 {offsets = [0, 2, 0, 0], sizes = [2, 1, 8, 64], strides = [1, 1, 1, 1]} : vector<2x8x8x64xf32> to vector<2x1x8x64xf32>
    %135 = vector.shape_cast %134 : vector<2x1x8x64xf32> to vector<2x8x64xf32>
    %136 = arith.mulf %135, %128 : vector<2x8x64xf32>
    %137 = vector.extract_strided_slice %110 {offsets = [0, 2, 0, 0], sizes = [2, 1, 8, 64], strides = [1, 1, 1, 1]} : vector<2x8x8x64xf32> to vector<2x1x8x64xf32>
    %138 = vector.shape_cast %137 : vector<2x1x8x64xf32> to vector<2x8x64xf32>
    %139 = arith.addf %136, %138 : vector<2x8x64xf32>
    %140 = vector.extract_strided_slice %111 {offsets = [0, 2, 0, 0], sizes = [2, 1, 8, 1], strides = [1, 1, 1, 1]} : vector<2x8x8x1xf32> to vector<2x1x8x1xf32>
    %141 = vector.shape_cast %140 : vector<2x1x8x1xf32> to vector<2x8x1xf32>
    %142 = vector.broadcast %141 : vector<2x8x1xf32> to vector<2x8x64xf32>
    %143 = arith.mulf %139, %142 : vector<2x8x64xf32>
    %cst_44 = arith.constant dense<0.000000e+00> : vector<2x64xf32>
    %144 = vector.multi_reduction <add>, %143, %cst_44 [1] : vector<2x8x64xf32> to vector<2x64xf32>
    %145 = vector.extract_strided_slice %104 {offsets = [0, 3, 0, 0], sizes = [2, 1, 8, 64], strides = [1, 1, 1, 1]} : vector<2x8x8x64xf32> to vector<2x1x8x64xf32>
    %146 = vector.shape_cast %145 : vector<2x1x8x64xf32> to vector<2x8x64xf32>
    %147 = arith.mulf %146, %139 : vector<2x8x64xf32>
    %148 = vector.extract_strided_slice %110 {offsets = [0, 3, 0, 0], sizes = [2, 1, 8, 64], strides = [1, 1, 1, 1]} : vector<2x8x8x64xf32> to vector<2x1x8x64xf32>
    %149 = vector.shape_cast %148 : vector<2x1x8x64xf32> to vector<2x8x64xf32>
    %150 = arith.addf %147, %149 : vector<2x8x64xf32>
    %151 = vector.extract_strided_slice %111 {offsets = [0, 3, 0, 0], sizes = [2, 1, 8, 1], strides = [1, 1, 1, 1]} : vector<2x8x8x1xf32> to vector<2x1x8x1xf32>
    %152 = vector.shape_cast %151 : vector<2x1x8x1xf32> to vector<2x8x1xf32>
    %153 = vector.broadcast %152 : vector<2x8x1xf32> to vector<2x8x64xf32>
    %154 = arith.mulf %150, %153 : vector<2x8x64xf32>
    %cst_45 = arith.constant dense<0.000000e+00> : vector<2x64xf32>
    %155 = vector.multi_reduction <add>, %154, %cst_45 [1] : vector<2x8x64xf32> to vector<2x64xf32>
    %156 = vector.extract_strided_slice %104 {offsets = [0, 4, 0, 0], sizes = [2, 1, 8, 64], strides = [1, 1, 1, 1]} : vector<2x8x8x64xf32> to vector<2x1x8x64xf32>
    %157 = vector.shape_cast %156 : vector<2x1x8x64xf32> to vector<2x8x64xf32>
    %158 = arith.mulf %157, %150 : vector<2x8x64xf32>
    %159 = vector.extract_strided_slice %110 {offsets = [0, 4, 0, 0], sizes = [2, 1, 8, 64], strides = [1, 1, 1, 1]} : vector<2x8x8x64xf32> to vector<2x1x8x64xf32>
    %160 = vector.shape_cast %159 : vector<2x1x8x64xf32> to vector<2x8x64xf32>
    %161 = arith.addf %158, %160 : vector<2x8x64xf32>
    %162 = vector.extract_strided_slice %111 {offsets = [0, 4, 0, 0], sizes = [2, 1, 8, 1], strides = [1, 1, 1, 1]} : vector<2x8x8x1xf32> to vector<2x1x8x1xf32>
    %163 = vector.shape_cast %162 : vector<2x1x8x1xf32> to vector<2x8x1xf32>
    %164 = vector.broadcast %163 : vector<2x8x1xf32> to vector<2x8x64xf32>
    %165 = arith.mulf %161, %164 : vector<2x8x64xf32>
    %cst_46 = arith.constant dense<0.000000e+00> : vector<2x64xf32>
    %166 = vector.multi_reduction <add>, %165, %cst_46 [1] : vector<2x8x64xf32> to vector<2x64xf32>
    %167 = vector.extract_strided_slice %104 {offsets = [0, 5, 0, 0], sizes = [2, 1, 8, 64], strides = [1, 1, 1, 1]} : vector<2x8x8x64xf32> to vector<2x1x8x64xf32>
    %168 = vector.shape_cast %167 : vector<2x1x8x64xf32> to vector<2x8x64xf32>
    %169 = arith.mulf %168, %161 : vector<2x8x64xf32>
    %170 = vector.extract_strided_slice %110 {offsets = [0, 5, 0, 0], sizes = [2, 1, 8, 64], strides = [1, 1, 1, 1]} : vector<2x8x8x64xf32> to vector<2x1x8x64xf32>
    %171 = vector.shape_cast %170 : vector<2x1x8x64xf32> to vector<2x8x64xf32>
    %172 = arith.addf %169, %171 : vector<2x8x64xf32>
    %173 = vector.extract_strided_slice %111 {offsets = [0, 5, 0, 0], sizes = [2, 1, 8, 1], strides = [1, 1, 1, 1]} : vector<2x8x8x1xf32> to vector<2x1x8x1xf32>
    %174 = vector.shape_cast %173 : vector<2x1x8x1xf32> to vector<2x8x1xf32>
    %175 = vector.broadcast %174 : vector<2x8x1xf32> to vector<2x8x64xf32>
    %176 = arith.mulf %172, %175 : vector<2x8x64xf32>
    %cst_47 = arith.constant dense<0.000000e+00> : vector<2x64xf32>
    %177 = vector.multi_reduction <add>, %176, %cst_47 [1] : vector<2x8x64xf32> to vector<2x64xf32>
    %178 = vector.extract_strided_slice %104 {offsets = [0, 6, 0, 0], sizes = [2, 1, 8, 64], strides = [1, 1, 1, 1]} : vector<2x8x8x64xf32> to vector<2x1x8x64xf32>
    %179 = vector.shape_cast %178 : vector<2x1x8x64xf32> to vector<2x8x64xf32>
    %180 = arith.mulf %179, %172 : vector<2x8x64xf32>
    %181 = vector.extract_strided_slice %110 {offsets = [0, 6, 0, 0], sizes = [2, 1, 8, 64], strides = [1, 1, 1, 1]} : vector<2x8x8x64xf32> to vector<2x1x8x64xf32>
    %182 = vector.shape_cast %181 : vector<2x1x8x64xf32> to vector<2x8x64xf32>
    %183 = arith.addf %180, %182 : vector<2x8x64xf32>
    %184 = vector.extract_strided_slice %111 {offsets = [0, 6, 0, 0], sizes = [2, 1, 8, 1], strides = [1, 1, 1, 1]} : vector<2x8x8x1xf32> to vector<2x1x8x1xf32>
    %185 = vector.shape_cast %184 : vector<2x1x8x1xf32> to vector<2x8x1xf32>
    %186 = vector.broadcast %185 : vector<2x8x1xf32> to vector<2x8x64xf32>
    %187 = arith.mulf %183, %186 : vector<2x8x64xf32>
    %cst_48 = arith.constant dense<0.000000e+00> : vector<2x64xf32>
    %188 = vector.multi_reduction <add>, %187, %cst_48 [1] : vector<2x8x64xf32> to vector<2x64xf32>
    %189 = vector.extract_strided_slice %104 {offsets = [0, 7, 0, 0], sizes = [2, 1, 8, 64], strides = [1, 1, 1, 1]} : vector<2x8x8x64xf32> to vector<2x1x8x64xf32>
    %190 = vector.shape_cast %189 : vector<2x1x8x64xf32> to vector<2x8x64xf32>
    %191 = arith.mulf %190, %183 : vector<2x8x64xf32>
    %192 = vector.extract_strided_slice %110 {offsets = [0, 7, 0, 0], sizes = [2, 1, 8, 64], strides = [1, 1, 1, 1]} : vector<2x8x8x64xf32> to vector<2x1x8x64xf32>
    %193 = vector.shape_cast %192 : vector<2x1x8x64xf32> to vector<2x8x64xf32>
    %194 = arith.addf %191, %193 : vector<2x8x64xf32>
    %195 = vector.extract_strided_slice %111 {offsets = [0, 7, 0, 0], sizes = [2, 1, 8, 1], strides = [1, 1, 1, 1]} : vector<2x8x8x1xf32> to vector<2x1x8x1xf32>
    %196 = vector.shape_cast %195 : vector<2x1x8x1xf32> to vector<2x8x1xf32>
    %197 = vector.broadcast %196 : vector<2x8x1xf32> to vector<2x8x64xf32>
    %198 = arith.mulf %194, %197 : vector<2x8x64xf32>
    %cst_49 = arith.constant dense<0.000000e+00> : vector<2x64xf32>
    %199 = vector.multi_reduction <add>, %198, %cst_49 [1] : vector<2x8x64xf32> to vector<2x64xf32>
    %200 = vector.shape_cast %122 : vector<2x64xf32> to vector<2x1x64xf32>
    %201 = vector.shape_cast %133 : vector<2x64xf32> to vector<2x1x64xf32>
    %202 = vector.shape_cast %144 : vector<2x64xf32> to vector<2x1x64xf32>
    %203 = vector.shape_cast %155 : vector<2x64xf32> to vector<2x1x64xf32>
    %204 = vector.shape_cast %166 : vector<2x64xf32> to vector<2x1x64xf32>
    %205 = vector.shape_cast %177 : vector<2x64xf32> to vector<2x1x64xf32>
    %206 = vector.shape_cast %188 : vector<2x64xf32> to vector<2x1x64xf32>
    %207 = vector.shape_cast %199 : vector<2x64xf32> to vector<2x1x64xf32>
    %208 = tpu.concatenate %200, %201, %202, %203, %204, %205, %206, %207 in 1 : vector<2x1x64xf32>, vector<2x1x64xf32>, vector<2x1x64xf32>, vector<2x1x64xf32>, vector<2x1x64xf32>, vector<2x1x64xf32>, vector<2x1x64xf32>, vector<2x1x64xf32> -> vector<2x8x64xf32>
    %209 = vector.shape_cast %20 : vector<1x64xf32> to vector<1x1x64xf32>
    %210 = vector.broadcast %209 : vector<1x1x64xf32> to vector<2x8x64xf32>
    %211 = arith.mulf %78, %210 : vector<2x8x64xf32>
    %212 = arith.addf %208, %211 : vector<2x8x64xf32>
    %213 = arith.negf %41 : vector<2x8x64xf32>
    %214 = math.exp %213 : vector<2x8x64xf32>
    %cst_50 = arith.constant 1.000000e+00 : f32
    %215 = vector.broadcast %cst_50 : f32 to vector<2x8x64xf32>
    %216 = arith.addf %215, %214 : vector<2x8x64xf32>
    %217 = arith.divf %215, %216 : vector<2x8x64xf32>
    %218 = arith.mulf %41, %217 : vector<2x8x64xf32>
    %219 = arith.mulf %212, %218 : vector<2x8x64xf32>
    %220 = vector.shape_cast %219 : vector<2x8x64xf32> to vector<16x64xf32>
    %cst_51 = arith.constant dense<0.000000e+00> : vector<16x32xf32>
    %221 = tpu.matmul %220, %22, %cst_51 {dimension_numbers = #tpu.dot_dimension_numbers<[1], [0], [0], [1], [0, 0, 1, 1], [], []>} : vector<16x64xf32>, vector<64x32xf32>, vector<16x32xf32> -> vector<16x32xf32>
    %222 = vector.shape_cast %221 : vector<16x32xf32> to vector<2x8x32xf32>
    %223 = arith.addf %3, %222 : vector<2x8x32xf32>
    %c0_52 = arith.constant 0 : index
    %c0_53 = arith.constant 0 : index
    %c0_54 = arith.constant 0 : index
    %224 = vector.load %arg13[%c0_52, %c0_53, %c0_54] : memref<2x8x32xf32, #tpu.memory_space<vmem>>, vector<2x8x32xf32>
    tpu.vector_store %arg13[%c0_52, %c0_53, %c0_54], %223 {strides = array<i32>} : memref<2x8x32xf32, #tpu.memory_space<vmem>>, vector<2x8x32xf32>,
    %225 = vector.extract_strided_slice %194 {offsets = [0, 0, 0], sizes = [1, 8, 64], strides = [1, 1, 1]} : vector<2x8x64xf32> to vector<1x8x64xf32>
    %226 = vector.shape_cast %225 : vector<1x8x64xf32> to vector<8x64xf32>
    %227 = tpu.transpose %226, [1, 0] : vector<8x64xf32> -> vector<64x8xf32>
    %228 = vector.extract_strided_slice %194 {offsets = [1, 0, 0], sizes = [1, 8, 64], strides = [1, 1, 1]} : vector<2x8x64xf32> to vector<1x8x64xf32>
    %229 = vector.shape_cast %228 : vector<1x8x64xf32> to vector<8x64xf32>
    %230 = tpu.transpose %229, [1, 0] : vector<8x64xf32> -> vector<64x8xf32>
    %231 = vector.shape_cast %227 : vector<64x8xf32> to vector<1x64x8xf32>
    %232 = vector.shape_cast %230 : vector<64x8xf32> to vector<1x64x8xf32>
    %233 = tpu.concatenate %231, %232 in 0 : vector<1x64x8xf32>, vector<1x64x8xf32> -> vector<2x64x8xf32>
    %c0_55 = arith.constant 0 : index
    %c0_56 = arith.constant 0 : index
    %c0_57 = arith.constant 0 : index
    %c0_58 = arith.constant 0 : index
    %234 = vector.load %arg12[%c0_55, %c0_56, %c0_57, %c0_58] : memref<1x2x64x8xf32, #tpu.memory_space<vmem>>, vector<1x2x64x8xf32>
    %235 = vector.shape_cast %234 : vector<1x2x64x8xf32> to vector<2x64x8xf32>
    %236 = vector.shape_cast %233 : vector<2x64x8xf32> to vector<1x2x64x8xf32>
    tpu.vector_store %arg12[%c0_55, %c0_56, %c0_57, %c0_58], %236 {strides = array<i32>} : memref<1x2x64x8xf32, #tpu.memory_space<vmem>>, vector<1x2x64x8xf32>,
    return
  }
  func.func @transform_0(%arg0: i32) -> (i32, i32) {
    %c0_i32 = arith.constant 0 : i32
    %c0_i32_0 = arith.constant 0 : i32
    %c0_i32_1 = arith.constant 0 : i32
    return %c0_i32, %c0_i32_0 : i32, i32
  }
  func.func @transform_1(%arg0: i32) -> (i32, i32) {
    %c0_i32 = arith.constant 0 : i32
    %c0_i32_0 = arith.constant 0 : i32
    %c0_i32_1 = arith.constant 0 : i32
    return %c0_i32, %c0_i32_0 : i32, i32
  }
  func.func @transform_2(%arg0: i32) -> (i32, i32, i32) {
    %c0_i32 = arith.constant 0 : i32
    %c0_i32_0 = arith.constant 0 : i32
    %c0_i32_1 = arith.constant 0 : i32
    return %arg0, %c0_i32, %c0_i32_0 : i32, i32, i32
  }
  func.func @transform_3(%arg0: i32) -> (i32, i32, i32) {
    %c0_i32 = arith.constant 0 : i32
    %c0_i32_0 = arith.constant 0 : i32
    %c0_i32_1 = arith.constant 0 : i32
    return %arg0, %c0_i32, %c0_i32_0 : i32, i32, i32
  }
  func.func @transform_4(%arg0: i32) -> (i32, i32, i32) {
    %c0_i32 = arith.constant 0 : i32
    %c0_i32_0 = arith.constant 0 : i32
    %c0_i32_1 = arith.constant 0 : i32
    return %arg0, %c0_i32, %c0_i32_0 : i32, i32, i32
  }
  func.func @transform_5(%arg0: i32) -> (i32, i32, i32) {
    %c0_i32 = arith.constant 0 : i32
    %c0_i32_0 = arith.constant 0 : i32
    %c0_i32_1 = arith.constant 0 : i32
    return %arg0, %c0_i32, %c0_i32_0 : i32, i32, i32
  }
  func.func @transform_6(%arg0: i32) -> (i32, i32, i32) {
    %c0_i32 = arith.constant 0 : i32
    %c0_i32_0 = arith.constant 0 : i32
    %c0_i32_1 = arith.constant 0 : i32
    return %arg0, %c0_i32, %c0_i32_0 : i32, i32, i32
  }
  func.func @transform_7(%arg0: i32) -> (i32, i32, i32) {
    %c0_i32 = arith.constant 0 : i32
    %c0_i32_0 = arith.constant 0 : i32
    %c0_i32_1 = arith.constant 0 : i32
    return %arg0, %c0_i32, %c0_i32_0 : i32, i32, i32
  }
  func.func @transform_8(%arg0: i32) -> (i32, i32, i32) {
    %c0_i32 = arith.constant 0 : i32
    %c0_i32_0 = arith.constant 0 : i32
    %c0_i32_1 = arith.constant 0 : i32
    return %arg0, %c0_i32, %c0_i32_0 : i32, i32, i32
  }
  func.func @transform_9(%arg0: i32) -> (i32, i32, i32) {
    %c0_i32 = arith.constant 0 : i32
    %c0_i32_0 = arith.constant 0 : i32
    %c0_i32_1 = arith.constant 0 : i32
    return %arg0, %c0_i32, %c0_i32_0 : i32, i32, i32
  }
  func.func @transform_10(%arg0: i32) -> (i32, i32, i32) {
    %c0_i32 = arith.constant 0 : i32
    %c0_i32_0 = arith.constant 0 : i32
    %c0_i32_1 = arith.constant 0 : i32
    return %arg0, %c0_i32, %c0_i32_0 : i32, i32, i32
  }
  func.func @transform_11(%arg0: i32) -> (i32, i32, i32, i32) {
    %c0_i32 = arith.constant 0 : i32
    %c0_i32_0 = arith.constant 0 : i32
    %c0_i32_1 = arith.constant 0 : i32
    %c0_i32_2 = arith.constant 0 : i32
    return %arg0, %c0_i32, %c0_i32_0, %c0_i32_1 : i32, i32, i32, i32
  }
}

module attributes {stable_mosaic.version = 11 : i64} {
  func.func @_decoder_kernel(%arg0: i32, %arg1: memref<16x1xi32, #tpu.memory_space<vmem>>, %arg2: memref<128x32xf32, #tpu.memory_space<vmem>>, %arg3: memref<1x2x64x8xf32, #tpu.memory_space<vmem>>, %arg4: memref<1x1x32xf32, #tpu.memory_space<vmem>>, %arg5: memref<1x32x128xf32, #tpu.memory_space<vmem>>, %arg6: memref<1x4x64xf32, #tpu.memory_space<vmem>>, %arg7: memref<1x1x64xf32, #tpu.memory_space<vmem>>, %arg8: memref<1x64x128xf32, #tpu.memory_space<vmem>>, %arg9: memref<1x1x64xf32, #tpu.memory_space<vmem>>, %arg10: memref<1x8x64xf32, #tpu.memory_space<vmem>>, %arg11: memref<1x1x64xf32, #tpu.memory_space<vmem>>, %arg12: memref<1x64x32xf32, #tpu.memory_space<vmem>>, %arg13: memref<1x32xf32, #tpu.memory_space<vmem>>, %arg14: memref<32x128xf32, #tpu.memory_space<vmem>>, %arg15: memref<2x8x128xf32, #tpu.memory_space<vmem>>, %arg16: memref<2x8x32xf32, #tpu.memory_space<vmem>>) attributes {dimension_semantics = [#tpu.dimension_semantics<arbitrary>], iteration_bounds = array<i64: 2>, scalar_prefetch = 0 : i64, scratch_operands = 1 : i64, tpu.core_type = #tpu.core_type<tc>, window_params = [{pipeline_mode = #tpu.pipeline_mode<synchronous>, transform_indices = @transform_0, window_bounds = array<i64: 16, 1>}, {pipeline_mode = #tpu.pipeline_mode<synchronous>, transform_indices = @transform_1, window_bounds = array<i64: 128, 32>}, {transform_indices = @transform_2, window_bounds = array<i64: 1, 2, 64, 8>}, {transform_indices = @transform_3, window_bounds = array<i64: 1, 1, 32>}, {transform_indices = @transform_4, window_bounds = array<i64: 1, 32, 128>}, {transform_indices = @transform_5, window_bounds = array<i64: 1, 4, 64>}, {transform_indices = @transform_6, window_bounds = array<i64: 1, 1, 64>}, {transform_indices = @transform_7, window_bounds = array<i64: 1, 64, 128>}, {transform_indices = @transform_8, window_bounds = array<i64: 1, 1, 64>}, {transform_indices = @transform_9, window_bounds = array<i64: 1, 8, 64>}, {transform_indices = @transform_10, window_bounds = array<i64: 1, 1, 64>}, {transform_indices = @transform_11, window_bounds = array<i64: 1, 64, 32>}, {pipeline_mode = #tpu.pipeline_mode<synchronous>, transform_indices = @transform_12, window_bounds = array<i64: 1, 32>}, {pipeline_mode = #tpu.pipeline_mode<synchronous>, transform_indices = @transform_13, window_bounds = array<i64: 32, 128>}, {pipeline_mode = #tpu.pipeline_mode<synchronous>, transform_indices = @transform_14, window_bounds = array<i64: 2, 8, 128>}]} {
    %c0_i32 = arith.constant 0 : i32
    %0 = arith.cmpi eq, %arg0, %c0_i32 : i32
    %1 = arith.extui %0 : i1 to i32
    %c0_i32_0 = arith.constant 0 : i32
    %2 = arith.cmpi ne, %1, %c0_i32_0 : i32
    scf.if %2 {
      %238 = tpu.iota {dimensions = array<i32: 1>} : vector<16x128xi32>
      %c0_59 = arith.constant 0 : index
      %c0_60 = arith.constant 0 : index
      %239 = vector.load %arg1[%c0_59, %c0_60] : memref<16x1xi32, #tpu.memory_space<vmem>>, vector<16x1xi32>
      %240 = vector.broadcast %239 : vector<16x1xi32> to vector<16x128xi32>
      %241 = arith.cmpi eq, %238, %240 : vector<16x128xi32>
      %242 = arith.extui %241 : vector<16x128xi1> to vector<16x128xi32>
      %243 = arith.sitofp %242 : vector<16x128xi32> to vector<16x128xf32>
      %c0_61 = arith.constant 0 : index
      %c0_62 = arith.constant 0 : index
      %244 = vector.load %arg2[%c0_61, %c0_62] : memref<128x32xf32, #tpu.memory_space<vmem>>, vector<128x32xf32>
      %cst_63 = arith.constant dense<0.000000e+00> : vector<16x32xf32>
      %245 = tpu.matmul %243, %244, %cst_63 {dimension_numbers = #tpu.dot_dimension_numbers<[1], [0], [0], [1], [0, 0, 1, 1], [], []>} : vector<16x128xf32>, vector<128x32xf32>, vector<16x32xf32> -> vector<16x32xf32>
      %246 = vector.shape_cast %245 : vector<16x32xf32> to vector<2x8x32xf32>
      %c0_64 = arith.constant 0 : index
      %c0_65 = arith.constant 0 : index
      %c0_66 = arith.constant 0 : index
      %247 = vector.load %arg16[%c0_64, %c0_65, %c0_66] : memref<2x8x32xf32, #tpu.memory_space<vmem>>, vector<2x8x32xf32>
      tpu.vector_store %arg16[%c0_64, %c0_65, %c0_66], %246 {strides = array<i32>} : memref<2x8x32xf32, #tpu.memory_space<vmem>>, vector<2x8x32xf32>,
    } else {
    }
    %c0 = arith.constant 0 : index
    %c0_1 = arith.constant 0 : index
    %c0_2 = arith.constant 0 : index
    %c0_3 = arith.constant 0 : index
    %3 = vector.load %arg3[%c0, %c0_1, %c0_2, %c0_3] : memref<1x2x64x8xf32, #tpu.memory_space<vmem>>, vector<1x2x64x8xf32>
    %4 = vector.shape_cast %3 : vector<1x2x64x8xf32> to vector<2x64x8xf32>
    %5 = vector.extract_strided_slice %4 {offsets = [0, 0, 0], sizes = [1, 64, 8], strides = [1, 1, 1]} : vector<2x64x8xf32> to vector<1x64x8xf32>
    %6 = vector.shape_cast %5 : vector<1x64x8xf32> to vector<64x8xf32>
    %7 = tpu.transpose %6, [1, 0] : vector<64x8xf32> -> vector<8x64xf32>
    %8 = vector.extract_strided_slice %4 {offsets = [1, 0, 0], sizes = [1, 64, 8], strides = [1, 1, 1]} : vector<2x64x8xf32> to vector<1x64x8xf32>
    %9 = vector.shape_cast %8 : vector<1x64x8xf32> to vector<64x8xf32>
    %10 = tpu.transpose %9, [1, 0] : vector<64x8xf32> -> vector<8x64xf32>
    %11 = vector.shape_cast %7 : vector<8x64xf32> to vector<1x8x64xf32>
    %12 = vector.shape_cast %10 : vector<8x64xf32> to vector<1x8x64xf32>
    %13 = tpu.concatenate %11, %12 in 0 : vector<1x8x64xf32>, vector<1x8x64xf32> -> vector<2x8x64xf32>
    %c0_4 = arith.constant 0 : index
    %c0_5 = arith.constant 0 : index
    %c0_6 = arith.constant 0 : index
    %14 = vector.load %arg16[%c0_4, %c0_5, %c0_6] : memref<2x8x32xf32, #tpu.memory_space<vmem>>, vector<2x8x32xf32>
    %c0_7 = arith.constant 0 : index
    %c0_8 = arith.constant 0 : index
    %c0_9 = arith.constant 0 : index
    %15 = vector.load %arg4[%c0_7, %c0_8, %c0_9] : memref<1x1x32xf32, #tpu.memory_space<vmem>>, vector<1x1x32xf32>
    %16 = vector.shape_cast %15 : vector<1x1x32xf32> to vector<1x32xf32>
    %c0_10 = arith.constant 0 : index
    %c0_11 = arith.constant 0 : index
    %c0_12 = arith.constant 0 : index
    %17 = vector.load %arg5[%c0_10, %c0_11, %c0_12] : memref<1x32x128xf32, #tpu.memory_space<vmem>>, vector<1x32x128xf32>
    %18 = vector.shape_cast %17 : vector<1x32x128xf32> to vector<32x128xf32>
    %c0_13 = arith.constant 0 : index
    %c0_14 = arith.constant 0 : index
    %c0_15 = arith.constant 0 : index
    %19 = vector.load %arg6[%c0_13, %c0_14, %c0_15] : memref<1x4x64xf32, #tpu.memory_space<vmem>>, vector<1x4x64xf32>
    %20 = vector.shape_cast %19 : vector<1x4x64xf32> to vector<4x64xf32>
    %c0_16 = arith.constant 0 : index
    %c0_17 = arith.constant 0 : index
    %c0_18 = arith.constant 0 : index
    %21 = vector.load %arg7[%c0_16, %c0_17, %c0_18] : memref<1x1x64xf32, #tpu.memory_space<vmem>>, vector<1x1x64xf32>
    %22 = vector.shape_cast %21 : vector<1x1x64xf32> to vector<1x64xf32>
    %c0_19 = arith.constant 0 : index
    %c0_20 = arith.constant 0 : index
    %c0_21 = arith.constant 0 : index
    %23 = vector.load %arg8[%c0_19, %c0_20, %c0_21] : memref<1x64x128xf32, #tpu.memory_space<vmem>>, vector<1x64x128xf32>
    %24 = vector.shape_cast %23 : vector<1x64x128xf32> to vector<64x128xf32>
    %c0_22 = arith.constant 0 : index
    %c0_23 = arith.constant 0 : index
    %c0_24 = arith.constant 0 : index
    %25 = vector.load %arg9[%c0_22, %c0_23, %c0_24] : memref<1x1x64xf32, #tpu.memory_space<vmem>>, vector<1x1x64xf32>
    %26 = vector.shape_cast %25 : vector<1x1x64xf32> to vector<1x64xf32>
    %c0_25 = arith.constant 0 : index
    %c0_26 = arith.constant 0 : index
    %c0_27 = arith.constant 0 : index
    %27 = vector.load %arg10[%c0_25, %c0_26, %c0_27] : memref<1x8x64xf32, #tpu.memory_space<vmem>>, vector<1x8x64xf32>
    %28 = vector.shape_cast %27 : vector<1x8x64xf32> to vector<8x64xf32>
    %c0_28 = arith.constant 0 : index
    %c0_29 = arith.constant 0 : index
    %c0_30 = arith.constant 0 : index
    %29 = vector.load %arg11[%c0_28, %c0_29, %c0_30] : memref<1x1x64xf32, #tpu.memory_space<vmem>>, vector<1x1x64xf32>
    %30 = vector.shape_cast %29 : vector<1x1x64xf32> to vector<1x64xf32>
    %c0_31 = arith.constant 0 : index
    %c0_32 = arith.constant 0 : index
    %c0_33 = arith.constant 0 : index
    %31 = vector.load %arg12[%c0_31, %c0_32, %c0_33] : memref<1x64x32xf32, #tpu.memory_space<vmem>>, vector<1x64x32xf32>
    %32 = vector.shape_cast %31 : vector<1x64x32xf32> to vector<64x32xf32>
    %33 = arith.mulf %14, %14 : vector<2x8x32xf32>
    %cst = arith.constant dense<0.000000e+00> : vector<2x8xf32>
    %34 = vector.multi_reduction <add>, %33, %cst [2] : vector<2x8x32xf32> to vector<2x8xf32>
    %35 = vector.shape_cast %34 : vector<2x8xf32> to vector<2x8x1xf32>
    %cst_34 = arith.constant 3.200000e+01 : f32
    %36 = vector.broadcast %cst_34 : f32 to vector<2x8x1xf32>
    %37 = arith.divf %35, %36 : vector<2x8x1xf32>
    %cst_35 = arith.constant 9.99999974E-6 : f32
    %38 = vector.broadcast %cst_35 : f32 to vector<2x8x1xf32>
    %39 = arith.addf %37, %38 : vector<2x8x1xf32>
    %40 = math.rsqrt %39 : vector<2x8x1xf32>
    %41 = vector.broadcast %40 : vector<2x8x1xf32> to vector<2x8x32xf32>
    %42 = arith.mulf %14, %41 : vector<2x8x32xf32>
    %43 = vector.shape_cast %16 : vector<1x32xf32> to vector<1x1x32xf32>
    %44 = vector.broadcast %43 : vector<1x1x32xf32> to vector<2x8x32xf32>
    %45 = arith.mulf %42, %44 : vector<2x8x32xf32>
    %46 = vector.shape_cast %45 : vector<2x8x32xf32> to vector<16x32xf32>
    %cst_36 = arith.constant dense<0.000000e+00> : vector<16x128xf32>
    %47 = tpu.matmul %46, %18, %cst_36 {dimension_numbers = #tpu.dot_dimension_numbers<[1], [0], [0], [1], [0, 0, 1, 1], [], []>} : vector<16x32xf32>, vector<32x128xf32>, vector<16x128xf32> -> vector<16x128xf32>
    %48 = vector.extract_strided_slice %47 {offsets = [0, 0], sizes = [16, 64], strides = [1, 1]} : vector<16x128xf32> to vector<16x64xf32>
    %49 = vector.shape_cast %48 : vector<16x64xf32> to vector<2x8x64xf32>
    %50 = vector.extract_strided_slice %47 {offsets = [0, 64], sizes = [16, 64], strides = [1, 1]} : vector<16x128xf32> to vector<16x64xf32>
    %51 = vector.shape_cast %50 : vector<16x64xf32> to vector<2x8x64xf32>
    %52 = vector.extract_strided_slice %20 {offsets = [3, 0], sizes = [1, 64], strides = [1, 1]} : vector<4x64xf32> to vector<1x64xf32>
    %53 = vector.shape_cast %52 : vector<1x64xf32> to vector<1x1x64xf32>
    %54 = vector.broadcast %53 : vector<1x1x64xf32> to vector<2x8x64xf32>
    %55 = arith.mulf %49, %54 : vector<2x8x64xf32>
    %56 = vector.shape_cast %22 : vector<1x64xf32> to vector<1x1x64xf32>
    %57 = vector.broadcast %56 : vector<1x1x64xf32> to vector<2x8x64xf32>
    %58 = arith.addf %57, %55 : vector<2x8x64xf32>
    %cst_37 = arith.constant 0.000000e+00 : f32
    %59 = vector.broadcast %cst_37 : f32 to vector<2x1x64xf32>
    %60 = vector.extract_strided_slice %49 {offsets = [0, 0, 0], sizes = [2, 7, 64], strides = [1, 1, 1]} : vector<2x8x64xf32> to vector<2x7x64xf32>
    %61 = tpu.concatenate %59, %60 in 1 : vector<2x1x64xf32>, vector<2x7x64xf32> -> vector<2x8x64xf32>
    %62 = vector.extract_strided_slice %20 {offsets = [2, 0], sizes = [1, 64], strides = [1, 1]} : vector<4x64xf32> to vector<1x64xf32>
    %63 = vector.shape_cast %62 : vector<1x64xf32> to vector<1x1x64xf32>
    %64 = vector.broadcast %63 : vector<1x1x64xf32> to vector<2x8x64xf32>
    %65 = arith.mulf %61, %64 : vector<2x8x64xf32>
    %66 = arith.addf %58, %65 : vector<2x8x64xf32>
    %cst_38 = arith.constant 0.000000e+00 : f32
    %67 = vector.broadcast %cst_38 : f32 to vector<2x2x64xf32>
    %68 = vector.extract_strided_slice %49 {offsets = [0, 0, 0], sizes = [2, 6, 64], strides = [1, 1, 1]} : vector<2x8x64xf32> to vector<2x6x64xf32>
    %69 = tpu.concatenate %67, %68 in 1 : vector<2x2x64xf32>, vector<2x6x64xf32> -> vector<2x8x64xf32>
    %70 = vector.extract_strided_slice %20 {offsets = [1, 0], sizes = [1, 64], strides = [1, 1]} : vector<4x64xf32> to vector<1x64xf32>
    %71 = vector.shape_cast %70 : vector<1x64xf32> to vector<1x1x64xf32>
    %72 = vector.broadcast %71 : vector<1x1x64xf32> to vector<2x8x64xf32>
    %73 = arith.mulf %69, %72 : vector<2x8x64xf32>
    %74 = arith.addf %66, %73 : vector<2x8x64xf32>
    %cst_39 = arith.constant 0.000000e+00 : f32
    %75 = vector.broadcast %cst_39 : f32 to vector<2x3x64xf32>
    %76 = vector.extract_strided_slice %49 {offsets = [0, 0, 0], sizes = [2, 5, 64], strides = [1, 1, 1]} : vector<2x8x64xf32> to vector<2x5x64xf32>
    %77 = tpu.concatenate %75, %76 in 1 : vector<2x3x64xf32>, vector<2x5x64xf32> -> vector<2x8x64xf32>
    %78 = vector.extract_strided_slice %20 {offsets = [0, 0], sizes = [1, 64], strides = [1, 1]} : vector<4x64xf32> to vector<1x64xf32>
    %79 = vector.shape_cast %78 : vector<1x64xf32> to vector<1x1x64xf32>
    %80 = vector.broadcast %79 : vector<1x1x64xf32> to vector<2x8x64xf32>
    %81 = arith.mulf %77, %80 : vector<2x8x64xf32>
    %82 = arith.addf %74, %81 : vector<2x8x64xf32>
    %83 = arith.negf %82 : vector<2x8x64xf32>
    %84 = math.exp %83 : vector<2x8x64xf32>
    %cst_40 = arith.constant 1.000000e+00 : f32
    %85 = vector.broadcast %cst_40 : f32 to vector<2x8x64xf32>
    %86 = arith.addf %85, %84 : vector<2x8x64xf32>
    %87 = arith.divf %85, %86 : vector<2x8x64xf32>
    %88 = arith.mulf %82, %87 : vector<2x8x64xf32>
    %89 = vector.shape_cast %88 : vector<2x8x64xf32> to vector<16x64xf32>
    %cst_41 = arith.constant dense<0.000000e+00> : vector<16x128xf32>
    %90 = tpu.matmul %89, %24, %cst_41 {dimension_numbers = #tpu.dot_dimension_numbers<[1], [0], [0], [1], [0, 0, 1, 1], [], []>} : vector<16x64xf32>, vector<64x128xf32>, vector<16x128xf32> -> vector<16x128xf32>
    %91 = vector.extract_strided_slice %90 {offsets = [0, 0], sizes = [16, 64], strides = [1, 1]} : vector<16x128xf32> to vector<16x64xf32>
    %92 = vector.broadcast %26 : vector<1x64xf32> to vector<16x64xf32>
    %93 = arith.addf %91, %92 : vector<16x64xf32>
    %cst_42 = arith.constant 0.000000e+00 : f32
    %94 = vector.broadcast %cst_42 : f32 to vector<16x64xf32>
    %95 = arith.maximumf %93, %94 : vector<16x64xf32>
    %96 = math.absf %93 : vector<16x64xf32>
    %cst_43 = arith.constant 0.000000e+00 : f32
    %97 = vector.broadcast %cst_43 : f32 to vector<16x64xf32>
    %98 = arith.subf %97, %96 : vector<16x64xf32>
    %99 = math.exp %98 : vector<16x64xf32>
    %cst_44 = arith.constant 1.000000e+00 : f32
    %100 = vector.broadcast %cst_44 : f32 to vector<16x64xf32>
    %101 = arith.addf %100, %99 : vector<16x64xf32>
    %102 = math.log %101 : vector<16x64xf32>
    %103 = arith.addf %95, %102 : vector<16x64xf32>
    %104 = vector.shape_cast %103 : vector<16x64xf32> to vector<2x8x64xf32>
    %105 = vector.extract_strided_slice %90 {offsets = [0, 64], sizes = [16, 8], strides = [1, 1]} : vector<16x128xf32> to vector<16x8xf32>
    %106 = vector.shape_cast %105 : vector<16x8xf32> to vector<2x8x8xf32>
    %107 = vector.extract_strided_slice %90 {offsets = [0, 72], sizes = [16, 8], strides = [1, 1]} : vector<16x128xf32> to vector<16x8xf32>
    %108 = vector.shape_cast %107 : vector<16x8xf32> to vector<2x8x8xf32>
    %109 = vector.shape_cast %104 : vector<2x8x64xf32> to vector<2x8x1x64xf32>
    %110 = vector.shape_cast %28 : vector<8x64xf32> to vector<1x1x8x64xf32>
    %111 = vector.broadcast %109 : vector<2x8x1x64xf32> to vector<2x8x8x64xf32>
    %112 = vector.broadcast %110 : vector<1x1x8x64xf32> to vector<2x8x8x64xf32>
    %113 = arith.mulf %111, %112 : vector<2x8x8x64xf32>
    %114 = math.exp %113 : vector<2x8x8x64xf32>
    %115 = arith.mulf %104, %88 : vector<2x8x64xf32>
    %116 = vector.shape_cast %115 : vector<2x8x64xf32> to vector<2x8x1x64xf32>
    %117 = vector.shape_cast %106 : vector<2x8x8xf32> to vector<2x8x8x1xf32>
    %118 = vector.broadcast %116 : vector<2x8x1x64xf32> to vector<2x8x8x64xf32>
    %119 = vector.broadcast %117 : vector<2x8x8x1xf32> to vector<2x8x8x64xf32>
    %120 = arith.mulf %118, %119 : vector<2x8x8x64xf32>
    %121 = vector.shape_cast %108 : vector<2x8x8xf32> to vector<2x8x8x1xf32>
    %122 = vector.extract_strided_slice %114 {offsets = [0, 0, 0, 0], sizes = [2, 1, 8, 64], strides = [1, 1, 1, 1]} : vector<2x8x8x64xf32> to vector<2x1x8x64xf32>
    %123 = vector.shape_cast %122 : vector<2x1x8x64xf32> to vector<2x8x64xf32>
    %124 = arith.mulf %123, %13 : vector<2x8x64xf32>
    %125 = vector.extract_strided_slice %120 {offsets = [0, 0, 0, 0], sizes = [2, 1, 8, 64], strides = [1, 1, 1, 1]} : vector<2x8x8x64xf32> to vector<2x1x8x64xf32>
    %126 = vector.shape_cast %125 : vector<2x1x8x64xf32> to vector<2x8x64xf32>
    %127 = arith.addf %124, %126 : vector<2x8x64xf32>
    %128 = vector.extract_strided_slice %121 {offsets = [0, 0, 0, 0], sizes = [2, 1, 8, 1], strides = [1, 1, 1, 1]} : vector<2x8x8x1xf32> to vector<2x1x8x1xf32>
    %129 = vector.shape_cast %128 : vector<2x1x8x1xf32> to vector<2x8x1xf32>
    %130 = vector.broadcast %129 : vector<2x8x1xf32> to vector<2x8x64xf32>
    %131 = arith.mulf %127, %130 : vector<2x8x64xf32>
    %cst_45 = arith.constant dense<0.000000e+00> : vector<2x64xf32>
    %132 = vector.multi_reduction <add>, %131, %cst_45 [1] : vector<2x8x64xf32> to vector<2x64xf32>
    %133 = vector.extract_strided_slice %114 {offsets = [0, 1, 0, 0], sizes = [2, 1, 8, 64], strides = [1, 1, 1, 1]} : vector<2x8x8x64xf32> to vector<2x1x8x64xf32>
    %134 = vector.shape_cast %133 : vector<2x1x8x64xf32> to vector<2x8x64xf32>
    %135 = arith.mulf %134, %127 : vector<2x8x64xf32>
    %136 = vector.extract_strided_slice %120 {offsets = [0, 1, 0, 0], sizes = [2, 1, 8, 64], strides = [1, 1, 1, 1]} : vector<2x8x8x64xf32> to vector<2x1x8x64xf32>
    %137 = vector.shape_cast %136 : vector<2x1x8x64xf32> to vector<2x8x64xf32>
    %138 = arith.addf %135, %137 : vector<2x8x64xf32>
    %139 = vector.extract_strided_slice %121 {offsets = [0, 1, 0, 0], sizes = [2, 1, 8, 1], strides = [1, 1, 1, 1]} : vector<2x8x8x1xf32> to vector<2x1x8x1xf32>
    %140 = vector.shape_cast %139 : vector<2x1x8x1xf32> to vector<2x8x1xf32>
    %141 = vector.broadcast %140 : vector<2x8x1xf32> to vector<2x8x64xf32>
    %142 = arith.mulf %138, %141 : vector<2x8x64xf32>
    %cst_46 = arith.constant dense<0.000000e+00> : vector<2x64xf32>
    %143 = vector.multi_reduction <add>, %142, %cst_46 [1] : vector<2x8x64xf32> to vector<2x64xf32>
    %144 = vector.extract_strided_slice %114 {offsets = [0, 2, 0, 0], sizes = [2, 1, 8, 64], strides = [1, 1, 1, 1]} : vector<2x8x8x64xf32> to vector<2x1x8x64xf32>
    %145 = vector.shape_cast %144 : vector<2x1x8x64xf32> to vector<2x8x64xf32>
    %146 = arith.mulf %145, %138 : vector<2x8x64xf32>
    %147 = vector.extract_strided_slice %120 {offsets = [0, 2, 0, 0], sizes = [2, 1, 8, 64], strides = [1, 1, 1, 1]} : vector<2x8x8x64xf32> to vector<2x1x8x64xf32>
    %148 = vector.shape_cast %147 : vector<2x1x8x64xf32> to vector<2x8x64xf32>
    %149 = arith.addf %146, %148 : vector<2x8x64xf32>
    %150 = vector.extract_strided_slice %121 {offsets = [0, 2, 0, 0], sizes = [2, 1, 8, 1], strides = [1, 1, 1, 1]} : vector<2x8x8x1xf32> to vector<2x1x8x1xf32>
    %151 = vector.shape_cast %150 : vector<2x1x8x1xf32> to vector<2x8x1xf32>
    %152 = vector.broadcast %151 : vector<2x8x1xf32> to vector<2x8x64xf32>
    %153 = arith.mulf %149, %152 : vector<2x8x64xf32>
    %cst_47 = arith.constant dense<0.000000e+00> : vector<2x64xf32>
    %154 = vector.multi_reduction <add>, %153, %cst_47 [1] : vector<2x8x64xf32> to vector<2x64xf32>
    %155 = vector.extract_strided_slice %114 {offsets = [0, 3, 0, 0], sizes = [2, 1, 8, 64], strides = [1, 1, 1, 1]} : vector<2x8x8x64xf32> to vector<2x1x8x64xf32>
    %156 = vector.shape_cast %155 : vector<2x1x8x64xf32> to vector<2x8x64xf32>
    %157 = arith.mulf %156, %149 : vector<2x8x64xf32>
    %158 = vector.extract_strided_slice %120 {offsets = [0, 3, 0, 0], sizes = [2, 1, 8, 64], strides = [1, 1, 1, 1]} : vector<2x8x8x64xf32> to vector<2x1x8x64xf32>
    %159 = vector.shape_cast %158 : vector<2x1x8x64xf32> to vector<2x8x64xf32>
    %160 = arith.addf %157, %159 : vector<2x8x64xf32>
    %161 = vector.extract_strided_slice %121 {offsets = [0, 3, 0, 0], sizes = [2, 1, 8, 1], strides = [1, 1, 1, 1]} : vector<2x8x8x1xf32> to vector<2x1x8x1xf32>
    %162 = vector.shape_cast %161 : vector<2x1x8x1xf32> to vector<2x8x1xf32>
    %163 = vector.broadcast %162 : vector<2x8x1xf32> to vector<2x8x64xf32>
    %164 = arith.mulf %160, %163 : vector<2x8x64xf32>
    %cst_48 = arith.constant dense<0.000000e+00> : vector<2x64xf32>
    %165 = vector.multi_reduction <add>, %164, %cst_48 [1] : vector<2x8x64xf32> to vector<2x64xf32>
    %166 = vector.extract_strided_slice %114 {offsets = [0, 4, 0, 0], sizes = [2, 1, 8, 64], strides = [1, 1, 1, 1]} : vector<2x8x8x64xf32> to vector<2x1x8x64xf32>
    %167 = vector.shape_cast %166 : vector<2x1x8x64xf32> to vector<2x8x64xf32>
    %168 = arith.mulf %167, %160 : vector<2x8x64xf32>
    %169 = vector.extract_strided_slice %120 {offsets = [0, 4, 0, 0], sizes = [2, 1, 8, 64], strides = [1, 1, 1, 1]} : vector<2x8x8x64xf32> to vector<2x1x8x64xf32>
    %170 = vector.shape_cast %169 : vector<2x1x8x64xf32> to vector<2x8x64xf32>
    %171 = arith.addf %168, %170 : vector<2x8x64xf32>
    %172 = vector.extract_strided_slice %121 {offsets = [0, 4, 0, 0], sizes = [2, 1, 8, 1], strides = [1, 1, 1, 1]} : vector<2x8x8x1xf32> to vector<2x1x8x1xf32>
    %173 = vector.shape_cast %172 : vector<2x1x8x1xf32> to vector<2x8x1xf32>
    %174 = vector.broadcast %173 : vector<2x8x1xf32> to vector<2x8x64xf32>
    %175 = arith.mulf %171, %174 : vector<2x8x64xf32>
    %cst_49 = arith.constant dense<0.000000e+00> : vector<2x64xf32>
    %176 = vector.multi_reduction <add>, %175, %cst_49 [1] : vector<2x8x64xf32> to vector<2x64xf32>
    %177 = vector.extract_strided_slice %114 {offsets = [0, 5, 0, 0], sizes = [2, 1, 8, 64], strides = [1, 1, 1, 1]} : vector<2x8x8x64xf32> to vector<2x1x8x64xf32>
    %178 = vector.shape_cast %177 : vector<2x1x8x64xf32> to vector<2x8x64xf32>
    %179 = arith.mulf %178, %171 : vector<2x8x64xf32>
    %180 = vector.extract_strided_slice %120 {offsets = [0, 5, 0, 0], sizes = [2, 1, 8, 64], strides = [1, 1, 1, 1]} : vector<2x8x8x64xf32> to vector<2x1x8x64xf32>
    %181 = vector.shape_cast %180 : vector<2x1x8x64xf32> to vector<2x8x64xf32>
    %182 = arith.addf %179, %181 : vector<2x8x64xf32>
    %183 = vector.extract_strided_slice %121 {offsets = [0, 5, 0, 0], sizes = [2, 1, 8, 1], strides = [1, 1, 1, 1]} : vector<2x8x8x1xf32> to vector<2x1x8x1xf32>
    %184 = vector.shape_cast %183 : vector<2x1x8x1xf32> to vector<2x8x1xf32>
    %185 = vector.broadcast %184 : vector<2x8x1xf32> to vector<2x8x64xf32>
    %186 = arith.mulf %182, %185 : vector<2x8x64xf32>
    %cst_50 = arith.constant dense<0.000000e+00> : vector<2x64xf32>
    %187 = vector.multi_reduction <add>, %186, %cst_50 [1] : vector<2x8x64xf32> to vector<2x64xf32>
    %188 = vector.extract_strided_slice %114 {offsets = [0, 6, 0, 0], sizes = [2, 1, 8, 64], strides = [1, 1, 1, 1]} : vector<2x8x8x64xf32> to vector<2x1x8x64xf32>
    %189 = vector.shape_cast %188 : vector<2x1x8x64xf32> to vector<2x8x64xf32>
    %190 = arith.mulf %189, %182 : vector<2x8x64xf32>
    %191 = vector.extract_strided_slice %120 {offsets = [0, 6, 0, 0], sizes = [2, 1, 8, 64], strides = [1, 1, 1, 1]} : vector<2x8x8x64xf32> to vector<2x1x8x64xf32>
    %192 = vector.shape_cast %191 : vector<2x1x8x64xf32> to vector<2x8x64xf32>
    %193 = arith.addf %190, %192 : vector<2x8x64xf32>
    %194 = vector.extract_strided_slice %121 {offsets = [0, 6, 0, 0], sizes = [2, 1, 8, 1], strides = [1, 1, 1, 1]} : vector<2x8x8x1xf32> to vector<2x1x8x1xf32>
    %195 = vector.shape_cast %194 : vector<2x1x8x1xf32> to vector<2x8x1xf32>
    %196 = vector.broadcast %195 : vector<2x8x1xf32> to vector<2x8x64xf32>
    %197 = arith.mulf %193, %196 : vector<2x8x64xf32>
    %cst_51 = arith.constant dense<0.000000e+00> : vector<2x64xf32>
    %198 = vector.multi_reduction <add>, %197, %cst_51 [1] : vector<2x8x64xf32> to vector<2x64xf32>
    %199 = vector.extract_strided_slice %114 {offsets = [0, 7, 0, 0], sizes = [2, 1, 8, 64], strides = [1, 1, 1, 1]} : vector<2x8x8x64xf32> to vector<2x1x8x64xf32>
    %200 = vector.shape_cast %199 : vector<2x1x8x64xf32> to vector<2x8x64xf32>
    %201 = arith.mulf %200, %193 : vector<2x8x64xf32>
    %202 = vector.extract_strided_slice %120 {offsets = [0, 7, 0, 0], sizes = [2, 1, 8, 64], strides = [1, 1, 1, 1]} : vector<2x8x8x64xf32> to vector<2x1x8x64xf32>
    %203 = vector.shape_cast %202 : vector<2x1x8x64xf32> to vector<2x8x64xf32>
    %204 = arith.addf %201, %203 : vector<2x8x64xf32>
    %205 = vector.extract_strided_slice %121 {offsets = [0, 7, 0, 0], sizes = [2, 1, 8, 1], strides = [1, 1, 1, 1]} : vector<2x8x8x1xf32> to vector<2x1x8x1xf32>
    %206 = vector.shape_cast %205 : vector<2x1x8x1xf32> to vector<2x8x1xf32>
    %207 = vector.broadcast %206 : vector<2x8x1xf32> to vector<2x8x64xf32>
    %208 = arith.mulf %204, %207 : vector<2x8x64xf32>
    %cst_52 = arith.constant dense<0.000000e+00> : vector<2x64xf32>
    %209 = vector.multi_reduction <add>, %208, %cst_52 [1] : vector<2x8x64xf32> to vector<2x64xf32>
    %210 = vector.shape_cast %132 : vector<2x64xf32> to vector<2x1x64xf32>
    %211 = vector.shape_cast %143 : vector<2x64xf32> to vector<2x1x64xf32>
    %212 = vector.shape_cast %154 : vector<2x64xf32> to vector<2x1x64xf32>
    %213 = vector.shape_cast %165 : vector<2x64xf32> to vector<2x1x64xf32>
    %214 = vector.shape_cast %176 : vector<2x64xf32> to vector<2x1x64xf32>
    %215 = vector.shape_cast %187 : vector<2x64xf32> to vector<2x1x64xf32>
    %216 = vector.shape_cast %198 : vector<2x64xf32> to vector<2x1x64xf32>
    %217 = vector.shape_cast %209 : vector<2x64xf32> to vector<2x1x64xf32>
    %218 = tpu.concatenate %210, %211, %212, %213, %214, %215, %216, %217 in 1 : vector<2x1x64xf32>, vector<2x1x64xf32>, vector<2x1x64xf32>, vector<2x1x64xf32>, vector<2x1x64xf32>, vector<2x1x64xf32>, vector<2x1x64xf32>, vector<2x1x64xf32> -> vector<2x8x64xf32>
    %219 = vector.shape_cast %30 : vector<1x64xf32> to vector<1x1x64xf32>
    %220 = vector.broadcast %219 : vector<1x1x64xf32> to vector<2x8x64xf32>
    %221 = arith.mulf %88, %220 : vector<2x8x64xf32>
    %222 = arith.addf %218, %221 : vector<2x8x64xf32>
    %223 = arith.negf %51 : vector<2x8x64xf32>
    %224 = math.exp %223 : vector<2x8x64xf32>
    %cst_53 = arith.constant 1.000000e+00 : f32
    %225 = vector.broadcast %cst_53 : f32 to vector<2x8x64xf32>
    %226 = arith.addf %225, %224 : vector<2x8x64xf32>
    %227 = arith.divf %225, %226 : vector<2x8x64xf32>
    %228 = arith.mulf %51, %227 : vector<2x8x64xf32>
    %229 = arith.mulf %222, %228 : vector<2x8x64xf32>
    %230 = vector.shape_cast %229 : vector<2x8x64xf32> to vector<16x64xf32>
    %cst_54 = arith.constant dense<0.000000e+00> : vector<16x32xf32>
    %231 = tpu.matmul %230, %32, %cst_54 {dimension_numbers = #tpu.dot_dimension_numbers<[1], [0], [0], [1], [0, 0, 1, 1], [], []>} : vector<16x64xf32>, vector<64x32xf32>, vector<16x32xf32> -> vector<16x32xf32>
    %232 = vector.shape_cast %231 : vector<16x32xf32> to vector<2x8x32xf32>
    %233 = arith.addf %14, %232 : vector<2x8x32xf32>
    %c0_55 = arith.constant 0 : index
    %c0_56 = arith.constant 0 : index
    %c0_57 = arith.constant 0 : index
    %234 = vector.load %arg16[%c0_55, %c0_56, %c0_57] : memref<2x8x32xf32, #tpu.memory_space<vmem>>, vector<2x8x32xf32>
    tpu.vector_store %arg16[%c0_55, %c0_56, %c0_57], %233 {strides = array<i32>} : memref<2x8x32xf32, #tpu.memory_space<vmem>>, vector<2x8x32xf32>,
    %c1_i32 = arith.constant 1 : i32
    %235 = arith.cmpi eq, %arg0, %c1_i32 : i32
    %236 = arith.extui %235 : i1 to i32
    %c0_i32_58 = arith.constant 0 : i32
    %237 = arith.cmpi ne, %236, %c0_i32_58 : i32
    scf.if %237 {
      %238 = arith.mulf %233, %233 : vector<2x8x32xf32>
      %cst_59 = arith.constant dense<0.000000e+00> : vector<2x8xf32>
      %239 = vector.multi_reduction <add>, %238, %cst_59 [2] : vector<2x8x32xf32> to vector<2x8xf32>
      %240 = vector.shape_cast %239 : vector<2x8xf32> to vector<2x8x1xf32>
      %cst_60 = arith.constant 3.200000e+01 : f32
      %241 = vector.broadcast %cst_60 : f32 to vector<2x8x1xf32>
      %242 = arith.divf %240, %241 : vector<2x8x1xf32>
      %cst_61 = arith.constant 9.99999974E-6 : f32
      %243 = vector.broadcast %cst_61 : f32 to vector<2x8x1xf32>
      %244 = arith.addf %242, %243 : vector<2x8x1xf32>
      %245 = math.rsqrt %244 : vector<2x8x1xf32>
      %246 = vector.broadcast %245 : vector<2x8x1xf32> to vector<2x8x32xf32>
      %247 = arith.mulf %233, %246 : vector<2x8x32xf32>
      %c0_62 = arith.constant 0 : index
      %c0_63 = arith.constant 0 : index
      %248 = vector.load %arg13[%c0_62, %c0_63] : memref<1x32xf32, #tpu.memory_space<vmem>>, vector<1x32xf32>
      %249 = vector.shape_cast %248 : vector<1x32xf32> to vector<1x1x32xf32>
      %250 = vector.broadcast %249 : vector<1x1x32xf32> to vector<2x8x32xf32>
      %251 = arith.mulf %247, %250 : vector<2x8x32xf32>
      %252 = vector.shape_cast %251 : vector<2x8x32xf32> to vector<16x32xf32>
      %c0_64 = arith.constant 0 : index
      %c0_65 = arith.constant 0 : index
      %253 = vector.load %arg14[%c0_64, %c0_65] : memref<32x128xf32, #tpu.memory_space<vmem>>, vector<32x128xf32>
      %cst_66 = arith.constant dense<0.000000e+00> : vector<16x128xf32>
      %254 = tpu.matmul %252, %253, %cst_66 {dimension_numbers = #tpu.dot_dimension_numbers<[1], [0], [0], [1], [0, 0, 1, 1], [], []>} : vector<16x32xf32>, vector<32x128xf32>, vector<16x128xf32> -> vector<16x128xf32>
      %255 = vector.shape_cast %254 : vector<16x128xf32> to vector<2x8x128xf32>
      %c0_67 = arith.constant 0 : index
      %c0_68 = arith.constant 0 : index
      %c0_69 = arith.constant 0 : index
      %256 = vector.load %arg15[%c0_67, %c0_68, %c0_69] : memref<2x8x128xf32, #tpu.memory_space<vmem>>, vector<2x8x128xf32>
      tpu.vector_store %arg15[%c0_67, %c0_68, %c0_69], %255 {strides = array<i32>} : memref<2x8x128xf32, #tpu.memory_space<vmem>>, vector<2x8x128xf32>,
    } else {
    }
    return
  }
  func.func @transform_0(%arg0: i32) -> (i32, i32) {
    %c0_i32 = arith.constant 0 : i32
    %c0_i32_0 = arith.constant 0 : i32
    %c0_i32_1 = arith.constant 0 : i32
    return %c0_i32, %c0_i32_0 : i32, i32
  }
  func.func @transform_1(%arg0: i32) -> (i32, i32) {
    %c0_i32 = arith.constant 0 : i32
    %c0_i32_0 = arith.constant 0 : i32
    %c0_i32_1 = arith.constant 0 : i32
    return %c0_i32, %c0_i32_0 : i32, i32
  }
  func.func @transform_2(%arg0: i32) -> (i32, i32, i32, i32) {
    %c0_i32 = arith.constant 0 : i32
    %c0_i32_0 = arith.constant 0 : i32
    %c0_i32_1 = arith.constant 0 : i32
    %c0_i32_2 = arith.constant 0 : i32
    return %arg0, %c0_i32, %c0_i32_0, %c0_i32_1 : i32, i32, i32, i32
  }
  func.func @transform_3(%arg0: i32) -> (i32, i32, i32) {
    %c0_i32 = arith.constant 0 : i32
    %c0_i32_0 = arith.constant 0 : i32
    %c0_i32_1 = arith.constant 0 : i32
    return %arg0, %c0_i32, %c0_i32_0 : i32, i32, i32
  }
  func.func @transform_4(%arg0: i32) -> (i32, i32, i32) {
    %c0_i32 = arith.constant 0 : i32
    %c0_i32_0 = arith.constant 0 : i32
    %c0_i32_1 = arith.constant 0 : i32
    return %arg0, %c0_i32, %c0_i32_0 : i32, i32, i32
  }
  func.func @transform_5(%arg0: i32) -> (i32, i32, i32) {
    %c0_i32 = arith.constant 0 : i32
    %c0_i32_0 = arith.constant 0 : i32
    %c0_i32_1 = arith.constant 0 : i32
    return %arg0, %c0_i32, %c0_i32_0 : i32, i32, i32
  }
  func.func @transform_6(%arg0: i32) -> (i32, i32, i32) {
    %c0_i32 = arith.constant 0 : i32
    %c0_i32_0 = arith.constant 0 : i32
    %c0_i32_1 = arith.constant 0 : i32
    return %arg0, %c0_i32, %c0_i32_0 : i32, i32, i32
  }
  func.func @transform_7(%arg0: i32) -> (i32, i32, i32) {
    %c0_i32 = arith.constant 0 : i32
    %c0_i32_0 = arith.constant 0 : i32
    %c0_i32_1 = arith.constant 0 : i32
    return %arg0, %c0_i32, %c0_i32_0 : i32, i32, i32
  }
  func.func @transform_8(%arg0: i32) -> (i32, i32, i32) {
    %c0_i32 = arith.constant 0 : i32
    %c0_i32_0 = arith.constant 0 : i32
    %c0_i32_1 = arith.constant 0 : i32
    return %arg0, %c0_i32, %c0_i32_0 : i32, i32, i32
  }
  func.func @transform_9(%arg0: i32) -> (i32, i32, i32) {
    %c0_i32 = arith.constant 0 : i32
    %c0_i32_0 = arith.constant 0 : i32
    %c0_i32_1 = arith.constant 0 : i32
    return %arg0, %c0_i32, %c0_i32_0 : i32, i32, i32
  }
  func.func @transform_10(%arg0: i32) -> (i32, i32, i32) {
    %c0_i32 = arith.constant 0 : i32
    %c0_i32_0 = arith.constant 0 : i32
    %c0_i32_1 = arith.constant 0 : i32
    return %arg0, %c0_i32, %c0_i32_0 : i32, i32, i32
  }
  func.func @transform_11(%arg0: i32) -> (i32, i32, i32) {
    %c0_i32 = arith.constant 0 : i32
    %c0_i32_0 = arith.constant 0 : i32
    %c0_i32_1 = arith.constant 0 : i32
    return %arg0, %c0_i32, %c0_i32_0 : i32, i32, i32
  }
  func.func @transform_12(%arg0: i32) -> (i32, i32) {
    %c0_i32 = arith.constant 0 : i32
    %c0_i32_0 = arith.constant 0 : i32
    %c0_i32_1 = arith.constant 0 : i32
    return %c0_i32, %c0_i32_0 : i32, i32
  }
  func.func @transform_13(%arg0: i32) -> (i32, i32) {
    %c0_i32 = arith.constant 0 : i32
    %c0_i32_0 = arith.constant 0 : i32
    %c0_i32_1 = arith.constant 0 : i32
    return %c0_i32, %c0_i32_0 : i32, i32
  }
  func.func @transform_14(%arg0: i32) -> (i32, i32, i32) {
    %c0_i32 = arith.constant 0 : i32
    %c0_i32_0 = arith.constant 0 : i32
    %c0_i32_1 = arith.constant 0 : i32
    %c0_i32_2 = arith.constant 0 : i32
    return %c0_i32, %c0_i32_0, %c0_i32_1 : i32, i32, i32
  }
}

</mosaic_0001>

<bundles_post_ra>
// kernel: mamba_vae_forward.3
= control target key start
LH: loop header
LB: loop body
LE: loop exit
PB: predicated region body
PF: predicated region fallthrough
CT: control target
= control target key end

     0   :  { %s2705_s29 = smov 0   ;;  %s3244_s0 = inlined_call_operand.vmem [shape: s32[16,1], index: 0, kind: input, shape index: {}]   ;;  %s3245_s1 = inlined_call_operand.vmem [shape: f32[128,32], index: 1, kind: input, shape index: {}]   ;;  %s3246_s2 = inlined_call_operand.vmem [shape: f32[2,2,64,8], index: 2, kind: input, shape index: {}]   ;;  %s3247_s3 = inlined_call_operand.vmem [shape: f32[2,1,32], index: 3, kind: input, shape index: {}]   ;;  %s3248_s4 = inlined_call_operand.vmem [shape: f32[2,32,128], index: 4, kind: input, shape index: {}]   ;;  %s3249_s5 = inlined_call_operand.vmem [shape: f32[2,4,64], index: 5, kind: input, shape index: {}]   ;;  %s3250_s6 = inlined_call_operand.vmem [shape: f32[2,1,64], index: 6, kind: input, shape index: {}]   ;;  %s3251_s7 = inlined_call_operand.vmem [shape: f32[2,64,128], index: 7, kind: input, shape index: {}]   ;;  %s3252_s8 = inlined_call_operand.vmem [shape: f32[2,1,64], index: 8, kind: input, shape index: {}]   ;;  %s3253_s9 = inlined_call_operand.vmem [shape: f32[2,8,64], index: 9, kind: input, shape index: {}]   ;;  %s3254_s10 = inlined_call_operand.vmem [shape: f32[2,1,64], index: 10, kind: input, shape index: {}]   ;;  %s3255_s11 = inlined_call_operand.vmem [shape: f32[2,64,32], index: 11, kind: input, shape index: {}]   ;;  %s3256_s12 = inlined_call_operand.vmem [shape: f32[1,32], index: 12, kind: input, shape index: {}]   ;;  %s3257_s13 = inlined_call_operand.vmem [shape: f32[32,128], index: 13, kind: input, shape index: {}]   ;;  %s3258_s14 = inlined_call_operand.vmem [shape: f32[2,8,128], index: 14, kind: output, shape index: {}]  }
   0x1   :  { %3262 = sst [smem:[#allocation4_spill]] %s3246_s2 }
   0x2   :  { %3263 = sst [smem:[#allocation5_spill]] %s3248_s4 }
   0x3   :  { %3264 = sst [smem:[#allocation6_spill]] %s3256_s12 }
   0x4   :  { %3265 = sst [smem:[#allocation7_spill]] %s3257_s13 }
   0x5   :  { %3266 = sst [smem:[#allocation8_spill]] %s3258_s14 }
   0x6 LB: > { %3267 = sst [smem:[#allocation3_spill]] %s2624_s29  ;;  %s2711_s30 = sadd.s32 4294967295, %s2624_s29   ;;  %s2624_s29 = sphi %s2705_s29, %s24_s29  }
   0x7   : > { %p2273_p0 = scmp.ge.s32.totalorder %s2624_s29, 1  ;;  %p487_p1 = scmp.lt.s32.totalorder %s2624_s29, 3 }
   0x9   : > { %p488_p2 = pnand %p2273_p0, %p487_p1 }
   0xa   : > { %p563_p3 = scmp.lt.s32.totalorder (!%p488_p2), %s2711_s30, 1  ;;  %s3268_s2 = sld [smem:[#allocation4_spill]] (!%p488_p2) }
   0xb   : > { %491 = sbr.rel (%p488_p2) target bundleno = 1816 (0x718), region = 76  ;;  %s3269_s4 = sld [smem:[#allocation5_spill]] (!%p488_p2) }
   0xc   : > { %p2284_p4 = scmp.ne.s32.totalorder (!%p488_p2), %s2711_s30, 0 }
  0x12   : > { %s2717_s15 = scalar_select %p563_p3, %s2711_s30, 1 }
  0x13   : > { %v609_v0 = vld [vmem:[%s3244_s0] sm:$0xff] (!%p2284_p4)  ;;  %v2626_v2 = vmov (!%p2284_p4), 0   ;;  %v624_v3 = vld [vmem:[%s3245_s1 + $0x8] sm:$0xff] (!%p2284_p4)  ;;  %v625_v4 = vld [vmem:[%s3245_s1 + $0x10] sm:$0xff] (!%p2284_p4)  ;;  %v607_v27 = vlaneseq (!%p2284_p4)  ;;  %v2627_v30 = vmov (!%p2284_p4), 1.0   ;;  %vm714_vm2 = vcmask (!%p2284_p4), 261120  }
  0x14   : > { %s2309_s16 = sshll.u32 %s2717_s15, 7  ;;  %s2310_s23 = sshll.u32 %s2717_s15, 5  ;;  %v623_v1 = vld [vmem:[%s3245_s1] sm:$0xff] (!%p2284_p4)  ;;  %2551 = vset.pattern.permute.xlu0 (!%p2284_p4), %v2626_v2  ;;  %v626_v5 = vld [vmem:[%s3245_s1 + $0x18] sm:$0xff] (!%p2284_p4)  ;;  %v610_v8 = vld [vmem:[%s3244_s0 + $0x8] sm:$0xff] (!%p2284_p4) }
  0x15   : > { %s2727_s22 = scalar_lea.vmem %s3268_s2, %s2309_s16  ;;  %s2733_s26 = scalar_lea.vmem %s3269_s4, %s2310_s23  ;;  %612 = vperm.xlu0 (!%p2284_p4), %2551, %v609_v0   ;;  %v2458_v6 = vpack.c.bf16 (!%p2284_p4), %v624_v3, %v623_v1  ;;  %v2462_v7 = vpack.c.bf16 (!%p2284_p4), %v626_v5, %v625_v4  ;;  %v627_v9 = vld [vmem:[%s3245_s1 + $0x20] sm:$0xff] (!%p2284_p4)  ;;  %v628_v10 = vld [vmem:[%s3245_s1 + $0x28] sm:$0xff] (!%p2284_p4)  ;;  %v629_v12 = vld [vmem:[%s3245_s1 + $0x30] sm:$0xff] (!%p2284_p4)  ;;  %v608_v28 = vand.u32 (!%p2284_p4), 127, %v607_v27 }
  0x16   : > { %s2278_s27 = sshll.u32 %s2717_s15, 2  ;;  %s2311_s19 = sshll.u32 %s2717_s15, 6  ;;  %v2466_v11 = vpack.c.bf16 (!%p2284_p4), %v628_v10, %v627_v9  ;;  %v630_v13 = vld [vmem:[%s3245_s1 + $0x38] sm:$0xff] (!%p2284_p4)  ;;  %v631_v15 = vld [vmem:[%s3245_s1 + $0x40] sm:$0xff] (!%p2284_p4)  ;;  %v632_v16 = vld [vmem:[%s3245_s1 + $0x48] sm:$0xff] (!%p2284_p4) }
  0x17   : > { %s2739_s14 = scalar_lea.vmem %s3249_s5, %s2278_s27  ;;  %s590_s21 = scalar_lea.vmem %s3252_s8, %s2717_s15  ;;  %2459 = vmatprep.subr.bf16.mxu0 (!%p2284_p4), %v2458_v6  ;;  %v2470_v14 = vpack.c.bf16 (!%p2284_p4), %v630_v13, %v629_v12  ;;  %v2474_v17 = vpack.c.bf16 (!%p2284_p4), %v632_v16, %v631_v15  ;;  %v633_v18 = vld [vmem:[%s3245_s1 + $0x50] sm:$0xff] (!%p2284_p4)  ;;  %v634_v19 = vld [vmem:[%s3245_s1 + $0x58] sm:$0xff] (!%p2284_p4)  ;;  %v635_v21 = vld [vmem:[%s3245_s1 + $0x60] sm:$0xff] (!%p2284_p4) }
  0x18   : > { %s2753_s23 = scalar_lea.vmem %s3251_s7, %s2311_s19  ;;  %s2281_s24 = sshll.u32 %s2717_s15, 3  ;;  %2461 = vmatpush3.bf16.msra.mxu0 (!%p2284_p4), %v2458_v6  ;;  %v2478_v20 = vpack.c.bf16 (!%p2284_p4), %v634_v19, %v633_v18  ;;  %v636_v22 = vld [vmem:[%s3245_s1 + $0x68] sm:$0xff] (!%p2284_p4)  ;;  %v637_v24 = vld [vmem:[%s3245_s1 + $0x70] sm:$0xff] (!%p2284_p4)  ;;  %v638_v25 = vld [vmem:[%s3245_s1 + $0x78] sm:$0xff] (!%p2284_p4) }
  0x19   : > { %s2759_s29 = scalar_lea.vmem %s3253_s9, %s2281_s24  ;;  %s597_s12 = scalar_lea.vmem %s3254_s10, %s2717_s15  ;;  %615 = vperm.xlu0 (!%p2284_p4), %2551, %v610_v8   ;;  %2463 = vmatprep.subr.bf16.mxu0 (!%p2284_p4), %v2462_v7  ;;  %v2482_v23 = vpack.c.bf16 (!%p2284_p4), %v636_v22, %v635_v21  ;;  %v2486_v26 = vpack.c.bf16 (!%p2284_p4), %v638_v25, %v637_v24 }
  0x1a   : > { %s2768_s20 = scalar_lea.vmem %s3255_s11, %s2311_s19  ;;  %606 = sbr.rel (%p2284_p4) target bundleno = 368 (0x170), region = 80 }
  0x1c   : > { %2465 = vmatpush3.bf16.msra.mxu0 (!%p2284_p4), %v2462_v7 }
  0x1d   : > { %2467 = vmatprep.subr.bf16.mxu0 (!%p2284_p4), %v2466_v11 }
  0x20   : > { %2469 = vmatpush3.bf16.msra.mxu0 (!%p2284_p4), %v2466_v11 }
  0x21   : > { %2471 = vmatprep.subr.bf16.mxu0 %v2470_v14 }
  0x24   : > { %2473 = vmatpush3.bf16.msra.mxu0 %v2470_v14 }
  0x25   : > { %2475 = vmatprep.subr.bf16.mxu0 %v2474_v17 }
  0x28   : > { %2477 = vmatpush3.bf16.msra.mxu0 %v2474_v17 }
  0x29   : > { %2479 = vmatprep.subr.bf16.mxu0 %v2478_v20 }
  0x2c   : > { %2481 = vmatpush3.bf16.msra.mxu0 %v2478_v20 }
  0x2d   : > { %2483 = vmatprep.subr.bf16.mxu0 %v2482_v23 }
  0x30   : > { %2485 = vmatpush3.bf16.msra.mxu0 %v2482_v23 }
  0x31   : > { %2487 = vmatprep.subr.bf16.mxu0 %v2486_v26 }
  0x34   : > { %2489 = vmatpush3.bf16.msra.mxu0 %v2486_v26 }
  0x94   : > { %v613_v29 = vpop.permute.xlu0 %612 }
  0x95   : > { %vm617_vm0 = vcmp.eq.s32.totalorder %v608_v28, %v613_v29 }
  0x96   : > { %2395 = vmatprep.mubr.msk.f32.mxu0 %vm617_vm0, %v2627_v30 }
  0x98   : > { %v616_v31 = vpop.permute.xlu0 %615 }
  0x99   : > { %vm618_vm1 = vcmp.eq.s32.totalorder %v608_v28, %v616_v31 }
  0x9a   : > { %2396 = vmatmul.mubr.msk.f32.vlgmr.msra.gmra.mrb[0].mxu0 %vm618_vm1, %v2627_v30 }
 0x16d   : > { %v2397_v32 = vpop.f32.mrb[0].mxu0 }
 0x16e   : > { %716 = vst.msk [vmem:[#allocation2 + $0x8] sm:$0xff] %vm714_vm2, %v2397_v32  ;;  %v705_v33 = vpop.f32.mrb[1].mxu0 }
 0x16f   : > { %715 = vst.msk [vmem:[#allocation2] sm:$0xff] %vm714_vm2, %v705_v33 }
 0x170 PF: > { %vm827_vm3 = vcmask 261120   ;;  %v800_v40 = vld [vmem:[%s2733_s26] sm:$0xff]  ;;  %v801_v41 = vld [vmem:[%s2733_s26 + $0x8] sm:$0xff]  ;;  %v802_v42 = vld [vmem:[%s2733_s26 + $0x10] sm:$0xff]  ;;  %s3270_s24 = scalar_lea.vmem %s3247_s3, %s2717_s15  ;;  %v932_v23 = vlaneseq  ;;  %vm952_vm4 = vcmask 1040384   ;;  %vm967_vm5 = vcmask 1041408  }
 0x171   : > { %v2490_v43 = vpack.c.bf16 %v801_v41, %v800_v40  ;;  %v803_v44 = vld [vmem:[%s2733_s26 + $0x18] sm:$0xff]  ;;  %v2289_v53 = vld [vmem:[%s3270_s24] ss:$0 sm:$0xff]  ;;  %v807_v60 = vld [vmem:[%s2753_s23 + $0x8] sm:$0xff]  ;;  %vm982_vm6 = vcmask 1042432   ;;  %vm1007_vm7 = vcmask 523264  }
 0x172   : > { %v2494_v45 = vpack.c.bf16 %v803_v44, %v802_v42  ;;  %v806_v59 = vld [vmem:[%s2753_s23] sm:$0xff]  ;;  %v808_v61 = vld [vmem:[%s2753_s23 + $0x10] sm:$0xff]  ;;  %v809_v63 = vld [vmem:[%s2753_s23 + $0x18] sm:$0xff]  ;;  %v2862_v24 = vshrl.u32 %v932_v23, 7  ;;  %vm1899_vm8 = vcmask 1043456   ;;  %vm1902_vm9 = vcmask 1044480  }
 0x173   : > { %2491 = vmatprep.subr.bf16.mxu0 %v2490_v43  ;;  %v2498_v62 = vpack.c.bf16 %v807_v60, %v806_v59  ;;  %v2502_v0 = vpack.c.bf16 %v809_v63, %v808_v61  ;;  %v810_v1 = vld [vmem:[%s2753_s23 + $0x20] sm:$0xff]  ;;  %v811_v2 = vld [vmem:[%s2753_s23 + $0x28] sm:$0xff]  ;;  %v812_v4 = vld [vmem:[%s2753_s23 + $0x30] sm:$0xff]  ;;  %vm1905_vm10 = vcmask 1045504   ;;  %vm1908_vm11 = vcmask 1046528   ;;  %p2303_p5 = scmp.ne.s32.totalorder %s2711_s30, 1 }
 0x174   : > { %2493 = vmatpush3.bf16.msra.mxu0 %v2490_v43  ;;  %v2506_v3 = vpack.c.bf16 %v811_v2, %v810_v1  ;;  %v813_v5 = vld [vmem:[%s2753_s23 + $0x38] sm:$0xff]  ;;  %v725_v7 = vld [vmem:[%s2727_s22 + $0x40] sm:$0xff]  ;;  %v726_v9 = vld [vmem:[%s2727_s22 + $0x48] sm:$0xff]  ;;  %v2865_v25 = vsub.s32 3, %v2862_v24  ;;  %v2870_v28 = vsub.s32 2, %v2862_v24  ;;  %v2873_v29 = vsub.s32 1, %v2862_v24  ;;  %s3271_s23 = scalar_lea.vmem %s3250_s6, %s2717_s15 }
 0x175   : > { %v798_v35 = vld [vmem:[#allocation2 + $0x8] sm:$0xff]  ;;  %2495 = vmatprep.subr.bf16.mxu0 %v2494_v45  ;;  %2499 = vmatprep.subr.bf16.mxu1 %v2498_v62  ;;  %v2510_v6 = vpack.c.bf16 %v813_v5, %v812_v4  ;;  %v717_v8 = vld [vmem:[%s2727_s22] sm:$0xff]  ;;  %v727_v11 = vld [vmem:[%s2727_s22 + $0x50] sm:$0xff]  ;;  %v2878_v31 = vsub.s32 0, %v2862_v24  ;;  %s3272_s19 = sld [smem:[#allocation7_spill]] (!%p2303_p5)  ;;  %s3273_s4 = sld [smem:[#allocation6_spill]] (!%p2303_p5) }
 0x176   : > { %v797_v34 = vld [vmem:[#allocation2] sm:$0xff]  ;;  %v826_v37 = vmul.f32 %v798_v35, %v798_v35  ;;  %2501 = vmatpush3.bf16.msra.mxu1 %v2498_v62  ;;  %733 = vxpose.xlu1.b32.start [1/8] (short) (narrow) %v717_v8, 8  ;;  %v718_v10 = vld [vmem:[%s2727_s22 + $0x8] sm:$0xff]  ;;  %v719_v12 = vld [vmem:[%s2727_s22 + $0x10] sm:$0xff] }
 0x177   : > { %v825_v36 = vmul.f32 %v797_v34, %v797_v34  ;;  %2503 = vmatprep.subr.bf16.mxu1 %v2502_v0  ;;  %v728_v13 = vld [vmem:[%s2727_s22 + $0x58] sm:$0xff]  ;;  %v729_v15 = vld [vmem:[%s2727_s22 + $0x60] sm:$0xff]  ;;  %v730_v17 = vld [vmem:[%s2727_s22 + $0x68] sm:$0xff] }
 0x178   : > { %v831_v39 = vsel %vm827_vm3, %v826_v37, 0.0  ;;  %2497 = vmatpush3.bf16.msra.mxu0 %v2494_v45  ;;  %v720_v14 = vld [vmem:[%s2727_s22 + $0x18] sm:$0xff]  ;;  %v721_v16 = vld [vmem:[%s2727_s22 + $0x20] sm:$0xff]  ;;  %v722_v18 = vld [vmem:[%s2727_s22 + $0x28] sm:$0xff] }
 0x179   : > { %v828_v38 = vsel %vm827_vm3, %v825_v36, 0.0  ;;  %v731_v19 = vld [vmem:[%s2727_s22 + $0x70] sm:$0xff]  ;;  %v732_v21 = vld [vmem:[%s2727_s22 + $0x78] sm:$0xff]  ;;  %v804_v26 = vld [vmem:[%s2739_s14] sm:$0xf] }
 0x17a   : > { %829 = vadd.xlane.f32.xlu0 %v828_v38  ;;  %2505 = vmatpush3.bf16.msra.mxu1 %v2502_v0  ;;  %v723_v20 = vld [vmem:[%s2727_s22 + $0x30] sm:$0xff]  ;;  %v724_v22 = vld [vmem:[%s2727_s22 + $0x38] sm:$0xff]  ;;  %v935_v27 = vrot.slane %v804_v26, %v2865_v25  ;;  %v2292_v36 = vld [vmem:[%s3271_s23] ss:$0 sm:$0xff]  ;;  %v958_v37 = vrot.slane %v804_v26, %v2870_v28  ;;  %v973_v43 = vrot.slane %v804_v26, %v2873_v29  ;;  %s3274_s22 = sld [smem:[#allocation8_spill]] (!%p2303_p5) }
 0x17b   : > { %2507 = vmatprep.subr.bf16.mxu1 %v2506_v3  ;;  %734 = vxpose.xlu1.b32.cont [2/8] (short) (narrow) %v718_v10, 8 }
 0x17e   : > { %832 = vadd.xlane.f32.xlu0 %v831_v39  ;;  %2509 = vmatpush3.bf16.msra.mxu1 %v2506_v3 }
 0x17f   : > { %2511 = vmatprep.subr.bf16.mxu1 %v2510_v6  ;;  %735 = vxpose.xlu1.b32.cont [3/8] (short) (narrow) %v719_v12, 8 }
 0x182   : > { %2513 = vmatpush3.bf16.msra.mxu1 %v2510_v6 }
 0x183   : > { %736 = vxpose.xlu1.b32.cont [4/8] (short) (narrow) %v720_v14, 8 }
 0x187   : > { %737 = vxpose.xlu1.b32.cont [5/8] (short) (narrow) %v721_v16, 8  ;;  %v1487_v16 = vsub.s32 5, %v2862_v24 }
 0x18b   : > { %738 = vxpose.xlu1.b32.cont [6/8] (short) (narrow) %v722_v18, 8 }
 0x18f   : > { %739 = vxpose.xlu1.b32.cont [7/8] (short) (narrow) %v723_v20, 8 }
 0x193   : > { %740 = vxpose.xlu1.b32.end [8/8] (short) (narrow) %v724_v22, 8 }
 0x1ab   : > { %765 = vxpose.xlu0.b32.start [1/8] (short) (narrow) %v725_v7, 8 }
 0x1af   : > { %766 = vxpose.xlu0.b32.cont [2/8] (short) (narrow) %v726_v9, 8 }
 0x1b3   : > { %767 = vxpose.xlu0.b32.cont [3/8] (short) (narrow) %v727_v11, 8  ;;  %v1479_v11 = vsub.s32 4, %v2862_v24 }
 0x1b7   : > { %768 = vxpose.xlu0.b32.cont [4/8] (short) (narrow) %v728_v13, 8 }
 0x1bb   : > { %769 = vxpose.xlu0.b32.cont [5/8] (short) (narrow) %v729_v15, 8 }
 0x1bf   : > { %770 = vxpose.xlu0.b32.cont [6/8] (short) (narrow) %v730_v17, 8 }
 0x1c3   : > { %771 = vxpose.xlu0.b32.cont [7/8] (short) (narrow) %v731_v19, 8 }
 0x1c7   : > { %772 = vxpose.xlu0.b32.end [8/8] (short) (narrow) %v732_v21, 8  ;;  %v1495_v21 = vsub.s32 6, %v2862_v24 }
 0x207   : > { %v830_v46 = vpop.xlane.xlu0 %829 }
 0x208   : > { %v835_v47 = vmul.f32 0.03125, %v830_v46 }
 0x20a   : > { %v837_v48 = vadd.f32 1e-05, %v835_v47 }
 0x20b   : > { %v833_v49 = vpop.xlane.xlu0 %832 }
 0x20c   : > { %2552 = vrsqrt.f32 %v837_v48  ;;  %v836_v50 = vmul.f32 0.03125, %v833_v49 }
 0x20e   : > { %v838_v51 = vadd.f32 1e-05, %v836_v50 }
 0x210   : > { %2554 = vrsqrt.f32 %v838_v51  ;;  %v988_v51 = vrot.slane %v804_v26, %v2878_v31 }
 0x216   : > { %v2553_v52 = vpop.eup %2552 }
 0x217   : > { %v841_v54 = vmul.f32 %v2553_v52, %v797_v34 }
 0x219   : > { %v849_v55 = vmul.f32 %v2289_v53, %v841_v54 }
 0x21a   : > { %v2555_v56 = vpop.eup %2554 }
 0x21b   : > { %v842_v57 = vmul.f32 %v2555_v56, %v798_v35  ;;  %2406 = vmatprep.mubr.msk.f32.mxu0 %vm827_vm3, %v849_v55 }
 0x21d   : > { %v850_v58 = vmul.f32 %v2289_v53, %v842_v57 }
 0x21f   : > { %2407 = vmatmul.mubr.msk.f32.vlgmr.msra.gmra.mrb[0].mxu0 %vm827_vm3, %v850_v58 }
 0x2f2   : > { %v2875_v30 = vpop.f32.mrb[0].mxu0 }
 0x2f3   : > { %v937_v32 = vmul.f32 %v2875_v30, %v935_v27  ;;  %v949_v33 = vrot.slane %v2875_v30, 7  ;;  %v964_v34 = vrot.slane %v2875_v30, 6  ;;  %v2883_v35 = vpop.f32.mrb[1].mxu0  ;;  %v979_v42 = vrot.slane %v2875_v30, 5 }
 0x2f4   : > { %v936_v38 = vmul.f32 %v935_v27, %v2883_v35  ;;  %v948_v39 = vrot.slane %v2883_v35, 7  ;;  %v963_v40 = vrot.slane %v2883_v35, 6  ;;  %v978_v50 = vrot.slane %v2883_v35, 5 }
 0x2f5   : > { %v954_v41 = vsel %vm952_vm4, 0.0, %v949_v33  ;;  %v945_v45 = vadd.f32 %v2292_v36, %v937_v32  ;;  %v969_v48 = vsel %vm967_vm5, 0.0, %v964_v34  ;;  %v984_v56 = vsel %vm982_vm6, 0.0, %v979_v42 }
 0x2f6   : > { %v944_v44 = vadd.f32 %v2292_v36, %v936_v38  ;;  %v953_v46 = vsel %vm952_vm4, 0.0, %v948_v39  ;;  %v968_v47 = vsel %vm967_vm5, 0.0, %v963_v40  ;;  %v960_v52 = vmul.f32 %v958_v37, %v954_v41 }
 0x2f7   : > { %v959_v49 = vmul.f32 %v958_v37, %v953_v46  ;;  %v974_v54 = vmul.f32 %v973_v43, %v968_v47  ;;  %v983_v55 = vsel %vm982_vm6, 0.0, %v978_v50  ;;  %v975_v58 = vmul.f32 %v973_v43, %v969_v48 }
 0x2f8   : > { %v962_v57 = vadd.f32 %v960_v52, %v945_v45  ;;  %v989_v60 = vmul.f32 %v988_v51, %v983_v55  ;;  %v990_v62 = vmul.f32 %v988_v51, %v984_v56  ;;  %v2300_v26 = vmul.f32 -1.442695, %v2875_v30 }
 0x2f9   : > { %v961_v53 = vadd.f32 %v959_v49, %v944_v44  ;;  %v1503_v32 = vsub.s32 7, %v2862_v24  ;;  %v2299_v44 = vmul.f32 -1.442695, %v2883_v35 }
 0x2fa   : > { %v977_v61 = vadd.f32 %v975_v58, %v962_v57 }
 0x2fb   : > { %v976_v59 = vadd.f32 %v974_v54, %v961_v53 }
 0x2fc   : > { %v992_v0 = vadd.f32 %v990_v62, %v977_v61 }
 0x2fd   : > { %v991_v63 = vadd.f32 %v989_v60, %v976_v59 }
 0x2fe   : > { %v2294_v2 = vmul.f32 -1.442695, %v992_v0 }
 0x2ff   : > { %v2293_v1 = vmul.f32 -1.442695, %v991_v63 }
 0x301   : > { %2556 = vpow2.f32 %v2293_v1  ;;  %v818_v1 = vld [vmem:[%s2768_s20 + $0x8] sm:$0xff] }
 0x302   : > { %2558 = vpow2.f32 %v2294_v2  ;;  %v819_v2 = vld [vmem:[%s2768_s20 + $0x10] sm:$0xff] }
 0x30b   : > { %v2557_v3 = vpop.eup %2556 }
 0x30c   : > { %v2559_v4 = vpop.eup %2558  ;;  %v999_v5 = vadd.f32 1.0, %v2557_v3 }
 0x30d   : > { %v1000_v6 = vadd.f32 1.0, %v2559_v4 }
 0x30e   : > { %2560 = vrcp.f32 %v999_v5  ;;  %v820_v5 = vld [vmem:[%s2768_s20 + $0x18] sm:$0xff] }
 0x30f   : > { %2562 = vrcp.f32 %v1000_v6  ;;  %v2518_v6 = vpack.c.bf16 %v820_v5, %v819_v2 }
 0x310   : > { %2564 = vpow2.f32 %v2300_v26 }
 0x318   : > { %v2561_v7 = vpop.eup %2560 }
 0x319   : > { %v2563_v8 = vpop.eup %2562  ;;  %v2904_v9 = vmul.f32 %v2561_v7, %v991_v63  ;;  %v821_v7 = vld [vmem:[%s2768_s20 + $0x20] sm:$0xff] }
 0x31a   : > { %v2906_v10 = vmul.f32 %v2563_v8, %v992_v0  ;;  %v2565_v37 = vpop.eup %2564  ;;  %v817_v0 = vld [vmem:[%s2768_s20] sm:$0xff]  ;;  %v822_v8 = vld [vmem:[%s2768_s20 + $0x28] sm:$0xff] }
 0x31b   : > { %2425 = vmatprep.mubr.msk.f32.mxu1 %vm1007_vm7, %v2904_v9  ;;  %v1928_v40 = vadd.f32 1.0, %v2565_v37  ;;  %v2514_v4 = vpack.c.bf16 %v818_v1, %v817_v0 }
 0x31c   : > { %2426 = vmatmul.mubr.msk.f32.vlgmr.msra.gmra.mrb[0].mxu1 %vm1007_vm7, %v2906_v10 }
 0x31d   : > { %2566 = vrcp.f32 %v1928_v40  ;;  %2515 = vmatprep.subr.bf16.mxu0 %v2514_v4 }
 0x31e   : > { %2568 = vpow2.f32 %v2299_v44  ;;  %2517 = vmatpush3.bf16.msra.mxu0 %v2514_v4 }
 0x31f   : > { %2519 = vmatprep.subr.bf16.mxu0 %v2518_v6 }
 0x322   : > { %2521 = vmatpush3.bf16.msra.mxu0 %v2518_v6 }
 0x327   : > { %v2567_v48 = vpop.eup %2566 }
 0x328   : > { %v1934_v49 = vmul.f32 %v2567_v48, %v2875_v30  ;;  %v2569_v50 = vpop.eup %2568  ;;  %v2629_v30 = vmov 1966171168  }
 0x329   : > { %v1927_v52 = vadd.f32 1.0, %v2569_v50  ;;  %v1119_v54 = vunpack.c.l.s4 %v2629_v30 }
 0x32b   : > { %v1120_v57 = vunpack.c.0.s8 %v1119_v54 }
 0x32d   : > { %v2948_v62 = vsub.s32 %v1120_v57, %v2862_v24  ;;  %v2522_v24 = vpack.c.bf16 %v822_v8, %v821_v7 }
 0x32f   : > { %2523 = vmatprep.subr.bf16.mxu0 %v2522_v24 }
 0x330   : > { %2525 = vmatpush3.bf16.msra.mxu0 %v2522_v24 }
 0x3ef   : > { %v2427_v12 = vpop.f32.mrb[0].mxu1 }
 0x3f0   : > { %v2913_v13 = vpop.f32.mrb[1].mxu1  ;;  %v1544_v14 = vrot.slane %v2427_v12, %v1479_v11  ;;  %v1512_v15 = vrot.slane %v2427_v12, %v2878_v31  ;;  %v1552_v17 = vrot.slane %v2427_v12, %v1487_v16  ;;  %v1520_v18 = vrot.slane %v2427_v12, %v2873_v29 }
 0x3f1   : > { %v1528_v19 = vrot.slane %v2427_v12, %v2870_v28  ;;  %v1536_v20 = vrot.slane %v2427_v12, %v2865_v25  ;;  %v1456_v22 = vrot.slane %v2913_v13, %v2873_v29  ;;  %v1560_v23 = vrot.slane %v2427_v12, %v1495_v21  ;;  %v2297_v29 = vld [vmem:[%s590_s21] ss:$0 sm:$0xff]  ;;  %s2628_s21 = smov 64  }
 0x3f2   : > { %1547 = vbcast.lane.b32.xlu0 %v1544_v14, 320  ;;  %1515 = vbcast.lane.b32.xlu1 %v1512_v15, 320  ;;  %v1496_v27 = vrot.slane %v2913_v13, %v1495_v21  ;;  %v1568_v33 = vrot.slane %v2427_v12, %v1503_v32  ;;  %v1504_v34 = vrot.slane %v2913_v13, %v1503_v32 }
 0x3f3   : > { %v1096_v36 = vadd.f32 %v2427_v12, %v2297_v29  ;;  %v1480_v38 = vrot.slane %v2913_v13, %v1479_v11  ;;  %v1488_v41 = vrot.slane %v2913_v13, %v1487_v16  ;;  %v1448_v43 = vrot.slane %v2913_v13, %v2878_v31  ;;  %v823_v11 = vld [vmem:[%s2768_s20 + $0x30] sm:$0xff]  ;;  %v824_v12 = vld [vmem:[%s2768_s20 + $0x38] sm:$0xff] }
 0x3f4   : > { %v1464_v46 = vrot.slane %v2913_v13, %v2870_v28  ;;  %v1472_v47 = vrot.slane %v2913_v13, %v2865_v25  ;;  %v2943_v53 = vadd.f32 %v2297_v29, %v2913_v13 }
 0x3f5   : > { %v1100_v39 = vand.u32 2147483647, %v1096_v36  ;;  %v1098_v61 = vmax.f32 %v1096_v36, 0.0 }
 0x3f6   : > { %1555 = vbcast.lane.b32.xlu0 %v1552_v17, 320  ;;  %1523 = vbcast.lane.b32.xlu1 %v1520_v18, 320  ;;  %v1099_v56 = vand.u32 2147483647, %v2943_v53 }
 0x3f7   : > { %v1102_v42 = vsub.f32 0.0, %v1100_v39 }
 0x3f8   : > { %v1101_v60 = vsub.f32 0.0, %v1099_v56 }
 0x3f9   : > { %v1105_v45 = vmul.f32 1.442695, %v1102_v42  ;;  %v781_v42 = vpop.trf.xlu0 }
 0x3fa   : > { %1703 = vbcast.lane.b32.xlu0 %v1512_v15, 328  ;;  %1531 = vbcast.lane.b32.xlu1 %v1528_v19, 320  ;;  %v1103_v3 = vmul.f32 1.442695, %v1101_v60 }
 0x3fb   : > { %2570 = vpow2.f32 %v1105_v45 }
 0x3fc   : > { %2572 = vrcp.f32 %v1927_v52 }
 0x3fe   : > { %1711 = vbcast.lane.b32.xlu0 %v1528_v19, 328  ;;  %1539 = vbcast.lane.b32.xlu1 %v1536_v20, 320 }
 0x402   : > { %1459 = vbcast.lane.b32.xlu0 %v1456_v22, 320  ;;  %1563 = vbcast.lane.b32.xlu1 %v1560_v23, 320 }
 0x405   : > { %v2571_v51 = vpop.eup %2570 }
 0x406   : > { %1499 = vbcast.lane.b32.xlu0 %v1496_v27, 320  ;;  %1707 = vbcast.lane.b32.xlu1 %v1520_v18, 328  ;;  %v1108_v28 = vadd.f32 1.0, %v2571_v51  ;;  %v2573_v25 = vpop.eup %2572  ;;  %v1097_v51 = vmax.f32 %v2943_v53, 0.0 }
 0x407   : > { %v1933_v59 = vmul.f32 %v2573_v25, %v2883_v35 }
 0x408   : > { %2574 = vlog2.f32 %v1108_v28 }
 0x409   : > { %2576 = vpow2.f32 %v1103_v3 }
 0x40a   : > { %1675 = vbcast.lane.b32.xlu0 %v1456_v22, 328  ;;  %1571 = vbcast.lane.b32.xlu1 %v1568_v33, 320 }
 0x40e   : > { %1507 = vbcast.lane.b32.xlu0 %v1504_v34, 320  ;;  %1715 = vbcast.lane.b32.xlu1 %v1536_v20, 328 }
 0x412   : > { %1687 = vbcast.lane.b32.xlu0 %v1480_v38, 328  ;;  %1719 = vbcast.lane.b32.xlu1 %v1544_v14, 328  ;;  %v2575_v55 = vpop.eup %2574  ;;  %v2526_v14 = vpack.c.bf16 %v824_v12, %v823_v11 }
 0x413   : > { %v1112_v58 = vmul.f32 0.6931472, %v2575_v55  ;;  %v2577_v19 = vpop.eup %2576 }
 0x414   : > { %2527 = vmatprep.subr.bf16.mxu0 %v2526_v14  ;;  %v1107_v21 = vadd.f32 1.0, %v2577_v19 }
 0x415   : > { %v1114_v63 = vadd.f32 %v1112_v58, %v1098_v61  ;;  %2529 = vmatpush3.bf16.msra.mxu0 %v2526_v14 }
 0x416   : > { %1691 = vbcast.lane.b32.xlu0 %v1488_v41, 328  ;;  %1723 = vbcast.lane.b32.xlu1 %v1552_v17, 328  ;;  %v2962_v17 = vld [vmem:[%s2759_s29] sm:$0xff]  ;;  %2578 = vlog2.f32 %v1107_v21 }
 0x417   : > { %v1173_v35 = vrot.slane %v1114_v63, %v2948_v62  ;;  %v2969_v32 = vmul.f32 %v1114_v63, %v2906_v10  ;;  %v1166_v36 = vcombine.high %v1114_v63, %v1114_v63 }
 0x419   : > { %v1189_v13 = vrot.slane %v1173_v35, %v2948_v62  ;;  %v1181_v15 = vcombine.high %v1173_v35, %v1173_v35  ;;  %v1180_v44 = vrot.slane %v1166_v36, %v2948_v62 }
 0x41a   : > { %1695 = vbcast.lane.b32.xlu0 %v1496_v27, 328  ;;  %1451 = vbcast.lane.b32.xlu1 %v1448_v43, 320 }
 0x41b   : > { %v1250_v16 = vrot.slane %v1189_v13, %v2878_v31  ;;  %v1203_v18 = vrot.slane %v1181_v15, %v2948_v62  ;;  %v1211_v26 = vcombine.high %v1189_v13, %v1189_v13  ;;  %v1196_v25 = vrot.slane %v1180_v44, %v2948_v62 }
 0x41c   : > { %v1182_v2 = vcombine.high %v1180_v44, %v1180_v44 }
 0x41d   : > { %v1303_v20 = vmul.f32 %v1250_v16, %v2962_v17  ;;  %v1254_v22 = vrot.slane %v1203_v18, %v2878_v31  ;;  %v1266_v61 = vrot.slane %v1196_v25, %v2878_v31 }
 0x41e   : > { %1699 = vbcast.lane.b32.xlu0 %v1504_v34, 328  ;;  %1467 = vbcast.lane.b32.xlu1 %v1464_v46, 320  ;;  %v1403_v34 = vrot.slane %v2969_v32, %v2948_v62  ;;  %v1210_v35 = vrot.slane %v1182_v2, %v2948_v62 }
 0x41f   : > { %v1304_v27 = vmul.f32 %v1254_v22, %v2962_v17  ;;  %v1307_v8 = vmul.f32 %v1266_v61, %v2962_v17 }
 0x420   : > { %v1419_v39 = vrot.slane %v1403_v34, %v2948_v62  ;;  %v1411_v40 = vcombine.high %v1403_v34, %v1403_v34  ;;  %v1214_v61 = vcombine.high %v1210_v35, %v1210_v35 }
 0x421   : > { %v1329_v29 = vmul.f32 1.442695, %v1304_v27  ;;  %v1335_v19 = vmul.f32 1.442695, %v1307_v8 }
 0x422   : > { %1731 = vbcast.lane.b32.xlu0 %v1568_v33, 328  ;;  %1475 = vbcast.lane.b32.xlu1 %v1472_v47, 320  ;;  %v1258_v33 = vrot.slane %v1211_v26, %v2878_v31  ;;  %v1433_v50 = vrot.slane %v1411_v40, %v2948_v62  ;;  %v1441_v3 = vcombine.high %v1419_v39, %v1419_v39 }
 0x424   : > { %v1305_v37 = vmul.f32 %v1258_v33, %v2962_v17  ;;  %v1612_v58 = vrot.slane %v1433_v50, %v2878_v31  ;;  %v1616_v24 = vrot.slane %v1441_v3, %v2878_v31  ;;  %v1443_v21 = vcombine.high %v1433_v50, %v1433_v50 }
 0x426   : > { %1939 = vrot.lane.b32.xlu0 %v1934_v49, %s2628_s21  ;;  %1483 = vbcast.lane.b32.xlu1 %v1480_v38, 320  ;;  %v1213_v38 = vcombine.high %v1203_v18, %v1203_v18  ;;  %v1331_v45 = vmul.f32 1.442695, %v1305_v37  ;;  %v1608_v49 = vrot.slane %v1419_v39, %v2878_v31  ;;  %v1620_v37 = vrot.slane %v1443_v21, %v2878_v31 }
 0x42a   : > { %1491 = vbcast.lane.b32.xlu1 %v1488_v41, 320  ;;  %v2579_v41 = vpop.eup %2578 }
 0x42b   : > { %v1110_v48 = vmul.f32 0.6931472, %v2579_v41 }
 0x42d   : > { %v2987_v56 = vadd.f32 %v1110_v48, %v1097_v51 }
 0x42e   : > { %1671 = vbcast.lane.b32.xlu1 %v1448_v43, 328  ;;  %v2976_v43 = vpop.trf.xlu1 }
 0x42f   : > { %v1124_v4 = vrot.slane %v2987_v56, %v2948_v62  ;;  %v1343_v44 = vmul.f32 %v2987_v56, %v2904_v9  ;;  %v1117_v50 = vcombine.high %v2987_v56, %v2987_v56 }
 0x431   : > { %v1140_v12 = vrot.slane %v1124_v4, %v2948_v62  ;;  %v1132_v18 = vcombine.high %v1124_v4, %v1124_v4 }
 0x432   : > { %1679 = vbcast.lane.b32.xlu1 %v1464_v46, 328  ;;  %v1262_v46 = vrot.slane %v1213_v38, %v2878_v31 }
 0x433   : > { %v1218_v22 = vrot.slane %v1140_v12, %v2878_v31  ;;  %v1154_v36 = vrot.slane %v1132_v18, %v2948_v62 }
 0x434   : > { %v1306_v55 = vmul.f32 %v1262_v46, %v2962_v17 }
 0x435   : > { %v1295_v39 = vmul.f32 %v1218_v22, %v2962_v17 }
 0x436   : > { %1683 = vbcast.lane.b32.xlu1 %v1472_v47, 328  ;;  %v1333_v1 = vmul.f32 1.442695, %v1306_v55 }
 0x437   : > { %v1311_v51 = vmul.f32 1.442695, %v1295_v39 }
 0x43a   : > { %1727 = vbcast.lane.b32.xlu1 %v1560_v23, 328  ;;  %v1327_v23 = vmul.f32 1.442695, %v1303_v20  ;;  %v1270_v20 = vrot.slane %v1210_v35, %v2878_v31 }
 0x43c   : > { %2580 = vpow2.f32 %v1327_v23  ;;  %v1396_v23 = vcombine.high %v2969_v32, %v2969_v32  ;;  %v1308_v34 = vmul.f32 %v1270_v20, %v2962_v17  ;;  %v1162_v32 = vcombine.high %v1140_v12, %v1140_v12 }
 0x43d   : > { %2582 = vpow2.f32 %v1329_v29  ;;  %v1212_v29 = vcombine.high %v1196_v25, %v1196_v25  ;;  %v1347_v20 = vcombine.high %v1343_v44, %v1343_v44 }
 0x43e   : > { %1937 = vrot.lane.b32.xlu1 %v1933_v59, %s2628_s21  ;;  %2584 = vpow2.f32 %v1331_v45  ;;  %v1410_v40 = vrot.slane %v1396_v23, %v2948_v62  ;;  %v1337_v48 = vmul.f32 1.442695, %v1308_v34 }
 0x43f   : > { %2586 = vpow2.f32 %v1333_v1 }
 0x440   : > { %2588 = vpow2.f32 %v1335_v19  ;;  %v1412_v25 = vcombine.high %v1410_v40, %v1410_v40 }
 0x441   : > { %2590 = vpow2.f32 %v1337_v48 }
 0x442   : > { %2592 = vpow2.f32 %v1311_v51  ;;  %v3050_v3 = vrot.slane %v1412_v25, %v2948_v62 }
 0x444   : > { %v1628_v21 = vrot.slane %v3050_v3, %v2878_v31 }
 0x446   : > { %v2581_v47 = vpop.eup %2580 }
 0x447   : > { %v1734_v30 = vmul.f32 %v2581_v47, %v781_v42  ;;  %v2583_v59 = vpop.eup %2582  ;;  %v1274_v47 = vrot.slane %v1212_v29, %v2878_v31 }
 0x448   : > { %v2585_v11 = vpop.eup %2584 }
 0x449   : > { %v2587_v38 = vpop.eup %2586 }
 0x44a   : > { %v2589_v1 = vpop.eup %2588 }
 0x464   : > { %v2983_v52 = vpop.permute.xlu0 %1547  ;;  %v1516_v28 = vpop.permute.xlu1 %1515 }
 0x465   : > { %v1661_v54 = vmul.f32 %v1608_v49, %v1516_v28  ;;  %v1222_v49 = vrot.slane %v1154_v36, %v2878_v31  ;;  %v3034_v28 = vrot.slane %v1410_v40, %v2948_v62 }
 0x467   : > { %v2989_v57 = vadd.f32 %v1734_v30, %v1661_v54  ;;  %v1354_v54 = vrot.slane %v1343_v44, %v2948_v62  ;;  %v1296_v56 = vmul.f32 %v1222_v49, %v2962_v17  ;;  %v1624_v2 = vrot.slane %v3034_v28, %v2878_v31 }
 0x468   : > { %v2992_v60 = vpop.permute.xlu0 %1555  ;;  %v1524_v53 = vpop.permute.xlu1 %1523  ;;  %v1442_v44 = vcombine.high %v3034_v28, %v3034_v28 }
 0x469   : > { %v1754_v63 = vmul.f32 %v2583_v59, %v2989_v57  ;;  %v1662_v0 = vmul.f32 %v1612_v58, %v1524_v53  ;;  %v1226_v59 = vrot.slane %v1162_v32, %v2878_v31  ;;  %v1309_v53 = vmul.f32 %v1274_v47, %v2962_v17 }
 0x46a   : > { %v1313_v12 = vmul.f32 1.442695, %v1296_v56  ;;  %v1444_v47 = vcombine.high %v3050_v3, %v3050_v3  ;;  %v1666_v25 = vmul.f32 %v1628_v21, %v2992_v60 }
 0x46b   : > { %v2998_v5 = vadd.f32 %v1754_v63, %v1662_v0  ;;  %v1164_v63 = vcombine.high %v1154_v36, %v1154_v36  ;;  %v1131_v0 = vrot.slane %v1117_v50, %v2948_v62  ;;  %v1297_v35 = vmul.f32 %v1226_v59, %v2962_v17 }
 0x46c   : > { %v3000_v6 = vpop.permute.xlu0 %1703  ;;  %v1532_v7 = vpop.permute.xlu1 %1531 }
 0x46d   : > { %v1663_v13 = vmul.f32 %v1616_v24, %v1532_v7  ;;  %v1774_v15 = vmul.f32 %v2585_v11, %v2998_v5  ;;  %v1362_v7 = vcombine.high %v1354_v54, %v1354_v54  ;;  %v1339_v11 = vmul.f32 1.442695, %v1309_v53 }
 0x46e   : > { %v1147_v18 = vrot.slane %v1131_v0, %v2948_v62  ;;  %v1133_v19 = vcombine.high %v1131_v0, %v1131_v0  ;;  %v1315_v36 = vmul.f32 1.442695, %v1297_v35 }
 0x46f   : > { %v3013_v26 = vadd.f32 %v1774_v15, %v1663_v13  ;;  %v1278_v13 = vrot.slane %v1214_v61, %v2878_v31  ;;  %v1665_v15 = vmul.f32 %v1624_v2, %v2983_v52  ;;  %v3067_v23 = vrot.slane %v1362_v7, %v2948_v62 }
 0x470   : > { %v3006_v14 = vpop.permute.xlu0 %1711  ;;  %v1540_v16 = vpop.permute.xlu1 %1539  ;;  %v1738_v52 = vmul.f32 %v2989_v57, %v3000_v6  ;;  %2594 = vpow2.f32 %v1339_v11  ;;  %v1234_v40 = vrot.slane %v1147_v18, %v2878_v31  ;;  %v1161_v32 = vrot.slane %v1133_v19, %v2948_v62 }
 0x471   : > { %v1794_v41 = vmul.f32 %v2587_v38, %v3013_v26  ;;  %v1664_v42 = vmul.f32 %v1620_v37, %v1540_v16  ;;  %v1230_v16 = vrot.slane %v1164_v63, %v2878_v31  ;;  %v1310_v38 = vmul.f32 %v1278_v13, %v2962_v17 }
 0x472   : > { %2596 = vpow2.f32 %v1313_v12  ;;  %v3085_v57 = vrot.slane %v1347_v20, %v2948_v62  ;;  %v1580_v6 = vrot.slane %v3067_v23, %v2878_v31  ;;  %v1163_v28 = vcombine.high %v1147_v18, %v1147_v18 }
 0x473   : > { %v3036_v30 = vadd.f32 %v1794_v41, %v1664_v42  ;;  %v1298_v39 = vmul.f32 %v1230_v16, %v2962_v17  ;;  %v2591_v41 = vpop.eup %2590  ;;  %v1778_v42 = vmul.f32 %v3013_v26, %v3006_v14  ;;  %2598 = vpow2.f32 %v1315_v36 }
 0x474   : > { %v3015_v27 = vpop.permute.xlu0 %1459  ;;  %v3017_v33 = vpop.permute.xlu1 %1563  ;;  %v1746_v26 = vsel %vm1007_vm7, %v1738_v52, 0.0  ;;  %v1341_v51 = vmul.f32 1.442695, %v1310_v38  ;;  %v1299_v59 = vmul.f32 %v1234_v40, %v2962_v17  ;;  %v1238_v53 = vrot.slane %v1161_v32, %v2878_v31 }
 0x475   : > { %v1814_v4 = vmul.f32 %v2589_v1, %v3036_v30  ;;  %v2593_v14 = vpop.eup %2592  ;;  %v1786_v56 = vsel %vm1007_vm7, %v1778_v42, 0.0  ;;  %v1632_v61 = vrot.slane %v1442_v44, %v2878_v31  ;;  %v3106_v63 = vrot.slane %v3085_v57, %v2948_v62 }
 0x476   : > { %v1733_v1 = vmul.f32 %v2593_v14, %v2976_v43  ;;  %v1747_v2 = vrot.slane %v1746_v26, 4  ;;  %2600 = vpow2.f32 %v1341_v51  ;;  %v1165_v35 = vcombine.high %v1161_v32, %v1161_v32 }
 0x477   : > { %v3064_v22 = vadd.f32 %v1814_v4, %v1665_v15  ;;  %v1242_v11 = vrot.slane %v1163_v28, %v2878_v31  ;;  %v1787_v12 = vrot.slane %v1786_v56, 4  ;;  %v1319_v13 = vmul.f32 1.442695, %v1299_v59 }
 0x478   : > { %v3027_v45 = vpop.permute.xlu0 %1499  ;;  %v1708_v46 = vpop.permute.xlu1 %1707  ;;  %v1300_v15 = vmul.f32 %v1238_v53, %v2962_v17  ;;  %v1363_v18 = vcombine.high %v3085_v57, %v3085_v57  ;;  %v1748_v52 = vadd.f32 %v1747_v2, %v1746_v26  ;;  %v1393_v38 = vcombine.high %v3106_v63, %v3106_v63 }
 0x479   : > { %v1758_v37 = vmul.f32 %v2998_v5, %v1708_v46  ;;  %v1370_v5 = vrot.slane %v1354_v54, %v2948_v62  ;;  %v1834_v46 = vmul.f32 %v2591_v41, %v3064_v22  ;;  %v1317_v54 = vmul.f32 1.442695, %v1298_v39 }
 0x47a   : > { %v2595_v16 = vpop.eup %2594  ;;  %v1654_v32 = vmul.f32 %v1580_v6, %v3015_v27  ;;  %v1246_v42 = vrot.slane %v1165_v35, %v2878_v31  ;;  %v1788_v44 = vadd.f32 %v1787_v12, %v1786_v56  ;;  %v1667_v57 = vmul.f32 %v1632_v61, %v3017_v33 }
 0x47b   : > { %v1766_v49 = vsel %vm1007_vm7, %v1758_v37, 0.0  ;;  %v1576_v0 = vrot.slane %v1370_v5, %v2878_v31  ;;  %v1836_v3 = vadd.f32 %v1834_v46, %v1666_v25  ;;  %2602 = vpow2.f32 %v1317_v54 }
 0x47c   : > { %v3039_v55 = vpop.permute.xlu0 %1675  ;;  %v3041_v58 = vpop.permute.xlu1 %1571  ;;  %v1767_v60 = vrot.slane %v1766_v49, 4  ;;  %v1392_v21 = vcombine.high %v1370_v5, %v1370_v5  ;;  %2604 = vpow2.f32 %v1319_v13  ;;  %v1321_v5 = vmul.f32 1.442695, %v1300_v15 }
 0x47d   : > { %v2597_v36 = vpop.eup %2596  ;;  %v1854_v37 = vmul.f32 %v2595_v16, %v1836_v3  ;;  %v1394_v27 = vcombine.high %v3067_v23, %v3067_v23  ;;  %v1749_v6 = vrot.slane %v1748_v52, 2  ;;  %v1636_v28 = vrot.slane %v1444_v47, %v2878_v31 }
 0x47e   : > { %v1768_v39 = vadd.f32 %v1767_v60, %v1766_v49  ;;  %v1584_v14 = vrot.slane %v1392_v21, %v2878_v31  ;;  %v1391_v54 = vrot.slane %v1363_v18, %v2948_v62  ;;  %v1302_v56 = vmul.f32 %v1246_v42, %v2962_v17 }
 0x47f   : > { %v3131_v49 = vadd.f32 %v1854_v37, %v1667_v57  ;;  %v1789_v61 = vrot.slane %v1788_v44, 2  ;;  %2606 = vpow2.f32 %v1321_v5  ;;  %v1600_v2 = vrot.slane %v1393_v38, %v2878_v31 }
 0x480   : > { %v3053_v8 = vpop.permute.xlu0 %1507  ;;  %v3055_v24 = vpop.permute.xlu1 %1715  ;;  %v1769_v51 = vrot.slane %v1768_v39, 2  ;;  %v1588_v62 = vrot.slane %v1394_v27, %v2878_v31  ;;  %v1325_v18 = vmul.f32 1.442695, %v1302_v56  ;;  %v1395_v21 = vcombine.high %v1391_v54, %v1391_v54 }
 0x481   : > { %v1798_v43 = vmul.f32 %v3036_v30, %v3055_v24  ;;  %v1301_v30 = vmul.f32 %v1242_v11, %v2962_v17  ;;  %v2599_v24 = vpop.eup %2598 }
 0x482   : > { %v2601_v23 = vpop.eup %2600  ;;  %v1770_v35 = vadd.f32 %v1769_v51, %v1768_v39  ;;  %v1604_v5 = vrot.slane %v1395_v21, %v2878_v31 }
 0x483   : > { %v1806_v46 = vsel %vm1007_vm7, %v1798_v43, 0.0  ;;  %v1874_v17 = vmul.f32 %v2601_v23, %v3131_v49  ;;  %v1790_v43 = vadd.f32 %v1789_v61, %v1788_v44 }
 0x484   : > { %v3069_v29 = vpop.permute.xlu0 %1687  ;;  %v3071_v34 = vpop.permute.xlu1 %1719 }
 0x485   : > { %v1818_v60 = vmul.f32 %v3064_v22, %v3071_v34  ;;  %v1668_v22 = vmul.f32 %v1636_v28, %v3041_v58 }
 0x488   : > { %v3093_v48 = vpop.permute.xlu1 %1723  ;;  %v3097_v50 = vpop.permute.xlu0 %1691 }
 0x489   : > { %v1838_v13 = vmul.f32 %v1836_v3, %v3093_v48  ;;  %v1771_v3 = vrot.slane %v1770_v35, 1 }
 0x48b   : > { %v1846_v58 = vsel %vm1007_vm7, %v1838_v13, 0.0  ;;  %v1772_v51 = vadd.f32 %v1771_v3, %v1770_v35 }
 0x48c   : > { %v1452_v4 = vpop.permute.xlu1 %1451  ;;  %v3116_v19 = vpop.permute.xlu0 %1695  ;;  %v1847_v28 = vrot.slane %v1846_v58, 4 }
 0x48d   : > { %v1653_v7 = vmul.f32 %v1576_v0, %v1452_v4  ;;  %v1807_v0 = vrot.slane %v1806_v46, 4  ;;  %v2603_v4 = vpop.eup %2602 }
 0x48e   : > { %v2605_v38 = vpop.eup %2604 }
 0x48f   : > { %v3118_v20 = vadd.f32 %v1733_v1, %v1653_v7  ;;  %v1323_v1 = vmul.f32 1.442695, %v1301_v30  ;;  %v1750_v7 = vadd.f32 %v1749_v6, %v1748_v52  ;;  %v1808_v34 = vadd.f32 %v1807_v0, %v1806_v46 }
 0x490   : > { %v1468_v40 = vpop.permute.xlu1 %1467  ;;  %v3135_v33 = vpop.permute.xlu0 %1699  ;;  %v1791_v30 = vrot.slane %v1790_v43, 1  ;;  %v1659_v6 = vmul.f32 %v1600_v2, %v3027_v45 }
 0x491   : > { %v1753_v41 = vmul.f32 %v2597_v36, %v3118_v20  ;;  %v1655_v53 = vmul.f32 %v1584_v14, %v1468_v40  ;;  %2608 = vpow2.f32 %v1323_v1  ;;  %v1826_v36 = vsel %vm1007_vm7, %v1818_v60, 0.0 }
 0x492   : > { %v1751_v48 = vrot.slane %v1750_v7, 1  ;;  %v1876_v40 = vadd.f32 %v1874_v17, %v1668_v22  ;;  %2610 = vpow2.f32 %v1325_v18  ;;  %v1827_v44 = vrot.slane %v1826_v36, 4 }
 0x493   : > { %v1755_v26 = vadd.f32 %v1753_v41, %v1654_v32  ;;  %v1596_v14 = vrot.slane %v1391_v54, %v2878_v31  ;;  %v3162_v0 = vadd.f32 %v1791_v30, %v1790_v43 }
 0x494   : > { %v1476_v25 = vpop.permute.xlu1 %1475  ;;  %v1732_v52 = vpop.permute.xlu0 %1731  ;;  %v1752_v27 = vadd.f32 %v1751_v48, %v1750_v7  ;;  %v1828_v23 = vadd.f32 %v1827_v44, %v1826_v36 }
 0x495   : > { %v1773_v59 = vmul.f32 %v2599_v24, %v1755_v26  ;;  %v1757_v11 = vmul.f32 %v1755_v26, %v3039_v55  ;;  %v1656_v16 = vmul.f32 %v1588_v62, %v1476_v25  ;;  %v1592_v55 = vrot.slane %v3106_v63, %v2878_v31  ;;  %v2607_v26 = vpop.eup %2606 }
 0x496   : > { %v1809_v24 = vrot.slane %v1808_v34, 2  ;;  %v1878_v57 = vmul.f32 %v1876_v40, %v1732_v52 }
 0x497   : > { %v3141_v47 = vadd.f32 %v1773_v59, %v1655_v53  ;;  %v1759_v39 = vsel %vm1007_vm7, %v1757_v11, 0.0  ;;  %v1848_v11 = vadd.f32 %v1847_v28, %v1846_v58 }
 0x498   : > { %v1484_v12 = vpop.permute.xlu1 %1483  ;;  %v1760_v63 = vrot.slane %v1759_v39, 4  ;;  %v3164_v1 = vadd.f32 %v1809_v24, %v1808_v34  ;;  %v1886_v31 = vsel %vm1007_vm7, %v1878_v57, 0.0 }
 0x499   : > { %v1793_v15 = vmul.f32 %v2603_v4, %v3141_v47  ;;  %v1657_v42 = vmul.f32 %v1592_v55, %v1484_v12  ;;  %v1660_v4 = vmul.f32 %v1604_v5, %v3053_v8  ;;  %v1887_v18 = vrot.slane %v1886_v31, 4 }
 0x49a   : > { %v1761_v54 = vadd.f32 %v1760_v63, %v1759_v39  ;;  %v1849_v3 = vrot.slane %v1848_v11, 2 }
 0x49b   : > { %v3150_v37 = vadd.f32 %v1793_v15, %v1656_v16  ;;  %v2609_v62 = vpop.eup %2608  ;;  %v1811_v15 = vrot.slane %v3164_v1, 1  ;;  %v1829_v16 = vrot.slane %v1828_v23, 2 }
 0x49c   : > { %v1492_v32 = vpop.permute.xlu1 %1491  ;;  %v2611_v22 = vpop.eup %2610  ;;  %v1762_v34 = vrot.slane %v1761_v54, 2 }
 0x49d   : > { %v1813_v41 = vmul.f32 %v2605_v38, %v3150_v37  ;;  %v1658_v56 = vmul.f32 %v1596_v14, %v1492_v32  ;;  %v1888_v32 = vadd.f32 %v1887_v18, %v1886_v31  ;;  %v1830_v30 = vadd.f32 %v1829_v16, %v1828_v23 }
 0x49e   : > { %v1763_v5 = vadd.f32 %v1762_v34, %v1761_v54  ;;  %v1812_v16 = vadd.f32 %v1811_v15, %v3164_v1 }
 0x49f   : > { %v1815_v46 = vadd.f32 %v1813_v41, %v1657_v42  ;;  %v1889_v28 = vrot.slane %v1888_v32, 2 }
 0x4a0   : > { %v1672_v25 = vpop.permute.xlu1 %1671  ;;  %v1764_v31 = vrot.slane %v1763_v5, 1 }
 0x4a1   : > { %v1817_v59 = vmul.f32 %v1815_v46, %v3069_v29  ;;  %v1833_v53 = vmul.f32 %v2607_v26, %v1815_v46  ;;  %v1737_v61 = vmul.f32 %v3118_v20, %v1672_v25  ;;  %v3170_v29 = vsel %vm952_vm4, %v1752_v27, %v1772_v51 }
 0x4a2   : > { %v1850_v51 = vadd.f32 %v1849_v3, %v1848_v11  ;;  %v1890_v11 = vadd.f32 %v1889_v28, %v1888_v32  ;;  %v1765_v34 = vadd.f32 %v1764_v31, %v1763_v5  ;;  %v1896_v1 = vsel %vm967_vm5, %v3170_v29, %v3162_v0  ;;  %v2612_v31 = vld [vmem:[#allocation2 + $0x8] sm:$0xff] }
 0x4a3   : > { %v1819_v60 = vsel %vm1007_vm7, %v1817_v59, 0.0  ;;  %v1835_v45 = vadd.f32 %v1833_v53, %v1658_v56  ;;  %v1739_v2 = vsel %vm1007_vm7, %v1737_v61, 0.0 }
 0x4a4   : > { %v1820_v20 = vrot.slane %v1819_v60, 4  ;;  %v1740_v7 = vrot.slane %v1739_v2, 4  ;;  %v1680_v35 = vpop.permute.xlu1 %1679 }
 0x4a5   : > { %v1837_v17 = vmul.f32 %v1835_v45, %v3097_v50  ;;  %v1853_v12 = vmul.f32 %v2609_v62, %v1835_v45  ;;  %v1777_v13 = vmul.f32 %v3141_v47, %v1680_v35 }
 0x4a6   : > { %v1741_v43 = vadd.f32 %v1740_v7, %v1739_v2  ;;  %v1821_v52 = vadd.f32 %v1820_v20, %v1819_v60  ;;  %v1851_v20 = vrot.slane %v1850_v51, 1 }
 0x4a7   : > { %v1839_v21 = vsel %vm1007_vm7, %v1837_v17, 0.0  ;;  %v1855_v36 = vadd.f32 %v1853_v12, %v1659_v6  ;;  %v1779_v8 = vsel %vm1007_vm7, %v1777_v13, 0.0 }
 0x4a8   : > { %v1840_v55 = vrot.slane %v1839_v21, 4  ;;  %v1742_v38 = vrot.slane %v1741_v43, 2  ;;  %v1780_v48 = vrot.slane %v1779_v8, 4  ;;  %v1684_v50 = vpop.permute.xlu1 %1683  ;;  %v1822_v63 = vrot.slane %v1821_v52, 2 }
 0x4a9   : > { %v1857_v47 = vmul.f32 %v1855_v36, %v3116_v19  ;;  %v1873_v39 = vmul.f32 %v2611_v22, %v1855_v36  ;;  %v1797_v40 = vmul.f32 %v3150_v37, %v1684_v50  ;;  %v1891_v50 = vrot.slane %v1890_v11, 1 }
 0x4aa   : > { %v1841_v58 = vadd.f32 %v1840_v55, %v1839_v21  ;;  %v1743_v41 = vadd.f32 %v1742_v38, %v1741_v43  ;;  %v1781_v42 = vadd.f32 %v1780_v48, %v1779_v8  ;;  %v1823_v54 = vadd.f32 %v1822_v63, %v1821_v52 }
 0x4ab   : > { %v1859_v24 = vsel %vm1007_vm7, %v1857_v47, 0.0  ;;  %v1875_v44 = vadd.f32 %v1873_v39, %v1660_v4  ;;  %v1799_v57 = vsel %vm1007_vm7, %v1797_v40, 0.0  ;;  %v1831_v4 = vrot.slane %v1830_v30, 1 }
 0x4ac   : > { %v1842_v46 = vrot.slane %v1841_v58, 2  ;;  %v1860_v14 = vrot.slane %v1859_v24, 4  ;;  %v1728_v26 = vpop.permute.xlu1 %1727  ;;  %v1782_v27 = vrot.slane %v1781_v42, 2  ;;  %v1800_v6 = vrot.slane %v1799_v57, 4 }
 0x4ad   : > { %v1877_v19 = vmul.f32 %v1875_v44, %v3135_v33  ;;  %v1858_v37 = vmul.f32 %v3131_v49, %v1728_v26  ;;  %v1744_v59 = vrot.slane %v1743_v41, 1  ;;  %v1824_v18 = vrot.slane %v1823_v54, 1 }
 0x4ae   : > { %v1861_v25 = vadd.f32 %v1860_v14, %v1859_v24  ;;  %v1783_v53 = vadd.f32 %v1782_v27, %v1781_v42  ;;  %v1801_v56 = vadd.f32 %v1800_v6, %v1799_v57  ;;  %v1843_v33 = vadd.f32 %v1842_v46, %v1841_v58 }
 0x4af   : > { %v1866_v61 = vsel %vm1007_vm7, %v1858_v37, 0.0  ;;  %v1879_v23 = vsel %vm1007_vm7, %v1877_v19, 0.0  ;;  %v1745_v17 = vadd.f32 %v1744_v59, %v1743_v41  ;;  %v1832_v52 = vadd.f32 %v1831_v4, %v1830_v30  ;;  %v2298_v30 = vld [vmem:[%s597_s12] ss:$0 sm:$0xff]  ;;  %v1940_v59 = vpop.permute.xlu0 %1939  ;;  %v2060_v4 = vld [vmem:[%s3272_s19 + $0x8] sm:$0xff] (!%p2303_p5) }
 0x4b0   : > { %v1862_v60 = vrot.slane %v1861_v25, 2  ;;  %v1867_v45 = vrot.slane %v1866_v61, 4  ;;  %v1784_v2 = vrot.slane %v1783_v53, 1  ;;  %v1802_v62 = vrot.slane %v1801_v56, 2 }
 0x4b1   : > { %v1880_v49 = vrot.slane %v1879_v23, 4  ;;  %v1844_v21 = vrot.slane %v1843_v33, 1  ;;  %v1852_v55 = vadd.f32 %v1851_v20, %v1850_v51  ;;  %v1893_v3 = vsel %vm952_vm4, %v1745_v17, %v1765_v34  ;;  %v2304_v34 = vld [vmem:[%s3273_s4] ss:$0 sm:$0xff] (!%p2303_p5) }
 0x4b2   : > { %v1868_v7 = vadd.f32 %v1867_v45, %v1866_v61  ;;  %v1863_v35 = vadd.f32 %v1862_v60, %v1861_v25  ;;  %v1803_v12 = vadd.f32 %v1802_v62, %v1801_v56  ;;  %v1785_v43 = vadd.f32 %v1784_v2, %v1783_v53  ;;  %v1938_v53 = vpop.permute.xlu1 %1937  ;;  %v2613_v60 = vld [vmem:[#allocation2] sm:$0xff] }
 0x4b3   : > { %v1881_v13 = vadd.f32 %v1880_v49, %v1879_v23  ;;  %v1825_v15 = vadd.f32 %v1824_v18, %v1823_v54  ;;  %v1898_v58 = vsel %vm982_vm6, %v1896_v1, %v1812_v16  ;;  %v1845_v41 = vadd.f32 %v1844_v21, %v1843_v33  ;;  %v2059_v49 = vld [vmem:[%s3272_s19] sm:$0xff] (!%p2303_p5) }
 0x4b4   : > { %v1869_v22 = vrot.slane %v1868_v7, 2  ;;  %v1804_v36 = vrot.slane %v1803_v12, 1  ;;  %v1864_v48 = vrot.slane %v1863_v35, 1  ;;  %v1895_v40 = vsel %vm967_vm5, %v1893_v3, %v1785_v43 }
 0x4b5   : > { %v1882_v8 = vrot.slane %v1881_v13, 2  ;;  %v1901_v44 = vsel %vm1899_vm8, %v1898_v58, %v1832_v52  ;;  %v1892_v29 = vadd.f32 %v1891_v50, %v1890_v11  ;;  %v1917_v27 = vmul.f32 %v2298_v30, %v2904_v9 }
 0x4b6   : > { %v1870_v38 = vadd.f32 %v1869_v22, %v1868_v7  ;;  %v1805_v47 = vadd.f32 %v1804_v36, %v1803_v12  ;;  %v1865_v5 = vadd.f32 %v1864_v48, %v1863_v35  ;;  %v1904_v14 = vsel %vm1902_vm9, %v1901_v44, %v1852_v55  ;;  %v2061_v7 = vld [vmem:[%s3272_s19 + $0x10] sm:$0xff] (!%p2303_p5)  ;;  %v2062_v35 = vld [vmem:[%s3272_s19 + $0x18] sm:$0xff] (!%p2303_p5) }
 0x4b7   : > { %v1883_v39 = vadd.f32 %v1882_v8, %v1881_v13  ;;  %v1918_v6 = vmul.f32 %v2298_v30, %v2906_v10  ;;  %v2530_v20 = vpack.c.bf16 (!%p2303_p5), %v2060_v4, %v2059_v49  ;;  %v2534_v11 = vpack.c.bf16 (!%p2303_p5), %v2062_v35, %v2061_v7 }
 0x4b8   : > { %v1871_v32 = vrot.slane %v1870_v38, 1  ;;  %v1897_v42 = vsel %vm982_vm6, %v1895_v40, %v1805_v47 }
 0x4b9   : > { %v1884_v24 = vrot.slane %v1883_v39, 1  ;;  %v1900_v0 = vsel %vm1899_vm8, %v1897_v42, %v1825_v15  ;;  %2531 = vmatprep.subr.bf16.mxu0 (!%p2303_p5), %v2530_v20 }
 0x4ba   : > { %v1872_v57 = vadd.f32 %v1871_v32, %v1870_v38  ;;  %v1903_v46 = vsel %vm1902_vm9, %v1900_v0, %v1845_v41 }
 0x4bb   : > { %v1885_v63 = vadd.f32 %v1884_v24, %v1883_v39  ;;  %v1906_v26 = vsel %vm1905_vm10, %v1903_v46, %v1865_v5 }
 0x4bc   : > { %v1907_v19 = vsel %vm1905_vm10, %v1904_v14, %v1872_v57 }
 0x4bd   : > { %v1909_v37 = vsel %vm1908_vm11, %v1906_v26, %v1885_v63  ;;  %v1910_v51 = vsel %vm1908_vm11, %v1907_v19, %v1892_v29 }
 0x4be   : > { %v1919_v28 = vadd.f32 %v1917_v27, %v1909_v37  ;;  %v1920_v25 = vadd.f32 %v1918_v6, %v1910_v51 }
 0x4c0   : > { %v1944_v56 = vmul.f32 %v1940_v59, %v1920_v25  ;;  %v1943_v61 = vmul.f32 %v1938_v53, %v1919_v28 }
 0x4c2   : > { %2444 = vmatprep.mubr.msk.f32.mxu0 %vm1007_vm7, %v1943_v61 }
 0x4c3   : > { %2445 = vmatmul.mubr.msk.f32.vlgmr.msra.gmra.mrb[2].mxu0 %vm1007_vm7, %v1944_v56 }
 0x4c4   : > { %2533 = vmatpush3.bf16.msra.mxu0 (!%p2303_p5), %v2530_v20 }
 0x4c5   : > { %2535 = vmatprep.subr.bf16.mxu0 (!%p2303_p5), %v2534_v11 }
 0x4c8   : > { %2537 = vmatpush3.bf16.msra.mxu0 (!%p2303_p5), %v2534_v11 }
 0x594   : > { %2033 = sbr.rel (%p2303_p5) target bundleno = 1816 (0x718), region = 84 }
 0x596   : > { %v2446_v23 = vpop.f32.mrb[2].mxu0 }
 0x597   : > { %v2027_v54 = vadd.f32 %v2612_v31, %v2446_v23  ;;  %v2017_v9 = vpop.f32.mrb[3].mxu0 }
 0x598   : > { %v2026_v10 = vadd.f32 %v2613_v60, %v2017_v9 }
 0x599   : > { %2029 = vst.msk [vmem:[#allocation2 + $0x8] sm:$0xff] %vm827_vm3, %v2027_v54  ;;  %v2035_v33 = vmul.f32 (!%p2303_p5), %v2027_v54, %v2027_v54 }
 0x59a   : > { %2028 = vst.msk [vmem:[#allocation2] sm:$0xff] %vm827_vm3, %v2026_v10  ;;  %v2034_v45 = vmul.f32 (!%p2303_p5), %v2026_v10, %v2026_v10 }
 0x59b   : > { %v2039_v62 = vsel %vm827_vm3, %v2035_v33, 0.0 }
 0x59c   : > { %v2036_v2 = vsel %vm827_vm3, %v2034_v45, 0.0 }
 0x59d   : > { %2037 = vadd.xlane.f32.xlu0 %v2036_v2 }
 0x5a1   : > { %2040 = vadd.xlane.f32.xlu0 %v2039_v62 }
 0x62a   : > { %v2038_v17 = vpop.xlane.xlu0 %2037 }
 0x62b   : > { %v2042_v12 = vmul.f32 0.03125, %v2038_v17 }
 0x62d   : > { %v2044_v13 = vadd.f32 1e-05, %v2042_v12 }
 0x62e   : > { %v2041_v16 = vpop.xlane.xlu0 %2040 }
 0x62f   : > { %2614 = vrsqrt.f32 %v2044_v13  ;;  %v2043_v18 = vmul.f32 0.03125, %v2041_v16 }
 0x631   : > { %v2045_v43 = vadd.f32 1e-05, %v2043_v18 }
 0x633   : > { %2616 = vrsqrt.f32 %v2045_v43 }
 0x639   : > { %v2615_v22 = vpop.eup %2614 }
 0x63a   : > { %v2048_v21 = vmul.f32 %v2615_v22, %v2026_v10 }
 0x63c   : > { %v2057_v36 = vmul.f32 %v2304_v34, %v2048_v21 }
 0x63d   : > { %v2617_v8 = vpop.eup %2616 }
 0x63e   : > { %v2049_v52 = vmul.f32 %v2617_v8, %v2027_v54  ;;  %2455 = vmatprep.mubr.msk.f32.mxu0 %vm827_vm3, %v2057_v36 }
 0x640   : > { %v2058_v55 = vmul.f32 %v2304_v34, %v2049_v52 }
 0x642   : > { %2456 = vmatmul.mubr.msk.f32.vlgmr.msra.gmra.mrb[0].mxu0 %vm827_vm3, %v2058_v55 }
 0x715   : > { %v2457_v38 = vpop.f32.mrb[0].mxu0 }
 0x716   : > { %2145 = vst [vmem:[%s3274_s22 + $0x8] sm:$0xff] %v2457_v38  ;;  %v2135_v48 = vpop.f32.mrb[1].mxu0 }
 0x717   : > { %2144 = vst [vmem:[%s3274_s22] sm:$0xff] %v2135_v48 }
 0x718 PF: > { %s3275_s18 = sld [smem:[#allocation3_spill]] }
 0x71e   : > { %s24_s29 = sadd.s32 1, %s3275_s18  }
 0x71f   : > { %p21_p6 = scmp.ge.s32.totalorder %s24_s29, 4  }
 0x721   :  { %23 = sbr.rel (!%p21_p6) target bundleno = 6 (0x6), region = 137 }

// kernel: mamba_vae_forward.2
= control target key start
LH: loop header
LB: loop body
LE: loop exit
PB: predicated region body
PF: predicated region fallthrough
CT: control target
= control target key end

     0   :  { %s2472_s17 = smov 0   ;;  %s2944_s0 = inlined_call_operand.vmem [shape: s32[16,1], index: 0, kind: input, shape index: {}]   ;;  %s2945_s1 = inlined_call_operand.vmem [shape: f32[128,32], index: 1, kind: input, shape index: {}]   ;;  %s2946_s2 = inlined_call_operand.vmem [shape: f32[2,1,32], index: 2, kind: input, shape index: {}]   ;;  %s2947_s3 = inlined_call_operand.vmem [shape: f32[2,32,128], index: 3, kind: input, shape index: {}]   ;;  %s2948_s4 = inlined_call_operand.vmem [shape: f32[2,4,64], index: 4, kind: input, shape index: {}]   ;;  %s2949_s5 = inlined_call_operand.vmem [shape: f32[2,1,64], index: 5, kind: input, shape index: {}]   ;;  %s2950_s6 = inlined_call_operand.vmem [shape: f32[2,64,128], index: 6, kind: input, shape index: {}]   ;;  %s2951_s7 = inlined_call_operand.vmem [shape: f32[2,1,64], index: 7, kind: input, shape index: {}]   ;;  %s2952_s8 = inlined_call_operand.vmem [shape: f32[2,8,64], index: 8, kind: input, shape index: {}]   ;;  %s2953_s9 = inlined_call_operand.vmem [shape: f32[2,1,64], index: 9, kind: input, shape index: {}]   ;;  %s2954_s10 = inlined_call_operand.vmem [shape: f32[2,64,32], index: 10, kind: input, shape index: {}]   ;;  %s2955_s11 = inlined_call_operand.vmem [shape: f32[2,2,64,8], index: 11, kind: output, shape index: {}]  }
   0x1   :  { %2957 = sst [smem:[#allocation4_spill]] %s2947_s3 }
   0x2 LB: > { %2958 = sst [smem:[#allocation3_spill]] %s2406_s17  ;;  %s2084_s18 = sadd.s32 4294967295, %s2406_s17   ;;  %s2406_s17 = sphi %s2472_s17, %s21_s17  }
   0x3   : > { %p2088_p0 = scmp.ge.s32.totalorder %s2406_s17, 1  ;;  %p407_p1 = scmp.lt.s32.totalorder %s2406_s17, 3 }
   0x5   : > { %p408_p2 = pnand %p2088_p0, %p407_p1 }
   0x6   : > { %p477_p3 = scmp.lt.s32.totalorder (!%p408_p2), %s2084_s18, 1  ;;  %s2959_s3 = sld [smem:[#allocation4_spill]] (!%p408_p2) }
   0x7   : > { %411 = sbr.rel (%p408_p2) target bundleno = 1430 (0x596), region = 64  ;;  %p2099_p4 = scmp.ne.s32.totalorder (!%p408_p2), %s2084_s18, 0 }
   0xe   : > { %s2480_s19 = scalar_select %p477_p3, %s2084_s18, 1 }
   0xf   : > { %v523_v0 = vld [vmem:[%s2944_s0] sm:$0xff] (!%p2099_p4)  ;;  %v2408_v2 = vmov (!%p2099_p4), 0   ;;  %v538_v3 = vld [vmem:[%s2945_s1 + $0x8] sm:$0xff] (!%p2099_p4)  ;;  %v539_v4 = vld [vmem:[%s2945_s1 + $0x10] sm:$0xff] (!%p2099_p4)  ;;  %v521_v27 = vlaneseq (!%p2099_p4)  ;;  %v2409_v30 = vmov (!%p2099_p4), 1.0   ;;  %vm628_vm2 = vcmask (!%p2099_p4), 261120  }
  0x10   : > { %s2120_s23 = sshll.u32 %s2480_s19, 5  ;;  %s2091_s27 = sshll.u32 %s2480_s19, 2  ;;  %v537_v1 = vld [vmem:[%s2945_s1] sm:$0xff] (!%p2099_p4)  ;;  %2337 = vset.pattern.permute.xlu0 (!%p2099_p4), %v2408_v2  ;;  %v540_v5 = vld [vmem:[%s2945_s1 + $0x18] sm:$0xff] (!%p2099_p4)  ;;  %v524_v8 = vld [vmem:[%s2944_s0 + $0x8] sm:$0xff] (!%p2099_p4) }
  0x11   : > { %s2490_s26 = scalar_lea.vmem %s2959_s3, %s2120_s23  ;;  %s2496_s30 = scalar_lea.vmem %s2948_s4, %s2091_s27  ;;  %526 = vperm.xlu0 (!%p2099_p4), %2337, %v523_v0   ;;  %v2252_v6 = vpack.c.bf16 (!%p2099_p4), %v538_v3, %v537_v1  ;;  %v2256_v7 = vpack.c.bf16 (!%p2099_p4), %v540_v5, %v539_v4  ;;  %v541_v9 = vld [vmem:[%s2945_s1 + $0x20] sm:$0xff] (!%p2099_p4)  ;;  %v542_v10 = vld [vmem:[%s2945_s1 + $0x28] sm:$0xff] (!%p2099_p4)  ;;  %v543_v12 = vld [vmem:[%s2945_s1 + $0x30] sm:$0xff] (!%p2099_p4)  ;;  %v522_v28 = vand.u32 (!%p2099_p4), 127, %v521_v27 }
  0x12   : > { %s2121_s15 = sshll.u32 %s2480_s19, 6  ;;  %s2094_s24 = sshll.u32 %s2480_s19, 3  ;;  %v2260_v11 = vpack.c.bf16 (!%p2099_p4), %v542_v10, %v541_v9  ;;  %v544_v13 = vld [vmem:[%s2945_s1 + $0x38] sm:$0xff] (!%p2099_p4)  ;;  %v545_v15 = vld [vmem:[%s2945_s1 + $0x40] sm:$0xff] (!%p2099_p4)  ;;  %v546_v16 = vld [vmem:[%s2945_s1 + $0x48] sm:$0xff] (!%p2099_p4) }
  0x13   : > { %s2510_s23 = scalar_lea.vmem %s2950_s6, %s2121_s15  ;;  %s2516_s27 = scalar_lea.vmem %s2952_s8, %s2094_s24  ;;  %2253 = vmatprep.subr.bf16.mxu0 (!%p2099_p4), %v2252_v6  ;;  %v2264_v14 = vpack.c.bf16 (!%p2099_p4), %v544_v13, %v543_v12  ;;  %v2268_v17 = vpack.c.bf16 (!%p2099_p4), %v546_v16, %v545_v15  ;;  %v547_v18 = vld [vmem:[%s2945_s1 + $0x50] sm:$0xff] (!%p2099_p4)  ;;  %v548_v19 = vld [vmem:[%s2945_s1 + $0x58] sm:$0xff] (!%p2099_p4)  ;;  %v549_v21 = vld [vmem:[%s2945_s1 + $0x60] sm:$0xff] (!%p2099_p4) }
  0x14   : > { %s506_s12 = scalar_lea.vmem %s2953_s9, %s2480_s19  ;;  %s2525_s16 = scalar_lea.vmem %s2954_s10, %s2121_s15  ;;  %2255 = vmatpush3.bf16.msra.mxu0 (!%p2099_p4), %v2252_v6  ;;  %v2272_v20 = vpack.c.bf16 (!%p2099_p4), %v548_v19, %v547_v18  ;;  %v550_v22 = vld [vmem:[%s2945_s1 + $0x68] sm:$0xff] (!%p2099_p4)  ;;  %v551_v24 = vld [vmem:[%s2945_s1 + $0x70] sm:$0xff] (!%p2099_p4)  ;;  %v552_v25 = vld [vmem:[%s2945_s1 + $0x78] sm:$0xff] (!%p2099_p4) }
  0x15   : > { %s2123_s20 = sshll.u32 %s2480_s19, 7  ;;  %520 = sbr.rel (%p2099_p4) target bundleno = 364 (0x16c), region = 68  ;;  %529 = vperm.xlu0 (!%p2099_p4), %2337, %v524_v8   ;;  %2257 = vmatprep.subr.bf16.mxu0 (!%p2099_p4), %v2256_v7  ;;  %v2276_v23 = vpack.c.bf16 (!%p2099_p4), %v550_v22, %v549_v21  ;;  %v2280_v26 = vpack.c.bf16 (!%p2099_p4), %v552_v25, %v551_v24 }
  0x16   : > { %s2531_s22 = scalar_lea.vmem %s2955_s11, %s2123_s20 }
  0x18   : > { %2259 = vmatpush3.bf16.msra.mxu0 (!%p2099_p4), %v2256_v7 }
  0x19   : > { %2261 = vmatprep.subr.bf16.mxu0 (!%p2099_p4), %v2260_v11 }
  0x1c   : > { %2263 = vmatpush3.bf16.msra.mxu0 %v2260_v11 }
  0x1d   : > { %2265 = vmatprep.subr.bf16.mxu0 %v2264_v14 }
  0x20   : > { %2267 = vmatpush3.bf16.msra.mxu0 %v2264_v14 }
  0x21   : > { %2269 = vmatprep.subr.bf16.mxu0 %v2268_v17 }
  0x24   : > { %2271 = vmatpush3.bf16.msra.mxu0 %v2268_v17 }
  0x25   : > { %2273 = vmatprep.subr.bf16.mxu0 %v2272_v20 }
  0x28   : > { %2275 = vmatpush3.bf16.msra.mxu0 %v2272_v20 }
  0x29   : > { %2277 = vmatprep.subr.bf16.mxu0 %v2276_v23 }
  0x2c   : > { %2279 = vmatpush3.bf16.msra.mxu0 %v2276_v23 }
  0x2d   : > { %2281 = vmatprep.subr.bf16.mxu0 %v2280_v26 }
  0x30   : > { %2283 = vmatpush3.bf16.msra.mxu0 %v2280_v26 }
  0x90   : > { %v527_v29 = vpop.permute.xlu0 %526 }
  0x91   : > { %vm531_vm0 = vcmp.eq.s32.totalorder %v522_v28, %v527_v29 }
  0x92   : > { %2200 = vmatprep.mubr.msk.f32.mxu0 %vm531_vm0, %v2409_v30 }
  0x94   : > { %v530_v31 = vpop.permute.xlu0 %529 }
  0x95   : > { %vm532_vm1 = vcmp.eq.s32.totalorder %v522_v28, %v530_v31 }
  0x96   : > { %2201 = vmatmul.mubr.msk.f32.vlgmr.msra.gmra.mrb[0].mxu0 %vm532_vm1, %v2409_v30 }
 0x169   : > { %v2202_v32 = vpop.f32.mrb[0].mxu0 }
 0x16a   : > { %630 = vst.msk [vmem:[#allocation2 + $0x8] sm:$0xff] %vm628_vm2, %v2202_v32  ;;  %v619_v33 = vpop.f32.mrb[1].mxu0 }
 0x16b   : > { %629 = vst.msk [vmem:[#allocation2] sm:$0xff] %vm628_vm2, %v619_v33 }
 0x16c PF: > { %vm661_vm3 = vcmask 261120   ;;  %v634_v40 = vld [vmem:[%s2490_s26] sm:$0xff]  ;;  %v635_v41 = vld [vmem:[%s2490_s26 + $0x8] sm:$0xff]  ;;  %v636_v42 = vld [vmem:[%s2490_s26 + $0x10] sm:$0xff]  ;;  %s2960_s24 = scalar_lea.vmem %s2946_s2, %s2480_s19  ;;  %v766_v7 = vlaneseq  ;;  %vm786_vm4 = vcmask 1040384   ;;  %vm801_vm5 = vcmask 1041408   ;;  %s2961_s25 = scalar_lea.vmem %s2949_s5, %s2480_s19 }
 0x16d   : > { %v2284_v43 = vpack.c.bf16 %v635_v41, %v634_v40  ;;  %v637_v44 = vld [vmem:[%s2490_s26 + $0x18] sm:$0xff]  ;;  %v2104_v53 = vld [vmem:[%s2960_s24] ss:$0 sm:$0xff]  ;;  %v641_v60 = vld [vmem:[%s2510_s23 + $0x8] sm:$0xff]  ;;  %vm816_vm6 = vcmask 1042432   ;;  %vm841_vm7 = vcmask 523264   ;;  %s2962_s15 = scalar_lea.vmem %s2951_s7, %s2480_s19 }
 0x16e   : > { %v2288_v45 = vpack.c.bf16 %v637_v44, %v636_v42  ;;  %v640_v59 = vld [vmem:[%s2510_s23] sm:$0xff]  ;;  %v642_v61 = vld [vmem:[%s2510_s23 + $0x10] sm:$0xff]  ;;  %v643_v63 = vld [vmem:[%s2510_s23 + $0x18] sm:$0xff]  ;;  %v2608_v8 = vshrl.u32 %v766_v7, 7  ;;  %s2411_s29 = smov 64   ;;  %vm1733_vm8 = vcmask 1043456  }
 0x16f   : > { %2285 = vmatprep.subr.bf16.mxu0 %v2284_v43  ;;  %v2292_v62 = vpack.c.bf16 %v641_v60, %v640_v59  ;;  %v2296_v0 = vpack.c.bf16 %v643_v63, %v642_v61  ;;  %v644_v1 = vld [vmem:[%s2510_s23 + $0x20] sm:$0xff]  ;;  %v645_v2 = vld [vmem:[%s2510_s23 + $0x28] sm:$0xff]  ;;  %v646_v4 = vld [vmem:[%s2510_s23 + $0x30] sm:$0xff]  ;;  %vm1736_vm9 = vcmask 1044480   ;;  %vm1739_vm10 = vcmask 1045504  }
 0x170   : > { %2287 = vmatpush3.bf16.msra.mxu0 %v2284_v43  ;;  %v2300_v3 = vpack.c.bf16 %v645_v2, %v644_v1  ;;  %v647_v5 = vld [vmem:[%s2510_s23 + $0x38] sm:$0xff]  ;;  %v2611_v9 = vsub.s32 3, %v2608_v8  ;;  %v638_v10 = vld [vmem:[%s2496_s30] sm:$0xf]  ;;  %v2616_v12 = vsub.s32 2, %v2608_v8  ;;  %v2619_v13 = vsub.s32 1, %v2608_v8 }
 0x171   : > { %v632_v35 = vld [vmem:[#allocation2 + $0x8] sm:$0xff]  ;;  %2289 = vmatprep.subr.bf16.mxu0 %v2288_v45  ;;  %2293 = vmatprep.subr.bf16.mxu1 %v2292_v62  ;;  %v2304_v6 = vpack.c.bf16 %v647_v5, %v646_v4  ;;  %v2624_v15 = vsub.s32 0, %v2608_v8  ;;  %v2107_v20 = vld [vmem:[%s2961_s25] ss:$0 sm:$0xff]  ;;  %v1313_v59 = vsub.s32 4, %v2608_v8  ;;  %v1329_v4 = vsub.s32 6, %v2608_v8 }
 0x172   : > { %v631_v34 = vld [vmem:[#allocation2] sm:$0xff]  ;;  %v660_v37 = vmul.f32 %v632_v35, %v632_v35  ;;  %2295 = vmatpush3.bf16.msra.mxu1 %v2292_v62  ;;  %v769_v11 = vrot.slane %v638_v10, %v2611_v9  ;;  %v792_v21 = vrot.slane %v638_v10, %v2616_v12  ;;  %v807_v27 = vrot.slane %v638_v10, %v2619_v13 }
 0x173   : > { %v659_v36 = vmul.f32 %v631_v34, %v631_v34  ;;  %2297 = vmatprep.subr.bf16.mxu1 %v2296_v0  ;;  %v2112_v1 = vld [vmem:[%s2962_s15] ss:$0 sm:$0xff]  ;;  %vm1742_vm11 = vcmask 1046528   ;;  %vm1928_vm12 = vcmask 64512  }
 0x174   : > { %v665_v39 = vsel %vm661_vm3, %v660_v37, 0.0  ;;  %2291 = vmatpush3.bf16.msra.mxu0 %v2288_v45 }
 0x175   : > { %v662_v38 = vsel %vm661_vm3, %v659_v36, 0.0 }
 0x176   : > { %663 = vadd.xlane.f32.xlu0 %v662_v38  ;;  %2299 = vmatpush3.bf16.msra.mxu1 %v2296_v0  ;;  %v1321_v0 = vsub.s32 5, %v2608_v8 }
 0x177   : > { %2301 = vmatprep.subr.bf16.mxu1 %v2300_v3 }
 0x17a   : > { %666 = vadd.xlane.f32.xlu0 %v665_v39  ;;  %2303 = vmatpush3.bf16.msra.mxu1 %v2300_v3 }
 0x17b   : > { %2305 = vmatprep.subr.bf16.mxu1 %v2304_v6 }
 0x17e   : > { %2307 = vmatpush3.bf16.msra.mxu1 %v2304_v6 }
 0x203   : > { %v664_v46 = vpop.xlane.xlu0 %663 }
 0x204   : > { %v669_v47 = vmul.f32 0.03125, %v664_v46 }
 0x206   : > { %v671_v48 = vadd.f32 1e-05, %v669_v47 }
 0x207   : > { %v667_v49 = vpop.xlane.xlu0 %666 }
 0x208   : > { %2338 = vrsqrt.f32 %v671_v48  ;;  %v670_v50 = vmul.f32 0.03125, %v667_v49 }
 0x20a   : > { %v672_v51 = vadd.f32 1e-05, %v670_v50 }
 0x20c   : > { %2340 = vrsqrt.f32 %v672_v51 }
 0x212   : > { %v2339_v52 = vpop.eup %2338 }
 0x213   : > { %v675_v54 = vmul.f32 %v2339_v52, %v631_v34 }
 0x215   : > { %v683_v55 = vmul.f32 %v2104_v53, %v675_v54 }
 0x216   : > { %v2341_v56 = vpop.eup %2340 }
 0x217   : > { %v676_v57 = vmul.f32 %v2341_v56, %v632_v35  ;;  %2211 = vmatprep.mubr.msk.f32.mxu0 %vm661_vm3, %v683_v55  ;;  %v822_v35 = vrot.slane %v638_v10, %v2624_v15 }
 0x219   : > { %v684_v58 = vmul.f32 %v2104_v53, %v676_v57 }
 0x21b   : > { %2212 = vmatmul.mubr.msk.f32.vlgmr.msra.gmra.mrb[0].mxu0 %vm661_vm3, %v684_v58 }
 0x2ee   : > { %v2621_v14 = vpop.f32.mrb[0].mxu0 }
 0x2ef   : > { %v771_v16 = vmul.f32 %v2621_v14, %v769_v11  ;;  %v783_v17 = vrot.slane %v2621_v14, 7  ;;  %v798_v18 = vrot.slane %v2621_v14, 6  ;;  %v2629_v19 = vpop.f32.mrb[1].mxu0  ;;  %v813_v26 = vrot.slane %v2621_v14, 5 }
 0x2f0   : > { %v770_v22 = vmul.f32 %v769_v11, %v2629_v19  ;;  %v782_v23 = vrot.slane %v2629_v19, 7  ;;  %v797_v24 = vrot.slane %v2629_v19, 6  ;;  %v812_v34 = vrot.slane %v2629_v19, 5 }
 0x2f1   : > { %v788_v25 = vsel %vm786_vm4, 0.0, %v783_v17  ;;  %v779_v29 = vadd.f32 %v2107_v20, %v771_v16  ;;  %v803_v32 = vsel %vm801_vm5, 0.0, %v798_v18  ;;  %v818_v40 = vsel %vm816_vm6, 0.0, %v813_v26 }
 0x2f2   : > { %v778_v28 = vadd.f32 %v2107_v20, %v770_v22  ;;  %v787_v30 = vsel %vm786_vm4, 0.0, %v782_v23  ;;  %v802_v31 = vsel %vm801_vm5, 0.0, %v797_v24  ;;  %v794_v36 = vmul.f32 %v792_v21, %v788_v25 }
 0x2f3   : > { %v793_v33 = vmul.f32 %v792_v21, %v787_v30  ;;  %v808_v38 = vmul.f32 %v807_v27, %v802_v31  ;;  %v817_v39 = vsel %vm816_vm6, 0.0, %v812_v34  ;;  %v809_v42 = vmul.f32 %v807_v27, %v803_v32 }
 0x2f4   : > { %v796_v41 = vadd.f32 %v794_v36, %v779_v29  ;;  %v823_v44 = vmul.f32 %v822_v35, %v817_v39  ;;  %v824_v46 = vmul.f32 %v822_v35, %v818_v40  ;;  %v2115_v20 = vmul.f32 -1.442695, %v2621_v14 }
 0x2f5   : > { %v795_v37 = vadd.f32 %v793_v33, %v778_v28  ;;  %v1337_v22 = vsub.s32 7, %v2608_v8  ;;  %v2114_v36 = vmul.f32 -1.442695, %v2629_v19 }
 0x2f6   : > { %v811_v45 = vadd.f32 %v809_v42, %v796_v41  ;;  %v2410_v41 = vmov 1966171168  }
 0x2f7   : > { %v810_v43 = vadd.f32 %v808_v38, %v795_v37  ;;  %v953_v42 = vunpack.c.l.s4 %v2410_v41 }
 0x2f8   : > { %v826_v48 = vadd.f32 %v824_v46, %v811_v45 }
 0x2f9   : > { %v825_v47 = vadd.f32 %v823_v44, %v810_v43 }
 0x2fa   : > { %v2109_v50 = vmul.f32 -1.442695, %v826_v48 }
 0x2fb   : > { %v2108_v49 = vmul.f32 -1.442695, %v825_v47 }
 0x2fd   : > { %2342 = vpow2.f32 %v2108_v49 }
 0x2fe   : > { %2344 = vpow2.f32 %v2109_v50 }
 0x307   : > { %v2343_v51 = vpop.eup %2342 }
 0x308   : > { %v2345_v52 = vpop.eup %2344  ;;  %v833_v53 = vadd.f32 1.0, %v2343_v51 }
 0x309   : > { %v834_v54 = vadd.f32 1.0, %v2345_v52 }
 0x30a   : > { %2346 = vrcp.f32 %v833_v53 }
 0x30b   : > { %2348 = vrcp.f32 %v834_v54 }
 0x314   : > { %v2347_v55 = vpop.eup %2346 }
 0x315   : > { %v2349_v56 = vpop.eup %2348  ;;  %v2650_v57 = vmul.f32 %v2347_v55, %v825_v47 }
 0x316   : > { %v2652_v58 = vmul.f32 %v2349_v56, %v826_v48 }
 0x317   : > { %2230 = vmatprep.mubr.msk.f32.mxu1 %vm841_vm7, %v2650_v57 }
 0x318   : > { %2231 = vmatmul.mubr.msk.f32.vlgmr.msra.gmra.mrb[0].mxu1 %vm841_vm7, %v2652_v58 }
 0x3eb   : > { %v2232_v60 = vpop.f32.mrb[0].mxu1 }
 0x3ec   : > { %v914_v61 = vpop.f32.mrb[1].mxu1  ;;  %v1378_v62 = vrot.slane %v2232_v60, %v1313_v59  ;;  %v1346_v63 = vrot.slane %v2232_v60, %v2624_v15  ;;  %v1386_v2 = vrot.slane %v2232_v60, %v1321_v0  ;;  %v1354_v3 = vrot.slane %v2232_v60, %v2619_v13 }
 0x3ed   : > { %v929_v5 = vadd.f32 %v2112_v1, %v914_v61  ;;  %v2668_v7 = vrot.slane %v2232_v60, %v1329_v4  ;;  %v1362_v10 = vrot.slane %v2232_v60, %v2616_v12  ;;  %v1370_v17 = vrot.slane %v2232_v60, %v2611_v9 }
 0x3ee   : > { %1381 = vbcast.lane.b32.xlu0 %v1378_v62, 320  ;;  %1349 = vbcast.lane.b32.xlu1 %v1346_v63, 320  ;;  %v1290_v18 = vrot.slane %v914_v61, %v2619_v13  ;;  %v1282_v21 = vrot.slane %v914_v61, %v2624_v15  ;;  %v1402_v24 = vrot.slane %v2232_v60, %v1337_v22 }
 0x3ef   : > { %v933_v6 = vand.u32 2147483647, %v929_v5  ;;  %v1338_v26 = vrot.slane %v914_v61, %v1337_v22  ;;  %v2677_v13 = vadd.f32 %v2232_v60, %v2112_v1  ;;  %v1314_v28 = vrot.slane %v914_v61, %v1313_v59 }
 0x3f0   : > { %v1322_v31 = vrot.slane %v914_v61, %v1321_v0  ;;  %v1330_v33 = vrot.slane %v914_v61, %v1329_v4  ;;  %v1298_v34 = vrot.slane %v914_v61, %v2616_v12  ;;  %v1306_v38 = vrot.slane %v914_v61, %v2611_v9  ;;  %v653_v0 = vld [vmem:[%s2525_s16 + $0x10] sm:$0xff]  ;;  %v655_v4 = vld [vmem:[%s2525_s16 + $0x20] sm:$0xff] }
 0x3f1   : > { %v935_v11 = vsub.f32 0.0, %v933_v6  ;;  %v934_v29 = vand.u32 2147483647, %v2677_v13  ;;  %v931_v40 = vmax.f32 %v929_v5, 0.0  ;;  %v954_v12 = vunpack.c.0.s8 %v953_v42  ;;  %v656_v5 = vld [vmem:[%s2525_s16 + $0x28] sm:$0xff] }
 0x3f2   : > { %1389 = vbcast.lane.b32.xlu0 %v1386_v2, 320  ;;  %1357 = vbcast.lane.b32.xlu1 %v1354_v3, 320  ;;  %v932_v60 = vmax.f32 %v2677_v13, 0.0 }
 0x3f3   : > { %v937_v16 = vmul.f32 1.442695, %v935_v11  ;;  %v936_v32 = vsub.f32 0.0, %v934_v29  ;;  %v2691_v48 = vsub.s32 %v954_v12, %v2608_v8 }
 0x3f5   : > { %2350 = vpow2.f32 %v937_v16  ;;  %v939_v37 = vmul.f32 1.442695, %v936_v32 }
 0x3f6   : > { %1397 = vbcast.lane.b32.xlu0 %v2668_v7, 320  ;;  %1365 = vbcast.lane.b32.xlu1 %v1362_v10, 320  ;;  %2352 = vpow2.f32 %v2115_v20  ;;  %v2717_v20 = vld [vmem:[%s2516_s27] sm:$0xff] }
 0x3fa   : > { %1537 = vbcast.lane.b32.xlu0 %v1346_v63, 328  ;;  %1373 = vbcast.lane.b32.xlu1 %v1370_v17, 320  ;;  %v652_v63 = vld [vmem:[%s2525_s16 + $0x8] sm:$0xff] }
 0x3fe   : > { %1541 = vbcast.lane.b32.xlu1 %v1354_v3, 328  ;;  %1293 = vbcast.lane.b32.xlu0 %v1290_v18, 320 }
 0x3ff   : > { %v2351_v23 = vpop.eup %2350 }
 0x400   : > { %v941_v25 = vadd.f32 1.0, %v2351_v23  ;;  %v2353_v27 = vpop.eup %2352 }
 0x401   : > { %v1762_v30 = vadd.f32 1.0, %v2353_v27 }
 0x402   : > { %1545 = vbcast.lane.b32.xlu0 %v1362_v10, 328  ;;  %1285 = vbcast.lane.b32.xlu1 %v1282_v21, 320  ;;  %2354 = vlog2.f32 %v941_v25  ;;  %v658_v10 = vld [vmem:[%s2525_s16 + $0x38] sm:$0xff] }
 0x403   : > { %2356 = vrcp.f32 %v1762_v30 }
 0x404   : > { %2358 = vpow2.f32 %v2114_v36 }
 0x405   : > { %2360 = vpow2.f32 %v939_v37 }
 0x406   : > { %1509 = vbcast.lane.b32.xlu0 %v1290_v18, 328  ;;  %1405 = vbcast.lane.b32.xlu1 %v1402_v24, 320 }
 0x40a   : > { %1341 = vbcast.lane.b32.xlu0 %v1338_v26, 320  ;;  %1549 = vbcast.lane.b32.xlu1 %v1370_v17, 328 }
 0x40c   : > { %v2355_v35 = vpop.eup %2354 }
 0x40d   : > { %v944_v39 = vmul.f32 0.6931472, %v2355_v35  ;;  %v2357_v44 = vpop.eup %2356 }
 0x40e   : > { %1521 = vbcast.lane.b32.xlu0 %v1314_v28, 328  ;;  %1553 = vbcast.lane.b32.xlu1 %v1378_v62, 328  ;;  %v1768_v45 = vmul.f32 %v2357_v44, %v2621_v14  ;;  %v2359_v9 = vpop.eup %2358  ;;  %v651_v62 = vld [vmem:[%s2525_s16] sm:$0xff] }
 0x40f   : > { %v2683_v43 = vadd.f32 %v944_v39, %v931_v40  ;;  %v2361_v47 = vpop.eup %2360  ;;  %v1761_v50 = vadd.f32 1.0, %v2359_v9  ;;  %v2308_v1 = vpack.c.bf16 %v652_v63, %v651_v62 }
 0x410   : > { %v942_v14 = vadd.f32 1.0, %v2361_v47 }
 0x411   : > { %v2688_v46 = vmul.f32 %v2683_v43, %v2650_v57  ;;  %2362 = vrcp.f32 %v1761_v50  ;;  %2309 = vmatprep.subr.bf16.mxu0 %v2308_v1 }
 0x412   : > { %1525 = vbcast.lane.b32.xlu0 %v1322_v31, 328  ;;  %1557 = vbcast.lane.b32.xlu1 %v1386_v2, 328  ;;  %2364 = vlog2.f32 %v942_v14  ;;  %v654_v2 = vld [vmem:[%s2525_s16 + $0x18] sm:$0xff] }
 0x413   : > { %v1181_v49 = vcombine.high %v2688_v46, %v2688_v46  ;;  %v2312_v3 = vpack.c.bf16 %v654_v2, %v653_v0  ;;  %2311 = vmatpush3.bf16.msra.mxu0 %v2308_v1 }
 0x415   : > { %v1195_v51 = vrot.slane %v1181_v49, %v2691_v48  ;;  %2313 = vmatprep.subr.bf16.mxu0 %v2312_v3 }
 0x416   : > { %1529 = vbcast.lane.b32.xlu0 %v1330_v33, 328  ;;  %1301 = vbcast.lane.b32.xlu1 %v1298_v34, 320 }
 0x417   : > { %v1197_v52 = vcombine.high %v1195_v51, %v1195_v51  ;;  %v2700_v8 = vrot.slane %v1195_v51, %v2691_v48  ;;  %2315 = vmatpush3.bf16.msra.mxu0 %v2312_v3 }
 0x419   : > { %v2697_v53 = vrot.slane %v1197_v52, %v2691_v48 }
 0x41a   : > { %1533 = vbcast.lane.b32.xlu0 %v1338_v26, 328  ;;  %1309 = vbcast.lane.b32.xlu1 %v1306_v38, 320 }
 0x41b   : > { %v2363_v54 = vpop.eup %2362 }
 0x41c   : > { %v2365_v55 = vpop.eup %2364  ;;  %v1767_v56 = vmul.f32 %v2363_v54, %v2629_v19  ;;  %v2316_v19 = vpack.c.bf16 %v656_v5, %v655_v4 }
 0x41d   : > { %v946_v59 = vmul.f32 0.6931472, %v2365_v55 }
 0x41e   : > { %1565 = vbcast.lane.b32.xlu0 %v1402_v24, 328  ;;  %1317 = vbcast.lane.b32.xlu1 %v1314_v28, 320 }
 0x41f   : > { %v948_v61 = vadd.f32 %v946_v59, %v932_v60  ;;  %2317 = vmatprep.subr.bf16.mxu0 %v2316_v19 }
 0x420   : > { %2319 = vmatpush3.bf16.msra.mxu0 %v2316_v19 }
 0x421   : > { %v1007_v6 = vrot.slane %v948_v61, %v2691_v48  ;;  %v1000_v24 = vcombine.high %v948_v61, %v948_v61  ;;  %v1178_v30 = vmul.f32 %v948_v61, %v2652_v58 }
 0x422   : > { %1773 = vrot.lane.b32.xlu0 %v1768_v45, %s2411_s29  ;;  %1325 = vbcast.lane.b32.xlu1 %v1322_v31, 320 }
 0x423   : > { %v1023_v11 = vrot.slane %v1007_v6, %v2691_v48  ;;  %v1015_v17 = vcombine.high %v1007_v6, %v1007_v6  ;;  %v1014_v27 = vrot.slane %v1000_v24, %v2691_v48  ;;  %v1237_v36 = vrot.slane %v1178_v30, %v2691_v48 }
 0x424   : > { %v1230_v54 = vcombine.high %v1178_v30, %v1178_v30 }
 0x425   : > { %v1084_v18 = vrot.slane %v1023_v11, %v2624_v15  ;;  %v1045_v23 = vcombine.high %v1023_v11, %v1023_v11  ;;  %v1030_v35 = vrot.slane %v1014_v27, %v2691_v48  ;;  %v1253_v42 = vrot.slane %v1237_v36, %v2691_v48 }
 0x426   : > { %1333 = vbcast.lane.b32.xlu1 %v1330_v33, 320  ;;  %v1245_v44 = vcombine.high %v1237_v36, %v1237_v36  ;;  %v1244_v6 = vrot.slane %v1230_v54, %v2691_v48 }
 0x427   : > { %v1137_v22 = vmul.f32 %v1084_v18, %v2717_v20  ;;  %v1092_v13 = vrot.slane %v1045_v23, %v2624_v15  ;;  %v1100_v41 = vrot.slane %v1030_v35, %v2624_v15  ;;  %v1046_v47 = vcombine.high %v1030_v35, %v1030_v35 }
 0x428   : > { %v1442_v51 = vrot.slane %v1253_v42, %v2624_v15  ;;  %v1267_v14 = vrot.slane %v1245_v44, %v2691_v48  ;;  %v1275_v3 = vcombine.high %v1253_v42, %v1253_v42 }
 0x429   : > { %v1161_v26 = vmul.f32 1.442695, %v1137_v22  ;;  %v1139_v31 = vmul.f32 %v1092_v13, %v2717_v20  ;;  %v1141_v50 = vmul.f32 %v1100_v41, %v2717_v20  ;;  %v1108_v1 = vrot.slane %v1046_v47, %v2624_v15 }
 0x42a   : > { %1505 = vbcast.lane.b32.xlu1 %v1282_v21, 328  ;;  %v1037_v21 = vrot.slane %v1015_v17, %v2691_v48  ;;  %v1446_v2 = vrot.slane %v1267_v14, %v2624_v15  ;;  %v1450_v24 = vrot.slane %v1275_v3, %v2624_v15  ;;  %v1260_v13 = vrot.slane %v1244_v6, %v2691_v48 }
 0x42b   : > { %2366 = vpow2.f32 %v1161_v26  ;;  %v1165_v37 = vmul.f32 1.442695, %v1139_v31  ;;  %v1169_v0 = vmul.f32 1.442695, %v1141_v50  ;;  %v1143_v22 = vmul.f32 %v1108_v1, %v2717_v20 }
 0x42c   : > { %v1088_v25 = vrot.slane %v1037_v21, %v2624_v15  ;;  %v1047_v28 = vcombine.high %v1037_v21, %v1037_v21 }
 0x42d   : > { %v1173_v35 = vmul.f32 1.442695, %v1143_v22 }
 0x42e   : > { %1513 = vbcast.lane.b32.xlu1 %v1298_v34, 328  ;;  %v1138_v29 = vmul.f32 %v1088_v25, %v2717_v20  ;;  %v1096_v33 = vrot.slane %v1047_v28, %v2624_v15  ;;  %v1016_v34 = vcombine.high %v1014_v27, %v1014_v27  ;;  %v1277_v25 = vcombine.high %v1267_v14, %v1267_v14 }
 0x42f   : > { %v1246_v27 = vcombine.high %v1244_v6, %v1244_v6 }
 0x430   : > { %v1163_v32 = vmul.f32 1.442695, %v1138_v29  ;;  %v1140_v39 = vmul.f32 %v1096_v33, %v2717_v20  ;;  %v1044_v40 = vrot.slane %v1016_v34, %v2691_v48  ;;  %v1454_v36 = vrot.slane %v1277_v25, %v2624_v15 }
 0x431   : > { %v2768_v41 = vrot.slane %v1246_v27, %v2691_v48 }
 0x432   : > { %1517 = vbcast.lane.b32.xlu1 %v1306_v38, 328  ;;  %v958_v38 = vrot.slane %v2683_v43, %v2691_v48  ;;  %2368 = vpow2.f32 %v1163_v32  ;;  %v1167_v9 = vmul.f32 1.442695, %v1140_v39  ;;  %v1104_v49 = vrot.slane %v1044_v40, %v2624_v15 }
 0x433   : > { %2370 = vpow2.f32 %v1165_v37  ;;  %v1048_v62 = vcombine.high %v1044_v40, %v1044_v40  ;;  %v1458_v40 = vrot.slane %v1260_v13, %v2624_v15  ;;  %v1278_v27 = vcombine.high %v2768_v41, %v2768_v41 }
 0x434   : > { %v2737_v12 = vrot.slane %v958_v38, %v2691_v48  ;;  %2372 = vpow2.f32 %v1167_v9  ;;  %v1142_v63 = vmul.f32 %v1104_v49, %v2717_v20  ;;  %v1188_v9 = vrot.slane %v2688_v46, %v2691_v48 }
 0x435   : > { %v2367_v45 = vpop.eup %2366  ;;  %2374 = vpow2.f32 %v1169_v0  ;;  %v1112_v21 = vrot.slane %v1048_v62, %v2624_v15 }
 0x436   : > { %1561 = vbcast.lane.b32.xlu1 %v2668_v7, 328  ;;  %v657_v7 = vld [vmem:[%s2525_s16 + $0x30] sm:$0xff]  ;;  %v1568_v60 = vmul.f32 0.0, %v2367_v45  ;;  %v1052_v61 = vrot.slane %v2737_v12, %v2624_v15  ;;  %v1171_v18 = vmul.f32 1.442695, %v1142_v63  ;;  %v951_v45 = vcombine.high %v2683_v43, %v2683_v43 }
 0x437   : > { %v2320_v16 = vpack.c.bf16 %v658_v10, %v657_v7  ;;  %v1144_v34 = vmul.f32 %v1112_v21, %v2717_v20  ;;  %v1196_v63 = vcombine.high %v1188_v9, %v1188_v9  ;;  %v2783_v0 = vrot.slane %v1188_v9, %v2691_v48 }
 0x438   : > { %v1129_v17 = vmul.f32 %v1052_v61, %v2717_v20  ;;  %2376 = vpow2.f32 %v1171_v18  ;;  %v965_v62 = vrot.slane %v951_v45, %v2691_v48 }
 0x439   : > { %2321 = vmatprep.subr.bf16.mxu0 %v2320_v16  ;;  %v1175_v14 = vmul.f32 1.442695, %v1144_v34 }
 0x43a   : > { %1771 = vrot.lane.b32.xlu1 %v1767_v56, %s2411_s29  ;;  %2323 = vmatpush3.bf16.msra.mxu0 %v2320_v16  ;;  %v966_v56 = vcombine.high %v958_v38, %v958_v38  ;;  %v1145_v32 = vmul.f32 1.442695, %v1129_v17  ;;  %v996_v38 = vcombine.high %v2737_v12, %v2737_v12  ;;  %v981_v25 = vrot.slane %v965_v62, %v2691_v48 }
 0x43c   : > { %v2369_v5 = vpop.eup %2368  ;;  %v988_v16 = vrot.slane %v966_v56, %v2691_v48  ;;  %2378 = vpow2.f32 %v1145_v32  ;;  %v1060_v56 = vrot.slane %v996_v38, %v2624_v15  ;;  %v967_v32 = vcombine.high %v965_v62, %v965_v62 }
 0x43d   : > { %v2371_v23 = vpop.eup %2370  ;;  %2380 = vpow2.f32 %v1173_v35 }
 0x43e   : > { %v1056_v33 = vrot.slane %v988_v16, %v2624_v15  ;;  %v2373_v39 = vpop.eup %2372  ;;  %2382 = vpow2.f32 %v1175_v14  ;;  %v995_v14 = vrot.slane %v967_v32, %v2691_v48 }
 0x43f   : > { %v2375_v43 = vpop.eup %2374 }
 0x440   : > { %v1130_v12 = vmul.f32 %v1056_v33, %v2717_v20 }
 0x460   : > { %v2743_v52 = vpop.permute.xlu0 %1381  ;;  %v1350_v55 = vpop.permute.xlu1 %1349 }
 0x461   : > { %v1495_v59 = vmul.f32 %v1442_v51, %v1350_v55  ;;  %v1276_v51 = vcombine.high %v1260_v13, %v1260_v13  ;;  %v998_v55 = vcombine.high %v988_v16, %v988_v16  ;;  %v1499_v1 = vmul.f32 %v1458_v40, %v2743_v52  ;;  %v2377_v52 = vpop.eup %2376 }
 0x462   : > { %v1131_v16 = vmul.f32 %v1060_v56, %v2717_v20  ;;  %v2379_v33 = vpop.eup %2378 }
 0x463   : > { %v1570_v4 = vadd.f32 %v1568_v60, %v1495_v59  ;;  %v1064_v17 = vrot.slane %v998_v55, %v2624_v15 }
 0x464   : > { %v2751_v19 = vpop.permute.xlu0 %1389  ;;  %v1358_v7 = vpop.permute.xlu1 %1357 }
 0x465   : > { %v1496_v10 = vmul.f32 %v1446_v2, %v1358_v7  ;;  %v1588_v11 = vmul.f32 %v2369_v5, %v1570_v4  ;;  %v1462_v2 = vrot.slane %v2768_v41, %v2624_v15  ;;  %v1466_v5 = vrot.slane %v1276_v51, %v2624_v15 }
 0x466   : > { %v1147_v7 = vmul.f32 1.442695, %v1130_v12  ;;  %v1132_v38 = vmul.f32 %v1064_v17, %v2717_v20 }
 0x467   : > { %v1590_v26 = vadd.f32 %v1588_v11, %v1496_v10 }
 0x468   : > { %v2759_v28 = vpop.permute.xlu0 %1397  ;;  %v1366_v29 = vpop.permute.xlu1 %1365  ;;  %2384 = vpow2.f32 %v1147_v7  ;;  %v1151_v56 = vmul.f32 1.442695, %v1132_v38 }
 0x469   : > { %v1497_v30 = vmul.f32 %v1450_v24, %v1366_v29  ;;  %v1608_v31 = vmul.f32 %v2371_v23, %v1590_v26  ;;  %v1410_v24 = vrot.slane %v2783_v0, %v2624_v15  ;;  %v1501_v45 = vmul.f32 %v1466_v5, %v2759_v28 }
 0x46b   : > { %v1610_v37 = vadd.f32 %v1608_v31, %v1497_v30 }
 0x46c   : > { %v1538_v42 = vpop.permute.xlu0 %1537  ;;  %v1374_v44 = vpop.permute.xlu1 %1373 }
 0x46d   : > { %v1572_v47 = vmul.f32 %v1570_v4, %v1538_v42  ;;  %v1498_v49 = vmul.f32 %v1454_v36, %v1374_v44  ;;  %v1628_v50 = vmul.f32 %v2373_v39, %v1610_v37  ;;  %v1149_v36 = vmul.f32 1.442695, %v1131_v16  ;;  %v2381_v39 = vpop.eup %2380 }
 0x46e   : > { %v1068_v44 = vrot.slane %v981_v25, %v2624_v15 }
 0x46f   : > { %v1580_v54 = vsel %vm841_vm7, %v1572_v47, 0.0  ;;  %v2777_v59 = vadd.f32 %v1628_v50, %v1498_v49  ;;  %v1470_v47 = vrot.slane %v1278_v27, %v2624_v15  ;;  %2386 = vpow2.f32 %v1149_v36 }
 0x470   : > { %v1581_v60 = vrot.slane %v1580_v54, 4  ;;  %v1542_v61 = vpop.permute.xlu1 %1541  ;;  %v2779_v46 = vpop.permute.xlu0 %1293  ;;  %2388 = vpow2.f32 %v1151_v56  ;;  %v999_v27 = vcombine.high %v995_v14, %v995_v14  ;;  %v1226_v36 = vcombine.high %v2783_v0, %v2783_v0 }
 0x471   : > { %v1592_v3 = vmul.f32 %v1590_v26, %v1542_v61  ;;  %v1648_v4 = vmul.f32 %v2375_v43, %v2777_v59  ;;  %v1500_v26 = vmul.f32 %v1462_v2, %v2751_v19  ;;  %v2383_v43 = vpop.eup %2382 }
 0x472   : > { %v1582_v6 = vadd.f32 %v1581_v60, %v1580_v54  ;;  %v1567_v54 = vmul.f32 0.0, %v2379_v33 }
 0x473   : > { %v1600_v10 = vsel %vm841_vm7, %v1592_v3, 0.0  ;;  %v2791_v11 = vadd.f32 %v1648_v4, %v1499_v1  ;;  %v997_v1 = vcombine.high %v981_v25, %v981_v25 }
 0x474   : > { %v1583_v18 = vrot.slane %v1582_v6, 2  ;;  %v1601_v21 = vrot.slane %v1600_v10, 4  ;;  %v1546_v22 = vpop.permute.xlu0 %1545  ;;  %v1286_v23 = vpop.permute.xlu1 %1285 }
 0x475   : > { %v1612_v13 = vmul.f32 %v1610_v37, %v1546_v22  ;;  %v1668_v29 = vmul.f32 %v2377_v52, %v2791_v11  ;;  %v2807_v37 = vrot.slane %v1196_v63, %v2691_v48  ;;  %v1487_v9 = vmul.f32 %v1410_v24, %v1286_v23 }
 0x476   : > { %v1584_v30 = vadd.f32 %v1583_v18, %v1582_v6  ;;  %v1602_v31 = vadd.f32 %v1601_v21, %v1600_v10  ;;  %v1133_v63 = vmul.f32 %v1068_v44, %v2717_v20  ;;  %v1072_v10 = vrot.slane %v995_v14, %v2624_v15  ;;  %v2385_v18 = vpop.eup %2384 }
 0x477   : > { %v1620_v34 = vsel %vm841_vm7, %v1612_v13, 0.0  ;;  %v2803_v35 = vadd.f32 %v1668_v29, %v1500_v26  ;;  %v2821_v2 = vadd.f32 %v1567_v54, %v1487_v9  ;;  %v1414_v16 = vrot.slane %v2807_v37, %v2624_v15 }
 0x478   : > { %v1603_v19 = vrot.slane %v1602_v31, 2  ;;  %v1621_v40 = vrot.slane %v1620_v34, 4  ;;  %v2809_v41 = vpop.permute.xlu0 %1509  ;;  %v1406_v42 = vpop.permute.xlu1 %1405  ;;  %v1585_v50 = vrot.slane %v1584_v30, 1  ;;  %v1076_v13 = vrot.slane %v997_v1, %v2624_v15 }
 0x479   : > { %v1688_v49 = vmul.f32 %v2381_v39, %v2803_v35  ;;  %v1502_v3 = vmul.f32 %v1470_v47, %v1406_v42  ;;  %v1587_v24 = vmul.f32 %v2385_v18, %v2821_v2  ;;  %v1134_v32 = vmul.f32 %v1072_v10, %v2717_v20 }
 0x47a   : > { %v1604_v51 = vadd.f32 %v1603_v19, %v1602_v31  ;;  %v1622_v12 = vadd.f32 %v1621_v40, %v1620_v34  ;;  %v1586_v5 = vadd.f32 %v1585_v50, %v1584_v30  ;;  %v1153_v31 = vmul.f32 1.442695, %v1133_v63  ;;  %v2387_v40 = vpop.eup %2386 }
 0x47b   : > { %v2816_v55 = vadd.f32 %v1688_v49, %v1501_v45  ;;  %v1488_v33 = vmul.f32 %v1414_v16, %v2779_v46  ;;  %v1135_v45 = vmul.f32 %v1076_v13, %v2717_v20  ;;  %v1080_v9 = vrot.slane %v999_v27, %v2624_v15  ;;  %v2389_v63 = vpop.eup %2388 }
 0x47c   : > { %v1605_v60 = vrot.slane %v1604_v51, 1  ;;  %v1623_v61 = vrot.slane %v1622_v12, 2  ;;  %v2818_v62 = vpop.permute.xlu0 %1341  ;;  %v1550_v28 = vpop.permute.xlu1 %1549  ;;  %2390 = vpow2.f32 %v1153_v31  ;;  %v1155_v49 = vmul.f32 1.442695, %v1134_v32 }
 0x47d   : > { %v1632_v4 = vmul.f32 %v2777_v59, %v1550_v28  ;;  %v1708_v48 = vmul.f32 %v2383_v43, %v2816_v55  ;;  %v1589_v42 = vadd.f32 %v1587_v24, %v1488_v33  ;;  %v1136_v28 = vmul.f32 %v1080_v9, %v2717_v20 }
 0x47e   : > { %v1606_v6 = vadd.f32 %v1605_v60, %v1604_v51  ;;  %v1624_v7 = vadd.f32 %v1623_v61, %v1622_v12  ;;  %v1418_v51 = vrot.slane %v1226_v36, %v2624_v15  ;;  %v1228_v12 = vcombine.high %v2807_v37, %v2807_v37 }
 0x47f   : > { %v1640_v17 = vsel %vm841_vm7, %v1632_v4, 0.0  ;;  %v2829_v52 = vadd.f32 %v1708_v48, %v1502_v3  ;;  %v1607_v60 = vmul.f32 %v2387_v40, %v1589_v42  ;;  %v1157_v61 = vmul.f32 1.442695, %v1135_v45 }
 0x480   : > { %v1728_v21 = vsel %vm786_vm4, %v1586_v5, %v1606_v6  ;;  %v1625_v22 = vrot.slane %v1624_v7, 1  ;;  %v1641_v23 = vrot.slane %v1640_v17, 4  ;;  %v1554_v59 = vpop.permute.xlu1 %1553  ;;  %v2833_v25 = vpop.permute.xlu0 %1521  ;;  %2392 = vpow2.f32 %v1155_v49 }
 0x481   : > { %v1652_v26 = vmul.f32 %v2791_v11, %v1554_v59  ;;  %1896 = vxpose.xlu0.b32.start.end [1/1] (short) (narrow) %v2829_v52, 64  ;;  %v1422_v5 = vrot.slane %v1228_v12, %v2624_v15  ;;  %2394 = vpow2.f32 %v1157_v61  ;;  %v1426_v59 = vrot.slane %v2700_v8, %v2624_v15 }
 0x482   : > { %v1626_v29 = vadd.f32 %v1625_v22, %v1624_v7  ;;  %v1642_v30 = vadd.f32 %v1641_v23, %v1640_v17  ;;  %v1159_v22 = vmul.f32 1.442695, %v1136_v28  ;;  %v1591_v32 = vmul.f32 %v1589_v42, %v2809_v41 }
 0x483   : > { %v1660_v34 = vsel %vm841_vm7, %v1652_v26, 0.0  ;;  %v1430_v36 = vrot.slane %v2697_v53, %v2624_v15  ;;  %v1229_v45 = vcombine.high %v2697_v53, %v2697_v53 }
 0x484   : > { %v1730_v38 = vsel %vm801_vm5, %v1728_v21, %v1626_v29  ;;  %v1643_v11 = vrot.slane %v1642_v30, 2  ;;  %v1661_v39 = vrot.slane %v1660_v34, 4  ;;  %v1558_v19 = vpop.permute.xlu1 %1557  ;;  %v1526_v50 = vpop.permute.xlu0 %1525  ;;  %2396 = vpow2.f32 %v1159_v22 }
 0x485   : > { %v1672_v44 = vmul.f32 %v2803_v35, %v1558_v19  ;;  %v1593_v41 = vsel %vm841_vm7, %v1591_v32, 0.0 }
 0x486   : > { %v1644_v47 = vadd.f32 %v1643_v11, %v1642_v30  ;;  %v1662_v46 = vadd.f32 %v1661_v39, %v1660_v34  ;;  %v2391_v24 = vpop.eup %2390 }
 0x487   : > { %v1680_v0 = vsel %vm841_vm7, %v1672_v44, 0.0 }
 0x488   : > { %v1645_v14 = vrot.slane %v1644_v47, 1  ;;  %v1663_v54 = vrot.slane %v1662_v46, 2  ;;  %v1681_v56 = vrot.slane %v1680_v0, 4  ;;  %v1302_v35 = vpop.permute.xlu1 %1301  ;;  %v1530_v16 = vpop.permute.xlu0 %1529 }
 0x489   : > { %v1489_v43 = vmul.f32 %v1418_v51, %v1302_v35 }
 0x48a   : > { %v1646_v1 = vadd.f32 %v1645_v14, %v1644_v47  ;;  %v1664_v3 = vadd.f32 %v1663_v54, %v1662_v46  ;;  %v1682_v4 = vadd.f32 %v1681_v56, %v1680_v0  ;;  %v2393_v11 = vpop.eup %2392  ;;  %v1594_v14 = vrot.slane %v1593_v41, 4 }
 0x48b   : > { %v2852_v48 = vadd.f32 %v1607_v60, %v1489_v43  ;;  %v2395_v47 = vpop.eup %2394  ;;  %v1438_v54 = vrot.slane %v1229_v45, %v2624_v15 }
 0x48c   : > { %v1732_v37 = vsel %vm816_vm6, %v1730_v38, %v1646_v1  ;;  %v1665_v6 = vrot.slane %v1664_v3, 1  ;;  %v1683_v7 = vrot.slane %v1682_v4, 2  ;;  %v1310_v10 = vpop.permute.xlu1 %1309  ;;  %v1534_v33 = vpop.permute.xlu0 %1533  ;;  %v1227_v38 = vcombine.high %v2700_v8, %v2700_v8 }
 0x48d   : > { %v1490_v17 = vmul.f32 %v1422_v5, %v1310_v10  ;;  %v1627_v18 = vmul.f32 %v2389_v63, %v2852_v48  ;;  %v1494_v53 = vmul.f32 %v1438_v54, %v2818_v62  ;;  %v1595_v1 = vadd.f32 %v1594_v14, %v1593_v41 }
 0x48e   : > { %v1666_v20 = vadd.f32 %v1665_v6, %v1664_v3  ;;  %v1684_v21 = vadd.f32 %v1683_v7, %v1682_v4  ;;  %v1434_v9 = vrot.slane %v1227_v38, %v2624_v15  ;;  %v2397_v35 = vpop.eup %2396 }
 0x48f   : > { %v2857_v23 = vadd.f32 %v1627_v18, %v1490_v17  ;;  %v1596_v17 = vrot.slane %v1595_v1, 2 }
 0x490   : > { %v1735_v26 = vsel %vm1733_vm8, %v1732_v37, %v1666_v20  ;;  %v1685_v13 = vrot.slane %v1684_v21, 1  ;;  %v1318_v27 = vpop.permute.xlu1 %1317  ;;  %v1566_v8 = vpop.permute.xlu0 %1565 }
 0x491   : > { %v1491_v29 = vmul.f32 %v1426_v59, %v1318_v27  ;;  %v1647_v30 = vmul.f32 %v2391_v24, %v2857_v23  ;;  %v1712_v43 = vmul.f32 %v2829_v52, %v1566_v8 }
 0x492   : > { %v1686_v31 = vadd.f32 %v1685_v13, %v1684_v21 }
 0x493   : > { %v1649_v34 = vadd.f32 %v1647_v30, %v1491_v29  ;;  %v1720_v62 = vsel %vm841_vm7, %v1712_v43, 0.0 }
 0x494   : > { %v1326_v39 = vpop.permute.xlu1 %1325  ;;  %v2869_v19 = vsel %vm1736_vm9, %v1735_v26, %v1686_v31  ;;  %v1721_v18 = vrot.slane %v1720_v62, 4  ;;  %v1597_v31 = vadd.f32 %v1596_v17, %v1595_v1  ;;  %v2113_v17 = vld [vmem:[%s506_s12] ss:$0 sm:$0xff] }
 0x495   : > { %v1492_v40 = vmul.f32 %v1430_v36, %v1326_v39  ;;  %v1667_v44 = vmul.f32 %v2393_v11, %v1649_v34  ;;  %v1651_v46 = vmul.f32 %v1649_v34, %v2833_v25 }
 0x497   : > { %v1669_v42 = vadd.f32 %v1667_v44, %v1492_v40  ;;  %v1653_v60 = vsel %vm841_vm7, %v1651_v46, 0.0 }
 0x498   : > { %v1334_v49 = vpop.permute.xlu1 %1333  ;;  %v1654_v3 = vrot.slane %v1653_v60, 4 }
 0x499   : > { %v1671_v0 = vmul.f32 %v1669_v42, %v1526_v50  ;;  %v1493_v51 = vmul.f32 %v1434_v9, %v1334_v49  ;;  %v1687_v12 = vmul.f32 %v2395_v47, %v1669_v42 }
 0x49a   : > { %v1655_v20 = vadd.f32 %v1654_v3, %v1653_v60 }
 0x49b   : > { %v1689_v56 = vadd.f32 %v1687_v12, %v1493_v51  ;;  %v1673_v28 = vsel %vm841_vm7, %v1671_v0, 0.0 }
 0x49c   : > { %v1506_v61 = vpop.permute.xlu1 %1505  ;;  %v1674_v37 = vrot.slane %v1673_v28, 4  ;;  %v1656_v34 = vrot.slane %v1655_v20, 2 }
 0x49d   : > { %v1691_v25 = vmul.f32 %v1689_v56, %v1530_v16  ;;  %v1571_v63 = vmul.f32 %v2821_v2, %v1506_v61  ;;  %v1707_v50 = vmul.f32 %v2397_v35, %v1689_v56 }
 0x49e   : > { %v1675_v59 = vadd.f32 %v1674_v37, %v1673_v28  ;;  %v1657_v8 = vadd.f32 %v1656_v34, %v1655_v20 }
 0x49f   : > { %v1693_v4 = vsel %vm841_vm7, %v1691_v25, 0.0  ;;  %v1573_v15 = vsel %vm841_vm7, %v1571_v63, 0.0  ;;  %v1709_v5 = vadd.f32 %v1707_v50, %v1494_v53 }
 0x4a0   : > { %v1574_v52 = vrot.slane %v1573_v15, 4  ;;  %v1514_v6 = vpop.permute.xlu1 %1513  ;;  %v1694_v7 = vrot.slane %v1693_v4, 4  ;;  %v1676_v11 = vrot.slane %v1675_v59, 2 }
 0x4a1   : > { %v1611_v10 = vmul.f32 %v2852_v48, %v1514_v6  ;;  %1864 = vxpose.xlu1.b32.start.end [1/1] (short) (narrow) %v1709_v5, 64  ;;  %v1711_v16 = vmul.f32 %v1709_v5, %v1534_v33  ;;  %v1722_v33 = vadd.f32 %v1721_v18, %v1720_v62 }
 0x4a2   : > { %v1575_v2 = vadd.f32 %v1574_v52, %v1573_v15  ;;  %v1695_v27 = vadd.f32 %v1694_v7, %v1693_v4  ;;  %v1677_v51 = vadd.f32 %v1676_v11, %v1675_v59 }
 0x4a3   : > { %v1613_v21 = vsel %vm841_vm7, %v1611_v10, 0.0  ;;  %v1713_v22 = vsel %vm841_vm7, %v1711_v16, 0.0  ;;  %v1723_v49 = vrot.slane %v1722_v33, 2 }
 0x4a4   : > { %v1576_v24 = vrot.slane %v1575_v2, 2  ;;  %v1614_v26 = vrot.slane %v1613_v21, 4  ;;  %v1518_v13 = vpop.permute.xlu1 %1517  ;;  %v1714_v29 = vrot.slane %v1713_v22, 4  ;;  %v1696_v45 = vrot.slane %v1695_v27, 2 }
 0x4a5   : > { %v1631_v30 = vmul.f32 %v2857_v23, %v1518_v13  ;;  %v1598_v23 = vrot.slane %v1597_v31, 1  ;;  %v1724_v61 = vadd.f32 %v1723_v49, %v1722_v33  ;;  %v1678_v63 = vrot.slane %v1677_v51, 1  ;;  %v1774_v33 = vpop.permute.xlu0 %1773 }
 0x4a6   : > { %v1577_v48 = vadd.f32 %v1576_v24, %v1575_v2  ;;  %v1615_v32 = vadd.f32 %v1614_v26, %v1613_v21  ;;  %v1715_v36 = vadd.f32 %v1714_v29, %v1713_v22  ;;  %v1697_v56 = vadd.f32 %v1696_v45, %v1695_v27 }
 0x4a7   : > { %v1633_v38 = vsel %vm841_vm7, %v1631_v30, 0.0  ;;  %v1599_v25 = vadd.f32 %v1598_v23, %v1597_v31  ;;  %v1725_v37 = vrot.slane %v1724_v61, 1  ;;  %v1679_v7 = vadd.f32 %v1678_v63, %v1677_v51 }
 0x4a8   : > { %v1616_v39 = vrot.slane %v1615_v32, 2  ;;  %v1634_v40 = vrot.slane %v1633_v38, 4  ;;  %v1562_v44 = vpop.permute.xlu1 %1561  ;;  %v1578_v42 = vrot.slane %v1577_v48, 1  ;;  %v1716_v47 = vrot.slane %v1715_v36, 2 }
 0x4a9   : > { %v1692_v41 = vmul.f32 %v2816_v55, %v1562_v44  ;;  %v1658_v55 = vrot.slane %v1657_v8, 1  ;;  %v1698_v3 = vrot.slane %v1697_v56, 1  ;;  %v1726_v59 = vadd.f32 %v1725_v37, %v1724_v61 }
 0x4aa   : > { %v1617_v9 = vadd.f32 %v1616_v39, %v1615_v32  ;;  %v1635_v46 = vadd.f32 %v1634_v40, %v1633_v38  ;;  %v1579_v35 = vadd.f32 %v1578_v42, %v1577_v48  ;;  %v1717_v53 = vadd.f32 %v1716_v47, %v1715_v36 }
 0x4ab   : > { %v1700_v0 = vsel %vm841_vm7, %v1692_v41, 0.0  ;;  %v1659_v52 = vadd.f32 %v1658_v55, %v1657_v8  ;;  %v1699_v2 = vadd.f32 %v1698_v3, %v1697_v56  ;;  %v1751_v24 = vmul.f32 %v2113_v17, %v2650_v57 }
 0x4ac   : > { %v1618_v12 = vrot.slane %v1617_v9, 1  ;;  %v1636_v14 = vrot.slane %v1635_v46, 2  ;;  %v1701_v54 = vrot.slane %v1700_v0, 4  ;;  %v1727_v4 = vsel %vm786_vm4, %v1579_v35, %v1599_v25  ;;  %v1772_v32 = vpop.permute.xlu1 %1771 }
 0x4ad   : > { %v1718_v62 = vrot.slane %v1717_v53, 1  ;;  %v1752_v27 = vmul.f32 %v2113_v17, %v2652_v58 }
 0x4ae   : > { %v1637_v43 = vadd.f32 %v1636_v14, %v1635_v46  ;;  %v1702_v60 = vadd.f32 %v1701_v54, %v1700_v0  ;;  %v1619_v28 = vadd.f32 %v1618_v12, %v1617_v9  ;;  %v2398_v0 = vld [vmem:[#allocation2 + $0x8] sm:$0xff]  ;;  %v2399_v14 = vld [vmem:[#allocation2] sm:$0xff] }
 0x4af   : > { %v1719_v21 = vadd.f32 %v1718_v62, %v1717_v53 }
 0x4b0   : > { %v1638_v50 = vrot.slane %v1637_v43, 1  ;;  %v1703_v1 = vrot.slane %v1702_v60, 2  ;;  %v1729_v6 = vsel %vm801_vm5, %v1727_v4, %v1619_v28 }
 0x4b2   : > { %v1639_v15 = vadd.f32 %v1638_v50, %v1637_v43  ;;  %v1704_v5 = vadd.f32 %v1703_v1, %v1702_v60 }
 0x4b4   : > { %v1731_v10 = vsel %vm816_vm6, %v1729_v6, %v1639_v15  ;;  %v1705_v16 = vrot.slane %v1704_v5, 1 }
 0x4b5   : > { %v1734_v18 = vsel %vm1733_vm8, %v1731_v10, %v1659_v52 }
 0x4b6   : > { %v1706_v20 = vadd.f32 %v1705_v16, %v1704_v5  ;;  %v1737_v22 = vsel %vm1736_vm9, %v1734_v18, %v1679_v7 }
 0x4b7   : > { %v1740_v26 = vsel %vm1739_vm10, %v1737_v22, %v1699_v2 }
 0x4b8   : > { %v1741_v13 = vsel %vm1739_vm10, %v2869_v19, %v1706_v20  ;;  %v1743_v29 = vsel %vm1742_vm11, %v1740_v26, %v1719_v21 }
 0x4b9   : > { %v1744_v30 = vsel %vm1742_vm11, %v1741_v13, %v1726_v59  ;;  %v1753_v31 = vadd.f32 %v1751_v24, %v1743_v29 }
 0x4ba   : > { %v1754_v48 = vadd.f32 %v1752_v27, %v1744_v30 }
 0x4bb   : > { %v1777_v34 = vmul.f32 %v1772_v32, %v1753_v31 }
 0x4bc   : > { %v1778_v36 = vmul.f32 %v1774_v33, %v1754_v48 }
 0x4bd   : > { %2249 = vmatprep.mubr.msk.f32.mxu0 %vm841_vm7, %v1777_v34 }
 0x4be   : > { %2250 = vmatmul.mubr.msk.f32.vlgmr.msra.gmra.mrb[2].mxu0 %vm841_vm7, %v1778_v36 }
 0x501   : > { %v1912_v57 = vpop.trf.xlu0 }
 0x502   : > { %1937 = vst.msk [vmem:[%s2531_s22 + $0x40] sm:$0xff] %vm1928_vm12, %v1912_v57 }
 0x505   : > { %v1913_v58 = vpop.trf.xlu0 }
 0x506   : > { %1938 = vst.msk [vmem:[%s2531_s22 + $0x48] sm:$0xff] %vm1928_vm12, %v1913_v58 }
 0x509   : > { %v1914_v19 = vpop.trf.xlu0 }
 0x50a   : > { %1939 = vst.msk [vmem:[%s2531_s22 + $0x50] sm:$0xff] %vm1928_vm12, %v1914_v19 }
 0x50d   : > { %v1915_v38 = vpop.trf.xlu0 }
 0x50e   : > { %1940 = vst.msk [vmem:[%s2531_s22 + $0x58] sm:$0xff] %vm1928_vm12, %v1915_v38 }
 0x511   : > { %v1916_v11 = vpop.trf.xlu0 }
 0x512   : > { %1941 = vst.msk [vmem:[%s2531_s22 + $0x60] sm:$0xff] %vm1928_vm12, %v1916_v11 }
 0x515   : > { %v1917_v39 = vpop.trf.xlu0 }
 0x516   : > { %1942 = vst.msk [vmem:[%s2531_s22 + $0x68] sm:$0xff] %vm1928_vm12, %v1917_v39 }
 0x519   : > { %v1918_v40 = vpop.trf.xlu0 }
 0x51a   : > { %1943 = vst.msk [vmem:[%s2531_s22 + $0x70] sm:$0xff] %vm1928_vm12, %v1918_v40 }
 0x51d   : > { %v1919_v44 = vpop.trf.xlu0 }
 0x51e   : > { %1944 = vst.msk [vmem:[%s2531_s22 + $0x78] sm:$0xff] %vm1928_vm12, %v1919_v44 }
 0x521   : > { %v1880_v45 = vpop.trf.xlu1 }
 0x522   : > { %1929 = vst.msk [vmem:[%s2531_s22] sm:$0xff] %vm1928_vm12, %v1880_v45 }
 0x525   : > { %v1881_v41 = vpop.trf.xlu1 }
 0x526   : > { %1930 = vst.msk [vmem:[%s2531_s22 + $0x8] sm:$0xff] %vm1928_vm12, %v1881_v41 }
 0x529   : > { %v1882_v42 = vpop.trf.xlu1 }
 0x52a   : > { %1931 = vst.msk [vmem:[%s2531_s22 + $0x10] sm:$0xff] %vm1928_vm12, %v1882_v42 }
 0x52d   : > { %v1883_v9 = vpop.trf.xlu1 }
 0x52e   : > { %1932 = vst.msk [vmem:[%s2531_s22 + $0x18] sm:$0xff] %vm1928_vm12, %v1883_v9 }
 0x531   : > { %v1884_v47 = vpop.trf.xlu1 }
 0x532   : > { %1933 = vst.msk [vmem:[%s2531_s22 + $0x20] sm:$0xff] %vm1928_vm12, %v1884_v47 }
 0x535   : > { %v1885_v46 = vpop.trf.xlu1 }
 0x536   : > { %1934 = vst.msk [vmem:[%s2531_s22 + $0x28] sm:$0xff] %vm1928_vm12, %v1885_v46 }
 0x539   : > { %v1886_v23 = vpop.trf.xlu1 }
 0x53a   : > { %1935 = vst.msk [vmem:[%s2531_s22 + $0x30] sm:$0xff] %vm1928_vm12, %v1886_v23 }
 0x53d   : > { %v1887_v49 = vpop.trf.xlu1 }
 0x53e   : > { %1936 = vst.msk [vmem:[%s2531_s22 + $0x38] sm:$0xff] %vm1928_vm12, %v1887_v49 }
 0x591   : > { %v2251_v8 = vpop.f32.mrb[2].mxu0 }
 0x592   : > { %v1861_v51 = vadd.f32 %v2398_v0, %v2251_v8  ;;  %v1851_v12 = vpop.f32.mrb[3].mxu0 }
 0x593   : > { %v1860_v54 = vadd.f32 %v2399_v14, %v1851_v12 }
 0x594   : > { %1863 = vst.msk [vmem:[#allocation2 + $0x8] sm:$0xff] %vm661_vm3, %v1861_v51 }
 0x595   : > { %1862 = vst.msk [vmem:[#allocation2] sm:$0xff] %vm661_vm3, %v1860_v54 }
 0x596 PF: > { %s2963_s19 = sld [smem:[#allocation3_spill]] }
 0x59c   : > { %s21_s17 = sadd.s32 1, %s2963_s19  }
 0x59d   : > { %p18_p5 = scmp.ge.s32.totalorder %s21_s17, 4  }
 0x59f   :  { %20 = sbr.rel (!%p18_p5) target bundleno = 2 (0x2), region = 122 }

</bundles_post_ra>
